<compile_context>
chip_gen: v7x
topology: tpu7x:2x2x1
jax: 0.10.0
libtpu: 0.0.40
codegen_flags: <defaults>
</compile_context>

<pallas_src>
import functools
import math

import jax
import jax.numpy as jnp
from jax import lax
from jax.experimental import pallas as pl
from jax.experimental.pallas import tpu as pltpu


def _round_up(v, m):
    return ((v + m - 1) // m) * m


def _make_conv_stats_kernel(*, k, dil, stride, th, w_al, h_out, w_out,
                            c_in_p, c_out_p, mxu_dtype):
    """Kernel 1: fused conv (+bias) on one row tile of TH dense output rows,
    plus masked per-channel sum / sum-of-squares accumulation for InstanceNorm."""

    def kernel(xa_ref, xb_ref, w_ref, b_ref, y_ref, s_ref):
        n_l = pl.program_id(1)

        @pl.when(n_l == 0)
        def _init():
            s_ref[...] = jnp.zeros_like(s_ref)

        bias = b_ref[...].astype(jnp.float32)                       # (c_out_p, 1)

        # Column-validity mask (same for every dense row of this tile).
        cols = lax.broadcasted_iota(jnp.int32, (1, w_al), 1)
        col_valid = cols < (w_out * stride)
        if stride > 1:
            col_valid = col_valid & (cols % stride == 0)

        sum_acc = jnp.zeros((c_out_p, 1), jnp.float32)
        sq_acc = jnp.zeros((c_out_p, 1), jnp.float32)

        for i in range(th):                                          # static unroll
            acc = jnp.zeros((c_out_p, w_al), jnp.float32)
            for kh in range(k):
                rr = i + kh * dil                                    # local input row
                if rr < th:
                    row = xa_ref[0, :, rr, :]
                else:
                    row = xb_ref[0, :, rr - th, :]
                row = row.astype(mxu_dtype)                          # (c_in_p, w_in_row)
                for kw in range(k):
                    xs = row[:, kw * dil:kw * dil + w_al]            # (c_in_p, w_al)
                    wt = w_ref[kh * k + kw].astype(mxu_dtype)        # (c_out_p, c_in_p)
                    acc = acc + jnp.dot(wt, xs,
                                        preferred_element_type=jnp.float32)
            y_row = acc + bias                                       # (c_out_p, w_al)

            # Validity of this dense output row (handles H padding and stride).
            dense_row = n_l * th + i
            row_valid = dense_row < (h_out * stride)
            if stride > 1:
                row_valid = row_valid & (dense_row % stride == 0)
            mask = (col_valid & row_valid).astype(jnp.float32)       # (1, w_al)

            ym = y_row * mask
            sum_acc = sum_acc + jnp.sum(ym, axis=1, keepdims=True)
            sq_acc = sq_acc + jnp.sum(ym * y_row, axis=1, keepdims=True)

            y_ref[0, :, i * w_al:(i + 1) * w_al] = y_row.astype(y_ref.dtype)

        s_ref[0, :, 0:1] = s_ref[0, :, 0:1] + sum_acc
        s_ref[0, :, 1:2] = s_ref[0, :, 1:2] + sq_acc

    return kernel


def _make_norm_gelu_kernel(*, count, eps=1e-5):
    """Kernel 2: InstanceNorm (per-sample, per-channel stats) + exact erf GELU."""
    inv_count = 1.0 / float(count)
    inv_sqrt2 = 1.0 / math.sqrt(2.0)

    def kernel(y_ref, s_ref, o_ref):
        s = s_ref[0].astype(jnp.float32)                             # (c_out_p, 2)
        mean = s[:, 0:1] * inv_count                                 # (c_out_p, 1)
        var = s[:, 1:2] * inv_count - mean * mean                    # biased var
        var = jnp.maximum(var, 0.0)
        inv_std = lax.rsqrt(var + eps)

        y = y_ref[0].astype(jnp.float32)                             # (c_out_p, tile)
        y_n = (y - mean) * inv_std
        g = 0.5 * y_n * (1.0 + lax.erf(y_n * inv_sqrt2))
        o_ref[0] = g.astype(o_ref.dtype)

    return kernel


@functools.partial(
    jax.jit,
    static_argnames=("kernel_size", "stride", "padding", "dilation", "mxu_bf16"))
def basic_conv2d(x, weight, bias, *, kernel_size, stride=1, padding=0, dilation=1,
                 mxu_bf16=False):
    """Forward pass of BasicConv2d with prob=0.0 (Dropout2d is the identity)."""
    # TODO(synk): Dropout2d with prob>0 (channel-wise Bernoulli masking) is not
    # implemented; the module default prob=0.0 makes it the identity.
    n, c_in, h, w = x.shape
    c_out = weight.shape[0]
    k = kernel_size
    d = dilation
    s = stride

    h_out = (h + 2 * padding - d * (k - 1) - 1) // s + 1
    w_out = (w + 2 * padding - d * (k - 1) - 1) // s + 1

    # Dense (stride-1) output grid on the zero-padded image; strided outputs are
    # a subset of it.  (For stride>1 this computes ~s^2 extra positions that are
    # masked out of the stats and sliced away afterwards.)
    h_dense = h + 2 * padding - (k - 1) * d
    w_dense = w + 2 * padding - (k - 1) * d

    c_in_p = _round_up(c_in, 8)
    c_out_p = _round_up(c_out, 8)

    th = max(8, _round_up((k - 1) * d, 8))          # row tile (>= vertical halo)
    n_lt = -(-h_dense // th)                        # number of row tiles
    w_al = _round_up(w_dense, 128)                  # lane-dense dense-output width
    tile = th * w_al

    w_in_row = w_al + (k - 1) * d                   # input row width incl. horiz. taps
    rows_total = (n_lt + 1) * th                    # +1 block so the halo tile exists

    # Pad + lay out the input once: conv zero-padding, channel pad to c_in_p,
    # rows to (n_lt+1)*th, cols to w_al + (k-1)*d.  (~1x input bytes, no k^2 blowup.)
    x_p = jnp.pad(
        x,
        ((0, 0),
         (0, c_in_p - c_in),
         (padding, rows_total - h - padding),
         (padding, w_in_row - w - padding)))
    # x_p: (n, c_in_p, rows_total, w_in_row)

    # Per-tap weight matrices: (k*k, c_out_p, c_in_p), tap index = kh*k + kw.
    w_taps = jnp.transpose(weight, (2, 3, 0, 1)).reshape(k * k, c_out, c_in)
    w_taps = jnp.pad(w_taps, ((0, 0), (0, c_out_p - c_out), (0, c_in_p - c_in)))
    b_col = jnp.pad(bias, (0, c_out_p - c_out)).reshape(c_out_p, 1).astype(jnp.float32)

    mxu_dtype = jnp.bfloat16 if mxu_bf16 else jnp.float32

    # 48 MiB scoped VMEM: above the 16/32 MiB defaults, below v7x's 64 MiB physical.
    vmem_limit = 48 * 1024 * 1024

    conv_kernel = _make_conv_stats_kernel(
        k=k, dil=d, stride=s, th=th, w_al=w_al, h_out=h_out, w_out=w_out,
        c_in_p=c_in_p, c_out_p=c_out_p, mxu_dtype=mxu_dtype)

    # Pass 1: conv + bias per row tile, masked sum / sum-of-squares accumulators.
    y_dense, stats = pl.pallas_call(
        conv_kernel,
        out_shape=(
            jax.ShapeDtypeStruct((n, c_out_p, n_lt * tile), jnp.float32),
            jax.ShapeDtypeStruct((n, c_out_p, 2), jnp.float32),
        ),
        grid_spec=pltpu.PrefetchScalarGridSpec(
            num_scalar_prefetch=0,
            grid=(n, n_lt),
            in_specs=[
                pl.BlockSpec((1, c_in_p, th, w_in_row), lambda i, l: (i, 0, l, 0)),
                pl.BlockSpec((1, c_in_p, th, w_in_row), lambda i, l: (i, 0, l + 1, 0)),
                pl.BlockSpec((k * k, c_out_p, c_in_p), lambda i, l: (0, 0, 0)),
                pl.BlockSpec((c_out_p, 1), lambda i, l: (0, 0)),
            ],
            out_specs=[
                pl.BlockSpec((1, c_out_p, tile), lambda i, l: (i, 0, l)),
                pl.BlockSpec((1, c_out_p, 2), lambda i, l: (i, 0, 0)),
            ],
        ),
        compiler_params=pltpu.CompilerParams(
            dimension_semantics=("parallel", "arbitrary"),
            vmem_limit_bytes=vmem_limit),
    )(x_p, x_p, w_taps, b_col)

    # Pass 2: InstanceNorm + GELU, tile by tile (fully parallel).
    norm_kernel = _make_norm_gelu_kernel(count=h_out * w_out)
    out = pl.pallas_call(
        norm_kernel,
        out_shape=jax.ShapeDtypeStruct((n, c_out_p, n_lt * tile), x.dtype),
        grid_spec=pltpu.PrefetchScalarGridSpec(
            num_scalar_prefetch=0,
            grid=(n, n_lt),
            in_specs=[
                pl.BlockSpec((1, c_out_p, tile), lambda i, l: (i, 0, l)),
                pl.BlockSpec((1, c_out_p, 2), lambda i, l: (i, 0, 0)),
            ],
            out_specs=pl.BlockSpec((1, c_out_p, tile), lambda i, l: (i, 0, l)),
        ),
        compiler_params=pltpu.CompilerParams(
            dimension_semantics=("parallel", "parallel"),
            vmem_limit_bytes=vmem_limit),
    )(y_dense, stats)

    # Dense grid -> NCHW valid outputs: free reshape + slice, no transposes.
    out = out.reshape(n, c_out_p, n_lt * th, w_al)
    out = out[:, :c_out, 0:(h_out - 1) * s + 1:s, 0:(w_out - 1) * s + 1:s]
    return out


def _reference_basic_conv2d(x, weight, bias, *, stride, padding, dilation):
    """Plain-JAX reference matching the PyTorch module (prob=0)."""
    y = lax.conv_general_dilated(
        x, weight,
        window_strides=(stride, stride),
        padding=[(padding, padding), (padding, padding)],
        rhs_dilation=(dilation, dilation),
        dimension_numbers=("NCHW", "OIHW", "NCHW"))
    y = y + bias.reshape(1, -1, 1, 1)
    mean = jnp.mean(y, axis=(2, 3), keepdims=True)
    var = jnp.mean((y - mean) ** 2, axis=(2, 3), keepdims=True)     # biased
    y_n = (y - mean) * lax.rsqrt(var + 1e-5)
    return 0.5 * y_n * (1.0 + lax.erf(y_n / jnp.sqrt(jnp.float32(2.0))))


if __name__ == "__main__":
    # BasicConv2d(in_planes=4, out_planes=8, kernel_size=3, stride=1, padding=1)
    key = jax.random.PRNGKey(0)
    k_x, k_w, k_b = jax.random.split(key, 3)

    N, C_in, H, W = 2, 4, 16, 16
    C_out, K = 8, 3

    x = jax.random.normal(k_x, (N, C_in, H, W), dtype=jnp.float32)

    fan_in = C_in * K * K
    bound = 1.0 / math.sqrt(fan_in)
    weight = jax.random.uniform(k_w, (C_out, C_in, K, K), jnp.float32, -bound, bound)
    bias = jax.random.uniform(k_b, (C_out,), jnp.float32, -bound, bound)

    y = basic_conv2d(x, weight, bias, kernel_size=K, stride=1, padding=1, dilation=1)
    jax.block_until_ready(y)
    assert y.shape == (N, C_out, H, W), y.shape

    y_ref = _reference_basic_conv2d(x, weight, bias, stride=1, padding=1, dilation=1)
    max_err = float(jnp.max(jnp.abs(y - y_ref)))
    assert max_err < 1e-2, f"max abs error vs reference: {max_err}"

    print("KERNEL_OK")
</pallas_src>

<mosaic_0001>
module attributes {stable_mosaic.version = 11 : i64} {
  func.func @kernel(%arg0: i32, %arg1: i32, %arg2: memref<1x8x1024xf32, #tpu.memory_space<vmem>>, %arg3: memref<1x8x2xf32, #tpu.memory_space<vmem>>, %arg4: memref<1x8x1024xf32, #tpu.memory_space<vmem>>) attributes {dimension_semantics = [#tpu.dimension_semantics<parallel>, #tpu.dimension_semantics<parallel>], iteration_bounds = array<i64: 2, 2>, scalar_prefetch = 0 : i64, scratch_operands = 0 : i64, tpu.core_type = #tpu.core_type<tc>, window_params = [{transform_indices = @transform_0, window_bounds = array<i64: 1, 8, 1024>}, {transform_indices = @transform_1, window_bounds = array<i64: 1, 8, 2>}, {transform_indices = @transform_2, window_bounds = array<i64: 1, 8, 1024>}]} {
    %c0 = arith.constant 0 : index
    %c0_0 = arith.constant 0 : index
    %c0_1 = arith.constant 0 : index
    %0 = vector.load %arg3[%c0, %c0_0, %c0_1] : memref<1x8x2xf32, #tpu.memory_space<vmem>>, vector<1x8x2xf32>
    %1 = vector.shape_cast %0 : vector<1x8x2xf32> to vector<8x2xf32>
    %2 = vector.extract_strided_slice %1 {offsets = [0, 0], sizes = [8, 1], strides = [1, 1]} : vector<8x2xf32> to vector<8x1xf32>
    %cst = arith.constant 3.906250e-03 : f32
    %3 = vector.broadcast %cst : f32 to vector<8x1xf32>
    %4 = arith.mulf %2, %3 : vector<8x1xf32>
    %5 = vector.extract_strided_slice %1 {offsets = [0, 1], sizes = [8, 1], strides = [1, 1]} : vector<8x2xf32> to vector<8x1xf32>
    %cst_2 = arith.constant 3.906250e-03 : f32
    %6 = vector.broadcast %cst_2 : f32 to vector<8x1xf32>
    %7 = arith.mulf %5, %6 : vector<8x1xf32>
    %8 = arith.mulf %4, %4 : vector<8x1xf32>
    %9 = arith.subf %7, %8 : vector<8x1xf32>
    %cst_3 = arith.constant 0.000000e+00 : f32
    %10 = vector.broadcast %cst_3 : f32 to vector<8x1xf32>
    %11 = arith.maximumf %9, %10 : vector<8x1xf32>
    %cst_4 = arith.constant 9.99999974E-6 : f32
    %12 = vector.broadcast %cst_4 : f32 to vector<8x1xf32>
    %13 = arith.addf %11, %12 : vector<8x1xf32>
    %14 = math.rsqrt %13 : vector<8x1xf32>
    %c0_5 = arith.constant 0 : index
    %c0_6 = arith.constant 0 : index
    %c0_7 = arith.constant 0 : index
    %15 = vector.load %arg2[%c0_5, %c0_6, %c0_7] : memref<1x8x1024xf32, #tpu.memory_space<vmem>>, vector<1x8x1024xf32>
    %16 = vector.shape_cast %15 : vector<1x8x1024xf32> to vector<8x1024xf32>
    %17 = vector.broadcast %4 : vector<8x1xf32> to vector<8x1024xf32>
    %18 = arith.subf %16, %17 : vector<8x1024xf32>
    %19 = vector.broadcast %14 : vector<8x1xf32> to vector<8x1024xf32>
    %20 = arith.mulf %18, %19 : vector<8x1024xf32>
    %cst_8 = arith.constant 5.000000e-01 : f32
    %21 = vector.broadcast %cst_8 : f32 to vector<8x1024xf32>
    %22 = arith.mulf %21, %20 : vector<8x1024xf32>
    %cst_9 = arith.constant 0.707106769 : f32
    %23 = vector.broadcast %cst_9 : f32 to vector<8x1024xf32>
    %24 = arith.mulf %20, %23 : vector<8x1024xf32>
    %25 = math.erf %24 : vector<8x1024xf32>
    %cst_10 = arith.constant 1.000000e+00 : f32
    %26 = vector.broadcast %cst_10 : f32 to vector<8x1024xf32>
    %27 = arith.addf %26, %25 : vector<8x1024xf32>
    %28 = arith.mulf %22, %27 : vector<8x1024xf32>
    %c0_11 = arith.constant 0 : index
    %c0_12 = arith.constant 0 : index
    %c0_13 = arith.constant 0 : index
    %29 = vector.load %arg4[%c0_11, %c0_12, %c0_13] : memref<1x8x1024xf32, #tpu.memory_space<vmem>>, vector<1x8x1024xf32>
    %30 = vector.shape_cast %29 : vector<1x8x1024xf32> to vector<8x1024xf32>
    %31 = vector.shape_cast %28 : vector<8x1024xf32> to vector<1x8x1024xf32>
    tpu.vector_store %arg4[%c0_11, %c0_12, %c0_13], %31 {strides = array<i32>} : memref<1x8x1024xf32, #tpu.memory_space<vmem>>, vector<1x8x1024xf32>,
    return
  }
  func.func @transform_0(%arg0: i32, %arg1: i32) -> (i32, i32, i32) {
    %c0_i32 = arith.constant 0 : i32
    %c0_i32_0 = arith.constant 0 : i32
    return %arg0, %c0_i32, %arg1 : i32, i32, i32
  }
  func.func @transform_1(%arg0: i32, %arg1: i32) -> (i32, i32, i32) {
    %c0_i32 = arith.constant 0 : i32
    %c0_i32_0 = arith.constant 0 : i32
    %c0_i32_1 = arith.constant 0 : i32
    return %arg0, %c0_i32, %c0_i32_0 : i32, i32, i32
  }
  func.func @transform_2(%arg0: i32, %arg1: i32) -> (i32, i32, i32) {
    %c0_i32 = arith.constant 0 : i32
    %c0_i32_0 = arith.constant 0 : i32
    return %arg0, %c0_i32, %arg1 : i32, i32, i32
  }
}

module attributes {stable_mosaic.version = 11 : i64} {
  func.func @kernel(%arg0: i32, %arg1: i32, %arg2: memref<1x8x8x130xf32, #tpu.memory_space<vmem>>, %arg3: memref<1x8x8x130xf32, #tpu.memory_space<vmem>>, %arg4: memref<9x8x8xf32, #tpu.memory_space<vmem>>, %arg5: memref<8x1xf32, #tpu.memory_space<vmem>>, %arg6: memref<1x8x1024xf32, #tpu.memory_space<vmem>>, %arg7: memref<1x8x2xf32, #tpu.memory_space<vmem>>) attributes {dimension_semantics = [#tpu.dimension_semantics<parallel>, #tpu.dimension_semantics<arbitrary>], iteration_bounds = array<i64: 2, 2>, scalar_prefetch = 0 : i64, scratch_operands = 0 : i64, tpu.core_type = #tpu.core_type<tc>, window_params = [{transform_indices = @transform_0, window_bounds = array<i64: 1, 8, 8, 130>}, {transform_indices = @transform_1, window_bounds = array<i64: 1, 8, 8, 130>}, {pipeline_mode = #tpu.pipeline_mode<synchronous>, transform_indices = @transform_2, window_bounds = array<i64: 9, 8, 8>}, {pipeline_mode = #tpu.pipeline_mode<synchronous>, transform_indices = @transform_3, window_bounds = array<i64: 8, 1>}, {transform_indices = @transform_4, window_bounds = array<i64: 1, 8, 1024>}, {transform_indices = @transform_5, window_bounds = array<i64: 1, 8, 2>}]} {
    %c0_i32 = arith.constant 0 : i32
    %0 = arith.cmpi eq, %arg1, %c0_i32 : i32
    %1 = arith.extui %0 : i1 to i32
    %c0_i32_0 = arith.constant 0 : i32
    %2 = arith.cmpi ne, %1, %c0_i32_0 : i32
    scf.if %2 {
      %cst_448 = arith.constant 0.000000e+00 : f32
      %605 = vector.broadcast %cst_448 : f32 to vector<1x8x2xf32>
      %c0_449 = arith.constant 0 : index
      %c0_450 = arith.constant 0 : index
      %c0_451 = arith.constant 0 : index
      %606 = vector.load %arg7[%c0_449, %c0_450, %c0_451] : memref<1x8x2xf32, #tpu.memory_space<vmem>>, vector<1x8x2xf32>
      tpu.vector_store %arg7[%c0_449, %c0_450, %c0_451], %605 {strides = array<i32>} : memref<1x8x2xf32, #tpu.memory_space<vmem>>, vector<1x8x2xf32>,
    } else {
    }
    %c0 = arith.constant 0 : index
    %c0_1 = arith.constant 0 : index
    %3 = vector.load %arg5[%c0, %c0_1] : memref<8x1xf32, #tpu.memory_space<vmem>>, vector<8x1xf32>
    %4 = tpu.iota {dimensions = array<i32: 1>} : vector<1x128xi32>
    %c16_i32 = arith.constant 16 : i32
    %5 = vector.broadcast %c16_i32 : i32 to vector<1x128xi32>
    %6 = arith.cmpi slt, %4, %5 : vector<1x128xi32>
    %cst = arith.constant 0.000000e+00 : f32
    %7 = vector.broadcast %cst : f32 to vector<8x1xf32>
    %cst_2 = arith.constant 0.000000e+00 : f32
    %8 = vector.broadcast %cst_2 : f32 to vector<8x1xf32>
    %cst_3 = arith.constant 0.000000e+00 : f32
    %9 = vector.broadcast %cst_3 : f32 to vector<8x128xf32>
    %c0_4 = arith.constant 0 : index
    %c0_5 = arith.constant 0 : index
    %c0_6 = arith.constant 0 : index
    %c0_7 = arith.constant 0 : index
    %10 = vector.load %arg2[%c0_4, %c0_5, %c0_6, %c0_7] : memref<1x8x8x130xf32, #tpu.memory_space<vmem>>, vector<1x8x1x130xf32>
    %11 = vector.shape_cast %10 : vector<1x8x1x130xf32> to vector<8x130xf32>
    %12 = vector.extract_strided_slice %11 {offsets = [0, 0], sizes = [8, 128], strides = [1, 1]} : vector<8x130xf32> to vector<8x128xf32>
    %c0_8 = arith.constant 0 : index
    %c0_9 = arith.constant 0 : index
    %c0_10 = arith.constant 0 : index
    %13 = vector.load %arg4[%c0_8, %c0_9, %c0_10] : memref<9x8x8xf32, #tpu.memory_space<vmem>>, vector<1x8x8xf32>
    %14 = vector.shape_cast %13 : vector<1x8x8xf32> to vector<8x8xf32>
    %cst_11 = arith.constant dense<0.000000e+00> : vector<8x128xf32>
    %15 = tpu.matmul %14, %12, %cst_11 {dimension_numbers = #tpu.dot_dimension_numbers<[1], [0], [0], [1], [0, 0, 1, 1], [], []>} : vector<8x8xf32>, vector<8x128xf32>, vector<8x128xf32> -> vector<8x128xf32>
    %16 = arith.addf %9, %15 : vector<8x128xf32>
    %17 = vector.extract_strided_slice %11 {offsets = [0, 1], sizes = [8, 128], strides = [1, 1]} : vector<8x130xf32> to vector<8x128xf32>
    %c1 = arith.constant 1 : index
    %c0_12 = arith.constant 0 : index
    %c0_13 = arith.constant 0 : index
    %18 = vector.load %arg4[%c1, %c0_12, %c0_13] : memref<9x8x8xf32, #tpu.memory_space<vmem>>, vector<1x8x8xf32>
    %19 = vector.shape_cast %18 : vector<1x8x8xf32> to vector<8x8xf32>
    %cst_14 = arith.constant dense<0.000000e+00> : vector<8x128xf32>
    %20 = tpu.matmul %19, %17, %cst_14 {dimension_numbers = #tpu.dot_dimension_numbers<[1], [0], [0], [1], [0, 0, 1, 1], [], []>} : vector<8x8xf32>, vector<8x128xf32>, vector<8x128xf32> -> vector<8x128xf32>
    %21 = arith.addf %16, %20 : vector<8x128xf32>
    %22 = vector.extract_strided_slice %11 {offsets = [0, 2], sizes = [8, 128], strides = [1, 1]} : vector<8x130xf32> to vector<8x128xf32>
    %c2 = arith.constant 2 : index
    %c0_15 = arith.constant 0 : index
    %c0_16 = arith.constant 0 : index
    %23 = vector.load %arg4[%c2, %c0_15, %c0_16] : memref<9x8x8xf32, #tpu.memory_space<vmem>>, vector<1x8x8xf32>
    %24 = vector.shape_cast %23 : vector<1x8x8xf32> to vector<8x8xf32>
    %cst_17 = arith.constant dense<0.000000e+00> : vector<8x128xf32>
    %25 = tpu.matmul %24, %22, %cst_17 {dimension_numbers = #tpu.dot_dimension_numbers<[1], [0], [0], [1], [0, 0, 1, 1], [], []>} : vector<8x8xf32>, vector<8x128xf32>, vector<8x128xf32> -> vector<8x128xf32>
    %26 = arith.addf %21, %25 : vector<8x128xf32>
    %c0_18 = arith.constant 0 : index
    %c0_19 = arith.constant 0 : index
    %c1_20 = arith.constant 1 : index
    %c0_21 = arith.constant 0 : index
    %27 = vector.load %arg2[%c0_18, %c0_19, %c1_20, %c0_21] : memref<1x8x8x130xf32, #tpu.memory_space<vmem>>, vector<1x8x1x130xf32>
    %28 = vector.shape_cast %27 : vector<1x8x1x130xf32> to vector<8x130xf32>
    %29 = vector.extract_strided_slice %28 {offsets = [0, 0], sizes = [8, 128], strides = [1, 1]} : vector<8x130xf32> to vector<8x128xf32>
    %c3 = arith.constant 3 : index
    %c0_22 = arith.constant 0 : index
    %c0_23 = arith.constant 0 : index
    %30 = vector.load %arg4[%c3, %c0_22, %c0_23] : memref<9x8x8xf32, #tpu.memory_space<vmem>>, vector<1x8x8xf32>
    %31 = vector.shape_cast %30 : vector<1x8x8xf32> to vector<8x8xf32>
    %cst_24 = arith.constant dense<0.000000e+00> : vector<8x128xf32>
    %32 = tpu.matmul %31, %29, %cst_24 {dimension_numbers = #tpu.dot_dimension_numbers<[1], [0], [0], [1], [0, 0, 1, 1], [], []>} : vector<8x8xf32>, vector<8x128xf32>, vector<8x128xf32> -> vector<8x128xf32>
    %33 = arith.addf %26, %32 : vector<8x128xf32>
    %34 = vector.extract_strided_slice %28 {offsets = [0, 1], sizes = [8, 128], strides = [1, 1]} : vector<8x130xf32> to vector<8x128xf32>
    %c4 = arith.constant 4 : index
    %c0_25 = arith.constant 0 : index
    %c0_26 = arith.constant 0 : index
    %35 = vector.load %arg4[%c4, %c0_25, %c0_26] : memref<9x8x8xf32, #tpu.memory_space<vmem>>, vector<1x8x8xf32>
    %36 = vector.shape_cast %35 : vector<1x8x8xf32> to vector<8x8xf32>
    %cst_27 = arith.constant dense<0.000000e+00> : vector<8x128xf32>
    %37 = tpu.matmul %36, %34, %cst_27 {dimension_numbers = #tpu.dot_dimension_numbers<[1], [0], [0], [1], [0, 0, 1, 1], [], []>} : vector<8x8xf32>, vector<8x128xf32>, vector<8x128xf32> -> vector<8x128xf32>
    %38 = arith.addf %33, %37 : vector<8x128xf32>
    %39 = vector.extract_strided_slice %28 {offsets = [0, 2], sizes = [8, 128], strides = [1, 1]} : vector<8x130xf32> to vector<8x128xf32>
    %c5 = arith.constant 5 : index
    %c0_28 = arith.constant 0 : index
    %c0_29 = arith.constant 0 : index
    %40 = vector.load %arg4[%c5, %c0_28, %c0_29] : memref<9x8x8xf32, #tpu.memory_space<vmem>>, vector<1x8x8xf32>
    %41 = vector.shape_cast %40 : vector<1x8x8xf32> to vector<8x8xf32>
    %cst_30 = arith.constant dense<0.000000e+00> : vector<8x128xf32>
    %42 = tpu.matmul %41, %39, %cst_30 {dimension_numbers = #tpu.dot_dimension_numbers<[1], [0], [0], [1], [0, 0, 1, 1], [], []>} : vector<8x8xf32>, vector<8x128xf32>, vector<8x128xf32> -> vector<8x128xf32>
    %43 = arith.addf %38, %42 : vector<8x128xf32>
    %c0_31 = arith.constant 0 : index
    %c0_32 = arith.constant 0 : index
    %c2_33 = arith.constant 2 : index
    %c0_34 = arith.constant 0 : index
    %44 = vector.load %arg2[%c0_31, %c0_32, %c2_33, %c0_34] : memref<1x8x8x130xf32, #tpu.memory_space<vmem>>, vector<1x8x1x130xf32>
    %45 = vector.shape_cast %44 : vector<1x8x1x130xf32> to vector<8x130xf32>
    %46 = vector.extract_strided_slice %45 {offsets = [0, 0], sizes = [8, 128], strides = [1, 1]} : vector<8x130xf32> to vector<8x128xf32>
    %c6 = arith.constant 6 : index
    %c0_35 = arith.constant 0 : index
    %c0_36 = arith.constant 0 : index
    %47 = vector.load %arg4[%c6, %c0_35, %c0_36] : memref<9x8x8xf32, #tpu.memory_space<vmem>>, vector<1x8x8xf32>
    %48 = vector.shape_cast %47 : vector<1x8x8xf32> to vector<8x8xf32>
    %cst_37 = arith.constant dense<0.000000e+00> : vector<8x128xf32>
    %49 = tpu.matmul %48, %46, %cst_37 {dimension_numbers = #tpu.dot_dimension_numbers<[1], [0], [0], [1], [0, 0, 1, 1], [], []>} : vector<8x8xf32>, vector<8x128xf32>, vector<8x128xf32> -> vector<8x128xf32>
    %50 = arith.addf %43, %49 : vector<8x128xf32>
    %51 = vector.extract_strided_slice %45 {offsets = [0, 1], sizes = [8, 128], strides = [1, 1]} : vector<8x130xf32> to vector<8x128xf32>
    %c7 = arith.constant 7 : index
    %c0_38 = arith.constant 0 : index
    %c0_39 = arith.constant 0 : index
    %52 = vector.load %arg4[%c7, %c0_38, %c0_39] : memref<9x8x8xf32, #tpu.memory_space<vmem>>, vector<1x8x8xf32>
    %53 = vector.shape_cast %52 : vector<1x8x8xf32> to vector<8x8xf32>
    %cst_40 = arith.constant dense<0.000000e+00> : vector<8x128xf32>
    %54 = tpu.matmul %53, %51, %cst_40 {dimension_numbers = #tpu.dot_dimension_numbers<[1], [0], [0], [1], [0, 0, 1, 1], [], []>} : vector<8x8xf32>, vector<8x128xf32>, vector<8x128xf32> -> vector<8x128xf32>
    %55 = arith.addf %50, %54 : vector<8x128xf32>
    %56 = vector.extract_strided_slice %45 {offsets = [0, 2], sizes = [8, 128], strides = [1, 1]} : vector<8x130xf32> to vector<8x128xf32>
    %c8 = arith.constant 8 : index
    %c0_41 = arith.constant 0 : index
    %c0_42 = arith.constant 0 : index
    %57 = vector.load %arg4[%c8, %c0_41, %c0_42] : memref<9x8x8xf32, #tpu.memory_space<vmem>>, vector<1x8x8xf32>
    %58 = vector.shape_cast %57 : vector<1x8x8xf32> to vector<8x8xf32>
    %cst_43 = arith.constant dense<0.000000e+00> : vector<8x128xf32>
    %59 = tpu.matmul %58, %56, %cst_43 {dimension_numbers = #tpu.dot_dimension_numbers<[1], [0], [0], [1], [0, 0, 1, 1], [], []>} : vector<8x8xf32>, vector<8x128xf32>, vector<8x128xf32> -> vector<8x128xf32>
    %60 = arith.addf %55, %59 : vector<8x128xf32>
    %61 = vector.broadcast %3 : vector<8x1xf32> to vector<8x128xf32>
    %62 = arith.addf %60, %61 : vector<8x128xf32>
    %c8_i32 = arith.constant 8 : i32
    %63 = arith.muli %arg1, %c8_i32 : i32
    %c0_i32_44 = arith.constant 0 : i32
    %64 = arith.addi %63, %c0_i32_44 : i32
    %c16_i32_45 = arith.constant 16 : i32
    %65 = arith.cmpi slt, %64, %c16_i32_45 : i32
    %66 = vector.broadcast %65 : i1 to vector<1x128xi1>
    %67 = arith.andi %6, %66 : vector<1x128xi1>
    %68 = arith.extui %67 : vector<1x128xi1> to vector<1x128xi32>
    %69 = arith.sitofp %68 : vector<1x128xi32> to vector<1x128xf32>
    %70 = vector.broadcast %69 : vector<1x128xf32> to vector<8x128xf32>
    %71 = arith.mulf %62, %70 : vector<8x128xf32>
    %cst_46 = arith.constant dense<0.000000e+00> : vector<8xf32>
    %72 = vector.multi_reduction <add>, %71, %cst_46 [1] : vector<8x128xf32> to vector<8xf32>
    %73 = vector.shape_cast %72 : vector<8xf32> to vector<8x1xf32>
    %74 = arith.addf %7, %73 : vector<8x1xf32>
    %75 = arith.mulf %71, %62 : vector<8x128xf32>
    %cst_47 = arith.constant dense<0.000000e+00> : vector<8xf32>
    %76 = vector.multi_reduction <add>, %75, %cst_47 [1] : vector<8x128xf32> to vector<8xf32>
    %77 = vector.shape_cast %76 : vector<8xf32> to vector<8x1xf32>
    %78 = arith.addf %8, %77 : vector<8x1xf32>
    %c0_48 = arith.constant 0 : index
    %c0_49 = arith.constant 0 : index
    %c0_50 = arith.constant 0 : index
    %79 = vector.load %arg6[%c0_48, %c0_49, %c0_50] : memref<1x8x1024xf32, #tpu.memory_space<vmem>>, vector<1x8x128xf32>
    %80 = vector.shape_cast %79 : vector<1x8x128xf32> to vector<8x128xf32>
    %81 = vector.shape_cast %62 : vector<8x128xf32> to vector<1x8x128xf32>
    tpu.vector_store %arg6[%c0_48, %c0_49, %c0_50], %81 {strides = array<i32>} : memref<1x8x1024xf32, #tpu.memory_space<vmem>>, vector<1x8x128xf32>,
    %cst_51 = arith.constant 0.000000e+00 : f32
    %82 = vector.broadcast %cst_51 : f32 to vector<8x128xf32>
    %c0_52 = arith.constant 0 : index
    %c0_53 = arith.constant 0 : index
    %c1_54 = arith.constant 1 : index
    %c0_55 = arith.constant 0 : index
    %83 = vector.load %arg2[%c0_52, %c0_53, %c1_54, %c0_55] : memref<1x8x8x130xf32, #tpu.memory_space<vmem>>, vector<1x8x1x130xf32>
    %84 = vector.shape_cast %83 : vector<1x8x1x130xf32> to vector<8x130xf32>
    %85 = vector.extract_strided_slice %84 {offsets = [0, 0], sizes = [8, 128], strides = [1, 1]} : vector<8x130xf32> to vector<8x128xf32>
    %c0_56 = arith.constant 0 : index
    %c0_57 = arith.constant 0 : index
    %c0_58 = arith.constant 0 : index
    %86 = vector.load %arg4[%c0_56, %c0_57, %c0_58] : memref<9x8x8xf32, #tpu.memory_space<vmem>>, vector<1x8x8xf32>
    %87 = vector.shape_cast %86 : vector<1x8x8xf32> to vector<8x8xf32>
    %cst_59 = arith.constant dense<0.000000e+00> : vector<8x128xf32>
    %88 = tpu.matmul %87, %85, %cst_59 {dimension_numbers = #tpu.dot_dimension_numbers<[1], [0], [0], [1], [0, 0, 1, 1], [], []>} : vector<8x8xf32>, vector<8x128xf32>, vector<8x128xf32> -> vector<8x128xf32>
    %89 = arith.addf %82, %88 : vector<8x128xf32>
    %90 = vector.extract_strided_slice %84 {offsets = [0, 1], sizes = [8, 128], strides = [1, 1]} : vector<8x130xf32> to vector<8x128xf32>
    %c1_60 = arith.constant 1 : index
    %c0_61 = arith.constant 0 : index
    %c0_62 = arith.constant 0 : index
    %91 = vector.load %arg4[%c1_60, %c0_61, %c0_62] : memref<9x8x8xf32, #tpu.memory_space<vmem>>, vector<1x8x8xf32>
    %92 = vector.shape_cast %91 : vector<1x8x8xf32> to vector<8x8xf32>
    %cst_63 = arith.constant dense<0.000000e+00> : vector<8x128xf32>
    %93 = tpu.matmul %92, %90, %cst_63 {dimension_numbers = #tpu.dot_dimension_numbers<[1], [0], [0], [1], [0, 0, 1, 1], [], []>} : vector<8x8xf32>, vector<8x128xf32>, vector<8x128xf32> -> vector<8x128xf32>
    %94 = arith.addf %89, %93 : vector<8x128xf32>
    %95 = vector.extract_strided_slice %84 {offsets = [0, 2], sizes = [8, 128], strides = [1, 1]} : vector<8x130xf32> to vector<8x128xf32>
    %c2_64 = arith.constant 2 : index
    %c0_65 = arith.constant 0 : index
    %c0_66 = arith.constant 0 : index
    %96 = vector.load %arg4[%c2_64, %c0_65, %c0_66] : memref<9x8x8xf32, #tpu.memory_space<vmem>>, vector<1x8x8xf32>
    %97 = vector.shape_cast %96 : vector<1x8x8xf32> to vector<8x8xf32>
    %cst_67 = arith.constant dense<0.000000e+00> : vector<8x128xf32>
    %98 = tpu.matmul %97, %95, %cst_67 {dimension_numbers = #tpu.dot_dimension_numbers<[1], [0], [0], [1], [0, 0, 1, 1], [], []>} : vector<8x8xf32>, vector<8x128xf32>, vector<8x128xf32> -> vector<8x128xf32>
    %99 = arith.addf %94, %98 : vector<8x128xf32>
    %c0_68 = arith.constant 0 : index
    %c0_69 = arith.constant 0 : index
    %c2_70 = arith.constant 2 : index
    %c0_71 = arith.constant 0 : index
    %100 = vector.load %arg2[%c0_68, %c0_69, %c2_70, %c0_71] : memref<1x8x8x130xf32, #tpu.memory_space<vmem>>, vector<1x8x1x130xf32>
    %101 = vector.shape_cast %100 : vector<1x8x1x130xf32> to vector<8x130xf32>
    %102 = vector.extract_strided_slice %101 {offsets = [0, 0], sizes = [8, 128], strides = [1, 1]} : vector<8x130xf32> to vector<8x128xf32>
    %c3_72 = arith.constant 3 : index
    %c0_73 = arith.constant 0 : index
    %c0_74 = arith.constant 0 : index
    %103 = vector.load %arg4[%c3_72, %c0_73, %c0_74] : memref<9x8x8xf32, #tpu.memory_space<vmem>>, vector<1x8x8xf32>
    %104 = vector.shape_cast %103 : vector<1x8x8xf32> to vector<8x8xf32>
    %cst_75 = arith.constant dense<0.000000e+00> : vector<8x128xf32>
    %105 = tpu.matmul %104, %102, %cst_75 {dimension_numbers = #tpu.dot_dimension_numbers<[1], [0], [0], [1], [0, 0, 1, 1], [], []>} : vector<8x8xf32>, vector<8x128xf32>, vector<8x128xf32> -> vector<8x128xf32>
    %106 = arith.addf %99, %105 : vector<8x128xf32>
    %107 = vector.extract_strided_slice %101 {offsets = [0, 1], sizes = [8, 128], strides = [1, 1]} : vector<8x130xf32> to vector<8x128xf32>
    %c4_76 = arith.constant 4 : index
    %c0_77 = arith.constant 0 : index
    %c0_78 = arith.constant 0 : index
    %108 = vector.load %arg4[%c4_76, %c0_77, %c0_78] : memref<9x8x8xf32, #tpu.memory_space<vmem>>, vector<1x8x8xf32>
    %109 = vector.shape_cast %108 : vector<1x8x8xf32> to vector<8x8xf32>
    %cst_79 = arith.constant dense<0.000000e+00> : vector<8x128xf32>
    %110 = tpu.matmul %109, %107, %cst_79 {dimension_numbers = #tpu.dot_dimension_numbers<[1], [0], [0], [1], [0, 0, 1, 1], [], []>} : vector<8x8xf32>, vector<8x128xf32>, vector<8x128xf32> -> vector<8x128xf32>
    %111 = arith.addf %106, %110 : vector<8x128xf32>
    %112 = vector.extract_strided_slice %101 {offsets = [0, 2], sizes = [8, 128], strides = [1, 1]} : vector<8x130xf32> to vector<8x128xf32>
    %c5_80 = arith.constant 5 : index
    %c0_81 = arith.constant 0 : index
    %c0_82 = arith.constant 0 : index
    %113 = vector.load %arg4[%c5_80, %c0_81, %c0_82] : memref<9x8x8xf32, #tpu.memory_space<vmem>>, vector<1x8x8xf32>
    %114 = vector.shape_cast %113 : vector<1x8x8xf32> to vector<8x8xf32>
    %cst_83 = arith.constant dense<0.000000e+00> : vector<8x128xf32>
    %115 = tpu.matmul %114, %112, %cst_83 {dimension_numbers = #tpu.dot_dimension_numbers<[1], [0], [0], [1], [0, 0, 1, 1], [], []>} : vector<8x8xf32>, vector<8x128xf32>, vector<8x128xf32> -> vector<8x128xf32>
    %116 = arith.addf %111, %115 : vector<8x128xf32>
    %c0_84 = arith.constant 0 : index
    %c0_85 = arith.constant 0 : index
    %c3_86 = arith.constant 3 : index
    %c0_87 = arith.constant 0 : index
    %117 = vector.load %arg2[%c0_84, %c0_85, %c3_86, %c0_87] : memref<1x8x8x130xf32, #tpu.memory_space<vmem>>, vector<1x8x1x130xf32>
    %118 = vector.shape_cast %117 : vector<1x8x1x130xf32> to vector<8x130xf32>
    %119 = vector.extract_strided_slice %118 {offsets = [0, 0], sizes = [8, 128], strides = [1, 1]} : vector<8x130xf32> to vector<8x128xf32>
    %c6_88 = arith.constant 6 : index
    %c0_89 = arith.constant 0 : index
    %c0_90 = arith.constant 0 : index
    %120 = vector.load %arg4[%c6_88, %c0_89, %c0_90] : memref<9x8x8xf32, #tpu.memory_space<vmem>>, vector<1x8x8xf32>
    %121 = vector.shape_cast %120 : vector<1x8x8xf32> to vector<8x8xf32>
    %cst_91 = arith.constant dense<0.000000e+00> : vector<8x128xf32>
    %122 = tpu.matmul %121, %119, %cst_91 {dimension_numbers = #tpu.dot_dimension_numbers<[1], [0], [0], [1], [0, 0, 1, 1], [], []>} : vector<8x8xf32>, vector<8x128xf32>, vector<8x128xf32> -> vector<8x128xf32>
    %123 = arith.addf %116, %122 : vector<8x128xf32>
    %124 = vector.extract_strided_slice %118 {offsets = [0, 1], sizes = [8, 128], strides = [1, 1]} : vector<8x130xf32> to vector<8x128xf32>
    %c7_92 = arith.constant 7 : index
    %c0_93 = arith.constant 0 : index
    %c0_94 = arith.constant 0 : index
    %125 = vector.load %arg4[%c7_92, %c0_93, %c0_94] : memref<9x8x8xf32, #tpu.memory_space<vmem>>, vector<1x8x8xf32>
    %126 = vector.shape_cast %125 : vector<1x8x8xf32> to vector<8x8xf32>
    %cst_95 = arith.constant dense<0.000000e+00> : vector<8x128xf32>
    %127 = tpu.matmul %126, %124, %cst_95 {dimension_numbers = #tpu.dot_dimension_numbers<[1], [0], [0], [1], [0, 0, 1, 1], [], []>} : vector<8x8xf32>, vector<8x128xf32>, vector<8x128xf32> -> vector<8x128xf32>
    %128 = arith.addf %123, %127 : vector<8x128xf32>
    %129 = vector.extract_strided_slice %118 {offsets = [0, 2], sizes = [8, 128], strides = [1, 1]} : vector<8x130xf32> to vector<8x128xf32>
    %c8_96 = arith.constant 8 : index
    %c0_97 = arith.constant 0 : index
    %c0_98 = arith.constant 0 : index
    %130 = vector.load %arg4[%c8_96, %c0_97, %c0_98] : memref<9x8x8xf32, #tpu.memory_space<vmem>>, vector<1x8x8xf32>
    %131 = vector.shape_cast %130 : vector<1x8x8xf32> to vector<8x8xf32>
    %cst_99 = arith.constant dense<0.000000e+00> : vector<8x128xf32>
    %132 = tpu.matmul %131, %129, %cst_99 {dimension_numbers = #tpu.dot_dimension_numbers<[1], [0], [0], [1], [0, 0, 1, 1], [], []>} : vector<8x8xf32>, vector<8x128xf32>, vector<8x128xf32> -> vector<8x128xf32>
    %133 = arith.addf %128, %132 : vector<8x128xf32>
    %134 = vector.broadcast %3 : vector<8x1xf32> to vector<8x128xf32>
    %135 = arith.addf %133, %134 : vector<8x128xf32>
    %c8_i32_100 = arith.constant 8 : i32
    %136 = arith.muli %arg1, %c8_i32_100 : i32
    %c1_i32 = arith.constant 1 : i32
    %137 = arith.addi %136, %c1_i32 : i32
    %c16_i32_101 = arith.constant 16 : i32
    %138 = arith.cmpi slt, %137, %c16_i32_101 : i32
    %139 = vector.broadcast %138 : i1 to vector<1x128xi1>
    %140 = arith.andi %6, %139 : vector<1x128xi1>
    %141 = arith.extui %140 : vector<1x128xi1> to vector<1x128xi32>
    %142 = arith.sitofp %141 : vector<1x128xi32> to vector<1x128xf32>
    %143 = vector.broadcast %142 : vector<1x128xf32> to vector<8x128xf32>
    %144 = arith.mulf %135, %143 : vector<8x128xf32>
    %cst_102 = arith.constant dense<0.000000e+00> : vector<8xf32>
    %145 = vector.multi_reduction <add>, %144, %cst_102 [1] : vector<8x128xf32> to vector<8xf32>
    %146 = vector.shape_cast %145 : vector<8xf32> to vector<8x1xf32>
    %147 = arith.addf %74, %146 : vector<8x1xf32>
    %148 = arith.mulf %144, %135 : vector<8x128xf32>
    %cst_103 = arith.constant dense<0.000000e+00> : vector<8xf32>
    %149 = vector.multi_reduction <add>, %148, %cst_103 [1] : vector<8x128xf32> to vector<8xf32>
    %150 = vector.shape_cast %149 : vector<8xf32> to vector<8x1xf32>
    %151 = arith.addf %78, %150 : vector<8x1xf32>
    %c0_104 = arith.constant 0 : index
    %c0_105 = arith.constant 0 : index
    %c128 = arith.constant 128 : index
    %152 = vector.load %arg6[%c0_104, %c0_105, %c128] : memref<1x8x1024xf32, #tpu.memory_space<vmem>>, vector<1x8x128xf32>
    %153 = vector.shape_cast %152 : vector<1x8x128xf32> to vector<8x128xf32>
    %154 = vector.shape_cast %135 : vector<8x128xf32> to vector<1x8x128xf32>
    tpu.vector_store %arg6[%c0_104, %c0_105, %c128], %154 {strides = array<i32>} : memref<1x8x1024xf32, #tpu.memory_space<vmem>>, vector<1x8x128xf32>,
    %cst_106 = arith.constant 0.000000e+00 : f32
    %155 = vector.broadcast %cst_106 : f32 to vector<8x128xf32>
    %c0_107 = arith.constant 0 : index
    %c0_108 = arith.constant 0 : index
    %c2_109 = arith.constant 2 : index
    %c0_110 = arith.constant 0 : index
    %156 = vector.load %arg2[%c0_107, %c0_108, %c2_109, %c0_110] : memref<1x8x8x130xf32, #tpu.memory_space<vmem>>, vector<1x8x1x130xf32>
    %157 = vector.shape_cast %156 : vector<1x8x1x130xf32> to vector<8x130xf32>
    %158 = vector.extract_strided_slice %157 {offsets = [0, 0], sizes = [8, 128], strides = [1, 1]} : vector<8x130xf32> to vector<8x128xf32>
    %c0_111 = arith.constant 0 : index
    %c0_112 = arith.constant 0 : index
    %c0_113 = arith.constant 0 : index
    %159 = vector.load %arg4[%c0_111, %c0_112, %c0_113] : memref<9x8x8xf32, #tpu.memory_space<vmem>>, vector<1x8x8xf32>
    %160 = vector.shape_cast %159 : vector<1x8x8xf32> to vector<8x8xf32>
    %cst_114 = arith.constant dense<0.000000e+00> : vector<8x128xf32>
    %161 = tpu.matmul %160, %158, %cst_114 {dimension_numbers = #tpu.dot_dimension_numbers<[1], [0], [0], [1], [0, 0, 1, 1], [], []>} : vector<8x8xf32>, vector<8x128xf32>, vector<8x128xf32> -> vector<8x128xf32>
    %162 = arith.addf %155, %161 : vector<8x128xf32>
    %163 = vector.extract_strided_slice %157 {offsets = [0, 1], sizes = [8, 128], strides = [1, 1]} : vector<8x130xf32> to vector<8x128xf32>
    %c1_115 = arith.constant 1 : index
    %c0_116 = arith.constant 0 : index
    %c0_117 = arith.constant 0 : index
    %164 = vector.load %arg4[%c1_115, %c0_116, %c0_117] : memref<9x8x8xf32, #tpu.memory_space<vmem>>, vector<1x8x8xf32>
    %165 = vector.shape_cast %164 : vector<1x8x8xf32> to vector<8x8xf32>
    %cst_118 = arith.constant dense<0.000000e+00> : vector<8x128xf32>
    %166 = tpu.matmul %165, %163, %cst_118 {dimension_numbers = #tpu.dot_dimension_numbers<[1], [0], [0], [1], [0, 0, 1, 1], [], []>} : vector<8x8xf32>, vector<8x128xf32>, vector<8x128xf32> -> vector<8x128xf32>
    %167 = arith.addf %162, %166 : vector<8x128xf32>
    %168 = vector.extract_strided_slice %157 {offsets = [0, 2], sizes = [8, 128], strides = [1, 1]} : vector<8x130xf32> to vector<8x128xf32>
    %c2_119 = arith.constant 2 : index
    %c0_120 = arith.constant 0 : index
    %c0_121 = arith.constant 0 : index
    %169 = vector.load %arg4[%c2_119, %c0_120, %c0_121] : memref<9x8x8xf32, #tpu.memory_space<vmem>>, vector<1x8x8xf32>
    %170 = vector.shape_cast %169 : vector<1x8x8xf32> to vector<8x8xf32>
    %cst_122 = arith.constant dense<0.000000e+00> : vector<8x128xf32>
    %171 = tpu.matmul %170, %168, %cst_122 {dimension_numbers = #tpu.dot_dimension_numbers<[1], [0], [0], [1], [0, 0, 1, 1], [], []>} : vector<8x8xf32>, vector<8x128xf32>, vector<8x128xf32> -> vector<8x128xf32>
    %172 = arith.addf %167, %171 : vector<8x128xf32>
    %c0_123 = arith.constant 0 : index
    %c0_124 = arith.constant 0 : index
    %c3_125 = arith.constant 3 : index
    %c0_126 = arith.constant 0 : index
    %173 = vector.load %arg2[%c0_123, %c0_124, %c3_125, %c0_126] : memref<1x8x8x130xf32, #tpu.memory_space<vmem>>, vector<1x8x1x130xf32>
    %174 = vector.shape_cast %173 : vector<1x8x1x130xf32> to vector<8x130xf32>
    %175 = vector.extract_strided_slice %174 {offsets = [0, 0], sizes = [8, 128], strides = [1, 1]} : vector<8x130xf32> to vector<8x128xf32>
    %c3_127 = arith.constant 3 : index
    %c0_128 = arith.constant 0 : index
    %c0_129 = arith.constant 0 : index
    %176 = vector.load %arg4[%c3_127, %c0_128, %c0_129] : memref<9x8x8xf32, #tpu.memory_space<vmem>>, vector<1x8x8xf32>
    %177 = vector.shape_cast %176 : vector<1x8x8xf32> to vector<8x8xf32>
    %cst_130 = arith.constant dense<0.000000e+00> : vector<8x128xf32>
    %178 = tpu.matmul %177, %175, %cst_130 {dimension_numbers = #tpu.dot_dimension_numbers<[1], [0], [0], [1], [0, 0, 1, 1], [], []>} : vector<8x8xf32>, vector<8x128xf32>, vector<8x128xf32> -> vector<8x128xf32>
    %179 = arith.addf %172, %178 : vector<8x128xf32>
    %180 = vector.extract_strided_slice %174 {offsets = [0, 1], sizes = [8, 128], strides = [1, 1]} : vector<8x130xf32> to vector<8x128xf32>
    %c4_131 = arith.constant 4 : index
    %c0_132 = arith.constant 0 : index
    %c0_133 = arith.constant 0 : index
    %181 = vector.load %arg4[%c4_131, %c0_132, %c0_133] : memref<9x8x8xf32, #tpu.memory_space<vmem>>, vector<1x8x8xf32>
    %182 = vector.shape_cast %181 : vector<1x8x8xf32> to vector<8x8xf32>
    %cst_134 = arith.constant dense<0.000000e+00> : vector<8x128xf32>
    %183 = tpu.matmul %182, %180, %cst_134 {dimension_numbers = #tpu.dot_dimension_numbers<[1], [0], [0], [1], [0, 0, 1, 1], [], []>} : vector<8x8xf32>, vector<8x128xf32>, vector<8x128xf32> -> vector<8x128xf32>
    %184 = arith.addf %179, %183 : vector<8x128xf32>
    %185 = vector.extract_strided_slice %174 {offsets = [0, 2], sizes = [8, 128], strides = [1, 1]} : vector<8x130xf32> to vector<8x128xf32>
    %c5_135 = arith.constant 5 : index
    %c0_136 = arith.constant 0 : index
    %c0_137 = arith.constant 0 : index
    %186 = vector.load %arg4[%c5_135, %c0_136, %c0_137] : memref<9x8x8xf32, #tpu.memory_space<vmem>>, vector<1x8x8xf32>
    %187 = vector.shape_cast %186 : vector<1x8x8xf32> to vector<8x8xf32>
    %cst_138 = arith.constant dense<0.000000e+00> : vector<8x128xf32>
    %188 = tpu.matmul %187, %185, %cst_138 {dimension_numbers = #tpu.dot_dimension_numbers<[1], [0], [0], [1], [0, 0, 1, 1], [], []>} : vector<8x8xf32>, vector<8x128xf32>, vector<8x128xf32> -> vector<8x128xf32>
    %189 = arith.addf %184, %188 : vector<8x128xf32>
    %c0_139 = arith.constant 0 : index
    %c0_140 = arith.constant 0 : index
    %c4_141 = arith.constant 4 : index
    %c0_142 = arith.constant 0 : index
    %190 = vector.load %arg2[%c0_139, %c0_140, %c4_141, %c0_142] : memref<1x8x8x130xf32, #tpu.memory_space<vmem>>, vector<1x8x1x130xf32>
    %191 = vector.shape_cast %190 : vector<1x8x1x130xf32> to vector<8x130xf32>
    %192 = vector.extract_strided_slice %191 {offsets = [0, 0], sizes = [8, 128], strides = [1, 1]} : vector<8x130xf32> to vector<8x128xf32>
    %c6_143 = arith.constant 6 : index
    %c0_144 = arith.constant 0 : index
    %c0_145 = arith.constant 0 : index
    %193 = vector.load %arg4[%c6_143, %c0_144, %c0_145] : memref<9x8x8xf32, #tpu.memory_space<vmem>>, vector<1x8x8xf32>
    %194 = vector.shape_cast %193 : vector<1x8x8xf32> to vector<8x8xf32>
    %cst_146 = arith.constant dense<0.000000e+00> : vector<8x128xf32>
    %195 = tpu.matmul %194, %192, %cst_146 {dimension_numbers = #tpu.dot_dimension_numbers<[1], [0], [0], [1], [0, 0, 1, 1], [], []>} : vector<8x8xf32>, vector<8x128xf32>, vector<8x128xf32> -> vector<8x128xf32>
    %196 = arith.addf %189, %195 : vector<8x128xf32>
    %197 = vector.extract_strided_slice %191 {offsets = [0, 1], sizes = [8, 128], strides = [1, 1]} : vector<8x130xf32> to vector<8x128xf32>
    %c7_147 = arith.constant 7 : index
    %c0_148 = arith.constant 0 : index
    %c0_149 = arith.constant 0 : index
    %198 = vector.load %arg4[%c7_147, %c0_148, %c0_149] : memref<9x8x8xf32, #tpu.memory_space<vmem>>, vector<1x8x8xf32>
    %199 = vector.shape_cast %198 : vector<1x8x8xf32> to vector<8x8xf32>
    %cst_150 = arith.constant dense<0.000000e+00> : vector<8x128xf32>
    %200 = tpu.matmul %199, %197, %cst_150 {dimension_numbers = #tpu.dot_dimension_numbers<[1], [0], [0], [1], [0, 0, 1, 1], [], []>} : vector<8x8xf32>, vector<8x128xf32>, vector<8x128xf32> -> vector<8x128xf32>
    %201 = arith.addf %196, %200 : vector<8x128xf32>
    %202 = vector.extract_strided_slice %191 {offsets = [0, 2], sizes = [8, 128], strides = [1, 1]} : vector<8x130xf32> to vector<8x128xf32>
    %c8_151 = arith.constant 8 : index
    %c0_152 = arith.constant 0 : index
    %c0_153 = arith.constant 0 : index
    %203 = vector.load %arg4[%c8_151, %c0_152, %c0_153] : memref<9x8x8xf32, #tpu.memory_space<vmem>>, vector<1x8x8xf32>
    %204 = vector.shape_cast %203 : vector<1x8x8xf32> to vector<8x8xf32>
    %cst_154 = arith.constant dense<0.000000e+00> : vector<8x128xf32>
    %205 = tpu.matmul %204, %202, %cst_154 {dimension_numbers = #tpu.dot_dimension_numbers<[1], [0], [0], [1], [0, 0, 1, 1], [], []>} : vector<8x8xf32>, vector<8x128xf32>, vector<8x128xf32> -> vector<8x128xf32>
    %206 = arith.addf %201, %205 : vector<8x128xf32>
    %207 = vector.broadcast %3 : vector<8x1xf32> to vector<8x128xf32>
    %208 = arith.addf %206, %207 : vector<8x128xf32>
    %c8_i32_155 = arith.constant 8 : i32
    %209 = arith.muli %arg1, %c8_i32_155 : i32
    %c2_i32 = arith.constant 2 : i32
    %210 = arith.addi %209, %c2_i32 : i32
    %c16_i32_156 = arith.constant 16 : i32
    %211 = arith.cmpi slt, %210, %c16_i32_156 : i32
    %212 = vector.broadcast %211 : i1 to vector<1x128xi1>
    %213 = arith.andi %6, %212 : vector<1x128xi1>
    %214 = arith.extui %213 : vector<1x128xi1> to vector<1x128xi32>
    %215 = arith.sitofp %214 : vector<1x128xi32> to vector<1x128xf32>
    %216 = vector.broadcast %215 : vector<1x128xf32> to vector<8x128xf32>
    %217 = arith.mulf %208, %216 : vector<8x128xf32>
    %cst_157 = arith.constant dense<0.000000e+00> : vector<8xf32>
    %218 = vector.multi_reduction <add>, %217, %cst_157 [1] : vector<8x128xf32> to vector<8xf32>
    %219 = vector.shape_cast %218 : vector<8xf32> to vector<8x1xf32>
    %220 = arith.addf %147, %219 : vector<8x1xf32>
    %221 = arith.mulf %217, %208 : vector<8x128xf32>
    %cst_158 = arith.constant dense<0.000000e+00> : vector<8xf32>
    %222 = vector.multi_reduction <add>, %221, %cst_158 [1] : vector<8x128xf32> to vector<8xf32>
    %223 = vector.shape_cast %222 : vector<8xf32> to vector<8x1xf32>
    %224 = arith.addf %151, %223 : vector<8x1xf32>
    %c0_159 = arith.constant 0 : index
    %c0_160 = arith.constant 0 : index
    %c256 = arith.constant 256 : index
    %225 = vector.load %arg6[%c0_159, %c0_160, %c256] : memref<1x8x1024xf32, #tpu.memory_space<vmem>>, vector<1x8x128xf32>
    %226 = vector.shape_cast %225 : vector<1x8x128xf32> to vector<8x128xf32>
    %227 = vector.shape_cast %208 : vector<8x128xf32> to vector<1x8x128xf32>
    tpu.vector_store %arg6[%c0_159, %c0_160, %c256], %227 {strides = array<i32>} : memref<1x8x1024xf32, #tpu.memory_space<vmem>>, vector<1x8x128xf32>,
    %cst_161 = arith.constant 0.000000e+00 : f32
    %228 = vector.broadcast %cst_161 : f32 to vector<8x128xf32>
    %c0_162 = arith.constant 0 : index
    %c0_163 = arith.constant 0 : index
    %c3_164 = arith.constant 3 : index
    %c0_165 = arith.constant 0 : index
    %229 = vector.load %arg2[%c0_162, %c0_163, %c3_164, %c0_165] : memref<1x8x8x130xf32, #tpu.memory_space<vmem>>, vector<1x8x1x130xf32>
    %230 = vector.shape_cast %229 : vector<1x8x1x130xf32> to vector<8x130xf32>
    %231 = vector.extract_strided_slice %230 {offsets = [0, 0], sizes = [8, 128], strides = [1, 1]} : vector<8x130xf32> to vector<8x128xf32>
    %c0_166 = arith.constant 0 : index
    %c0_167 = arith.constant 0 : index
    %c0_168 = arith.constant 0 : index
    %232 = vector.load %arg4[%c0_166, %c0_167, %c0_168] : memref<9x8x8xf32, #tpu.memory_space<vmem>>, vector<1x8x8xf32>
    %233 = vector.shape_cast %232 : vector<1x8x8xf32> to vector<8x8xf32>
    %cst_169 = arith.constant dense<0.000000e+00> : vector<8x128xf32>
    %234 = tpu.matmul %233, %231, %cst_169 {dimension_numbers = #tpu.dot_dimension_numbers<[1], [0], [0], [1], [0, 0, 1, 1], [], []>} : vector<8x8xf32>, vector<8x128xf32>, vector<8x128xf32> -> vector<8x128xf32>
    %235 = arith.addf %228, %234 : vector<8x128xf32>
    %236 = vector.extract_strided_slice %230 {offsets = [0, 1], sizes = [8, 128], strides = [1, 1]} : vector<8x130xf32> to vector<8x128xf32>
    %c1_170 = arith.constant 1 : index
    %c0_171 = arith.constant 0 : index
    %c0_172 = arith.constant 0 : index
    %237 = vector.load %arg4[%c1_170, %c0_171, %c0_172] : memref<9x8x8xf32, #tpu.memory_space<vmem>>, vector<1x8x8xf32>
    %238 = vector.shape_cast %237 : vector<1x8x8xf32> to vector<8x8xf32>
    %cst_173 = arith.constant dense<0.000000e+00> : vector<8x128xf32>
    %239 = tpu.matmul %238, %236, %cst_173 {dimension_numbers = #tpu.dot_dimension_numbers<[1], [0], [0], [1], [0, 0, 1, 1], [], []>} : vector<8x8xf32>, vector<8x128xf32>, vector<8x128xf32> -> vector<8x128xf32>
    %240 = arith.addf %235, %239 : vector<8x128xf32>
    %241 = vector.extract_strided_slice %230 {offsets = [0, 2], sizes = [8, 128], strides = [1, 1]} : vector<8x130xf32> to vector<8x128xf32>
    %c2_174 = arith.constant 2 : index
    %c0_175 = arith.constant 0 : index
    %c0_176 = arith.constant 0 : index
    %242 = vector.load %arg4[%c2_174, %c0_175, %c0_176] : memref<9x8x8xf32, #tpu.memory_space<vmem>>, vector<1x8x8xf32>
    %243 = vector.shape_cast %242 : vector<1x8x8xf32> to vector<8x8xf32>
    %cst_177 = arith.constant dense<0.000000e+00> : vector<8x128xf32>
    %244 = tpu.matmul %243, %241, %cst_177 {dimension_numbers = #tpu.dot_dimension_numbers<[1], [0], [0], [1], [0, 0, 1, 1], [], []>} : vector<8x8xf32>, vector<8x128xf32>, vector<8x128xf32> -> vector<8x128xf32>
    %245 = arith.addf %240, %244 : vector<8x128xf32>
    %c0_178 = arith.constant 0 : index
    %c0_179 = arith.constant 0 : index
    %c4_180 = arith.constant 4 : index
    %c0_181 = arith.constant 0 : index
    %246 = vector.load %arg2[%c0_178, %c0_179, %c4_180, %c0_181] : memref<1x8x8x130xf32, #tpu.memory_space<vmem>>, vector<1x8x1x130xf32>
    %247 = vector.shape_cast %246 : vector<1x8x1x130xf32> to vector<8x130xf32>
    %248 = vector.extract_strided_slice %247 {offsets = [0, 0], sizes = [8, 128], strides = [1, 1]} : vector<8x130xf32> to vector<8x128xf32>
    %c3_182 = arith.constant 3 : index
    %c0_183 = arith.constant 0 : index
    %c0_184 = arith.constant 0 : index
    %249 = vector.load %arg4[%c3_182, %c0_183, %c0_184] : memref<9x8x8xf32, #tpu.memory_space<vmem>>, vector<1x8x8xf32>
    %250 = vector.shape_cast %249 : vector<1x8x8xf32> to vector<8x8xf32>
    %cst_185 = arith.constant dense<0.000000e+00> : vector<8x128xf32>
    %251 = tpu.matmul %250, %248, %cst_185 {dimension_numbers = #tpu.dot_dimension_numbers<[1], [0], [0], [1], [0, 0, 1, 1], [], []>} : vector<8x8xf32>, vector<8x128xf32>, vector<8x128xf32> -> vector<8x128xf32>
    %252 = arith.addf %245, %251 : vector<8x128xf32>
    %253 = vector.extract_strided_slice %247 {offsets = [0, 1], sizes = [8, 128], strides = [1, 1]} : vector<8x130xf32> to vector<8x128xf32>
    %c4_186 = arith.constant 4 : index
    %c0_187 = arith.constant 0 : index
    %c0_188 = arith.constant 0 : index
    %254 = vector.load %arg4[%c4_186, %c0_187, %c0_188] : memref<9x8x8xf32, #tpu.memory_space<vmem>>, vector<1x8x8xf32>
    %255 = vector.shape_cast %254 : vector<1x8x8xf32> to vector<8x8xf32>
    %cst_189 = arith.constant dense<0.000000e+00> : vector<8x128xf32>
    %256 = tpu.matmul %255, %253, %cst_189 {dimension_numbers = #tpu.dot_dimension_numbers<[1], [0], [0], [1], [0, 0, 1, 1], [], []>} : vector<8x8xf32>, vector<8x128xf32>, vector<8x128xf32> -> vector<8x128xf32>
    %257 = arith.addf %252, %256 : vector<8x128xf32>
    %258 = vector.extract_strided_slice %247 {offsets = [0, 2], sizes = [8, 128], strides = [1, 1]} : vector<8x130xf32> to vector<8x128xf32>
    %c5_190 = arith.constant 5 : index
    %c0_191 = arith.constant 0 : index
    %c0_192 = arith.constant 0 : index
    %259 = vector.load %arg4[%c5_190, %c0_191, %c0_192] : memref<9x8x8xf32, #tpu.memory_space<vmem>>, vector<1x8x8xf32>
    %260 = vector.shape_cast %259 : vector<1x8x8xf32> to vector<8x8xf32>
    %cst_193 = arith.constant dense<0.000000e+00> : vector<8x128xf32>
    %261 = tpu.matmul %260, %258, %cst_193 {dimension_numbers = #tpu.dot_dimension_numbers<[1], [0], [0], [1], [0, 0, 1, 1], [], []>} : vector<8x8xf32>, vector<8x128xf32>, vector<8x128xf32> -> vector<8x128xf32>
    %262 = arith.addf %257, %261 : vector<8x128xf32>
    %c0_194 = arith.constant 0 : index
    %c0_195 = arith.constant 0 : index
    %c5_196 = arith.constant 5 : index
    %c0_197 = arith.constant 0 : index
    %263 = vector.load %arg2[%c0_194, %c0_195, %c5_196, %c0_197] : memref<1x8x8x130xf32, #tpu.memory_space<vmem>>, vector<1x8x1x130xf32>
    %264 = vector.shape_cast %263 : vector<1x8x1x130xf32> to vector<8x130xf32>
    %265 = vector.extract_strided_slice %264 {offsets = [0, 0], sizes = [8, 128], strides = [1, 1]} : vector<8x130xf32> to vector<8x128xf32>
    %c6_198 = arith.constant 6 : index
    %c0_199 = arith.constant 0 : index
    %c0_200 = arith.constant 0 : index
    %266 = vector.load %arg4[%c6_198, %c0_199, %c0_200] : memref<9x8x8xf32, #tpu.memory_space<vmem>>, vector<1x8x8xf32>
    %267 = vector.shape_cast %266 : vector<1x8x8xf32> to vector<8x8xf32>
    %cst_201 = arith.constant dense<0.000000e+00> : vector<8x128xf32>
    %268 = tpu.matmul %267, %265, %cst_201 {dimension_numbers = #tpu.dot_dimension_numbers<[1], [0], [0], [1], [0, 0, 1, 1], [], []>} : vector<8x8xf32>, vector<8x128xf32>, vector<8x128xf32> -> vector<8x128xf32>
    %269 = arith.addf %262, %268 : vector<8x128xf32>
    %270 = vector.extract_strided_slice %264 {offsets = [0, 1], sizes = [8, 128], strides = [1, 1]} : vector<8x130xf32> to vector<8x128xf32>
    %c7_202 = arith.constant 7 : index
    %c0_203 = arith.constant 0 : index
    %c0_204 = arith.constant 0 : index
    %271 = vector.load %arg4[%c7_202, %c0_203, %c0_204] : memref<9x8x8xf32, #tpu.memory_space<vmem>>, vector<1x8x8xf32>
    %272 = vector.shape_cast %271 : vector<1x8x8xf32> to vector<8x8xf32>
    %cst_205 = arith.constant dense<0.000000e+00> : vector<8x128xf32>
    %273 = tpu.matmul %272, %270, %cst_205 {dimension_numbers = #tpu.dot_dimension_numbers<[1], [0], [0], [1], [0, 0, 1, 1], [], []>} : vector<8x8xf32>, vector<8x128xf32>, vector<8x128xf32> -> vector<8x128xf32>
    %274 = arith.addf %269, %273 : vector<8x128xf32>
    %275 = vector.extract_strided_slice %264 {offsets = [0, 2], sizes = [8, 128], strides = [1, 1]} : vector<8x130xf32> to vector<8x128xf32>
    %c8_206 = arith.constant 8 : index
    %c0_207 = arith.constant 0 : index
    %c0_208 = arith.constant 0 : index
    %276 = vector.load %arg4[%c8_206, %c0_207, %c0_208] : memref<9x8x8xf32, #tpu.memory_space<vmem>>, vector<1x8x8xf32>
    %277 = vector.shape_cast %276 : vector<1x8x8xf32> to vector<8x8xf32>
    %cst_209 = arith.constant dense<0.000000e+00> : vector<8x128xf32>
    %278 = tpu.matmul %277, %275, %cst_209 {dimension_numbers = #tpu.dot_dimension_numbers<[1], [0], [0], [1], [0, 0, 1, 1], [], []>} : vector<8x8xf32>, vector<8x128xf32>, vector<8x128xf32> -> vector<8x128xf32>
    %279 = arith.addf %274, %278 : vector<8x128xf32>
    %280 = vector.broadcast %3 : vector<8x1xf32> to vector<8x128xf32>
    %281 = arith.addf %279, %280 : vector<8x128xf32>
    %c8_i32_210 = arith.constant 8 : i32
    %282 = arith.muli %arg1, %c8_i32_210 : i32
    %c3_i32 = arith.constant 3 : i32
    %283 = arith.addi %282, %c3_i32 : i32
    %c16_i32_211 = arith.constant 16 : i32
    %284 = arith.cmpi slt, %283, %c16_i32_211 : i32
    %285 = vector.broadcast %284 : i1 to vector<1x128xi1>
    %286 = arith.andi %6, %285 : vector<1x128xi1>
    %287 = arith.extui %286 : vector<1x128xi1> to vector<1x128xi32>
    %288 = arith.sitofp %287 : vector<1x128xi32> to vector<1x128xf32>
    %289 = vector.broadcast %288 : vector<1x128xf32> to vector<8x128xf32>
    %290 = arith.mulf %281, %289 : vector<8x128xf32>
    %cst_212 = arith.constant dense<0.000000e+00> : vector<8xf32>
    %291 = vector.multi_reduction <add>, %290, %cst_212 [1] : vector<8x128xf32> to vector<8xf32>
    %292 = vector.shape_cast %291 : vector<8xf32> to vector<8x1xf32>
    %293 = arith.addf %220, %292 : vector<8x1xf32>
    %294 = arith.mulf %290, %281 : vector<8x128xf32>
    %cst_213 = arith.constant dense<0.000000e+00> : vector<8xf32>
    %295 = vector.multi_reduction <add>, %294, %cst_213 [1] : vector<8x128xf32> to vector<8xf32>
    %296 = vector.shape_cast %295 : vector<8xf32> to vector<8x1xf32>
    %297 = arith.addf %224, %296 : vector<8x1xf32>
    %c0_214 = arith.constant 0 : index
    %c0_215 = arith.constant 0 : index
    %c384 = arith.constant 384 : index
    %298 = vector.load %arg6[%c0_214, %c0_215, %c384] : memref<1x8x1024xf32, #tpu.memory_space<vmem>>, vector<1x8x128xf32>
    %299 = vector.shape_cast %298 : vector<1x8x128xf32> to vector<8x128xf32>
    %300 = vector.shape_cast %281 : vector<8x128xf32> to vector<1x8x128xf32>
    tpu.vector_store %arg6[%c0_214, %c0_215, %c384], %300 {strides = array<i32>} : memref<1x8x1024xf32, #tpu.memory_space<vmem>>, vector<1x8x128xf32>,
    %cst_216 = arith.constant 0.000000e+00 : f32
    %301 = vector.broadcast %cst_216 : f32 to vector<8x128xf32>
    %c0_217 = arith.constant 0 : index
    %c0_218 = arith.constant 0 : index
    %c4_219 = arith.constant 4 : index
    %c0_220 = arith.constant 0 : index
    %302 = vector.load %arg2[%c0_217, %c0_218, %c4_219, %c0_220] : memref<1x8x8x130xf32, #tpu.memory_space<vmem>>, vector<1x8x1x130xf32>
    %303 = vector.shape_cast %302 : vector<1x8x1x130xf32> to vector<8x130xf32>
    %304 = vector.extract_strided_slice %303 {offsets = [0, 0], sizes = [8, 128], strides = [1, 1]} : vector<8x130xf32> to vector<8x128xf32>
    %c0_221 = arith.constant 0 : index
    %c0_222 = arith.constant 0 : index
    %c0_223 = arith.constant 0 : index
    %305 = vector.load %arg4[%c0_221, %c0_222, %c0_223] : memref<9x8x8xf32, #tpu.memory_space<vmem>>, vector<1x8x8xf32>
    %306 = vector.shape_cast %305 : vector<1x8x8xf32> to vector<8x8xf32>
    %cst_224 = arith.constant dense<0.000000e+00> : vector<8x128xf32>
    %307 = tpu.matmul %306, %304, %cst_224 {dimension_numbers = #tpu.dot_dimension_numbers<[1], [0], [0], [1], [0, 0, 1, 1], [], []>} : vector<8x8xf32>, vector<8x128xf32>, vector<8x128xf32> -> vector<8x128xf32>
    %308 = arith.addf %301, %307 : vector<8x128xf32>
    %309 = vector.extract_strided_slice %303 {offsets = [0, 1], sizes = [8, 128], strides = [1, 1]} : vector<8x130xf32> to vector<8x128xf32>
    %c1_225 = arith.constant 1 : index
    %c0_226 = arith.constant 0 : index
    %c0_227 = arith.constant 0 : index
    %310 = vector.load %arg4[%c1_225, %c0_226, %c0_227] : memref<9x8x8xf32, #tpu.memory_space<vmem>>, vector<1x8x8xf32>
    %311 = vector.shape_cast %310 : vector<1x8x8xf32> to vector<8x8xf32>
    %cst_228 = arith.constant dense<0.000000e+00> : vector<8x128xf32>
    %312 = tpu.matmul %311, %309, %cst_228 {dimension_numbers = #tpu.dot_dimension_numbers<[1], [0], [0], [1], [0, 0, 1, 1], [], []>} : vector<8x8xf32>, vector<8x128xf32>, vector<8x128xf32> -> vector<8x128xf32>
    %313 = arith.addf %308, %312 : vector<8x128xf32>
    %314 = vector.extract_strided_slice %303 {offsets = [0, 2], sizes = [8, 128], strides = [1, 1]} : vector<8x130xf32> to vector<8x128xf32>
    %c2_229 = arith.constant 2 : index
    %c0_230 = arith.constant 0 : index
    %c0_231 = arith.constant 0 : index
    %315 = vector.load %arg4[%c2_229, %c0_230, %c0_231] : memref<9x8x8xf32, #tpu.memory_space<vmem>>, vector<1x8x8xf32>
    %316 = vector.shape_cast %315 : vector<1x8x8xf32> to vector<8x8xf32>
    %cst_232 = arith.constant dense<0.000000e+00> : vector<8x128xf32>
    %317 = tpu.matmul %316, %314, %cst_232 {dimension_numbers = #tpu.dot_dimension_numbers<[1], [0], [0], [1], [0, 0, 1, 1], [], []>} : vector<8x8xf32>, vector<8x128xf32>, vector<8x128xf32> -> vector<8x128xf32>
    %318 = arith.addf %313, %317 : vector<8x128xf32>
    %c0_233 = arith.constant 0 : index
    %c0_234 = arith.constant 0 : index
    %c5_235 = arith.constant 5 : index
    %c0_236 = arith.constant 0 : index
    %319 = vector.load %arg2[%c0_233, %c0_234, %c5_235, %c0_236] : memref<1x8x8x130xf32, #tpu.memory_space<vmem>>, vector<1x8x1x130xf32>
    %320 = vector.shape_cast %319 : vector<1x8x1x130xf32> to vector<8x130xf32>
    %321 = vector.extract_strided_slice %320 {offsets = [0, 0], sizes = [8, 128], strides = [1, 1]} : vector<8x130xf32> to vector<8x128xf32>
    %c3_237 = arith.constant 3 : index
    %c0_238 = arith.constant 0 : index
    %c0_239 = arith.constant 0 : index
    %322 = vector.load %arg4[%c3_237, %c0_238, %c0_239] : memref<9x8x8xf32, #tpu.memory_space<vmem>>, vector<1x8x8xf32>
    %323 = vector.shape_cast %322 : vector<1x8x8xf32> to vector<8x8xf32>
    %cst_240 = arith.constant dense<0.000000e+00> : vector<8x128xf32>
    %324 = tpu.matmul %323, %321, %cst_240 {dimension_numbers = #tpu.dot_dimension_numbers<[1], [0], [0], [1], [0, 0, 1, 1], [], []>} : vector<8x8xf32>, vector<8x128xf32>, vector<8x128xf32> -> vector<8x128xf32>
    %325 = arith.addf %318, %324 : vector<8x128xf32>
    %326 = vector.extract_strided_slice %320 {offsets = [0, 1], sizes = [8, 128], strides = [1, 1]} : vector<8x130xf32> to vector<8x128xf32>
    %c4_241 = arith.constant 4 : index
    %c0_242 = arith.constant 0 : index
    %c0_243 = arith.constant 0 : index
    %327 = vector.load %arg4[%c4_241, %c0_242, %c0_243] : memref<9x8x8xf32, #tpu.memory_space<vmem>>, vector<1x8x8xf32>
    %328 = vector.shape_cast %327 : vector<1x8x8xf32> to vector<8x8xf32>
    %cst_244 = arith.constant dense<0.000000e+00> : vector<8x128xf32>
    %329 = tpu.matmul %328, %326, %cst_244 {dimension_numbers = #tpu.dot_dimension_numbers<[1], [0], [0], [1], [0, 0, 1, 1], [], []>} : vector<8x8xf32>, vector<8x128xf32>, vector<8x128xf32> -> vector<8x128xf32>
    %330 = arith.addf %325, %329 : vector<8x128xf32>
    %331 = vector.extract_strided_slice %320 {offsets = [0, 2], sizes = [8, 128], strides = [1, 1]} : vector<8x130xf32> to vector<8x128xf32>
    %c5_245 = arith.constant 5 : index
    %c0_246 = arith.constant 0 : index
    %c0_247 = arith.constant 0 : index
    %332 = vector.load %arg4[%c5_245, %c0_246, %c0_247] : memref<9x8x8xf32, #tpu.memory_space<vmem>>, vector<1x8x8xf32>
    %333 = vector.shape_cast %332 : vector<1x8x8xf32> to vector<8x8xf32>
    %cst_248 = arith.constant dense<0.000000e+00> : vector<8x128xf32>
    %334 = tpu.matmul %333, %331, %cst_248 {dimension_numbers = #tpu.dot_dimension_numbers<[1], [0], [0], [1], [0, 0, 1, 1], [], []>} : vector<8x8xf32>, vector<8x128xf32>, vector<8x128xf32> -> vector<8x128xf32>
    %335 = arith.addf %330, %334 : vector<8x128xf32>
    %c0_249 = arith.constant 0 : index
    %c0_250 = arith.constant 0 : index
    %c6_251 = arith.constant 6 : index
    %c0_252 = arith.constant 0 : index
    %336 = vector.load %arg2[%c0_249, %c0_250, %c6_251, %c0_252] : memref<1x8x8x130xf32, #tpu.memory_space<vmem>>, vector<1x8x1x130xf32>
    %337 = vector.shape_cast %336 : vector<1x8x1x130xf32> to vector<8x130xf32>
    %338 = vector.extract_strided_slice %337 {offsets = [0, 0], sizes = [8, 128], strides = [1, 1]} : vector<8x130xf32> to vector<8x128xf32>
    %c6_253 = arith.constant 6 : index
    %c0_254 = arith.constant 0 : index
    %c0_255 = arith.constant 0 : index
    %339 = vector.load %arg4[%c6_253, %c0_254, %c0_255] : memref<9x8x8xf32, #tpu.memory_space<vmem>>, vector<1x8x8xf32>
    %340 = vector.shape_cast %339 : vector<1x8x8xf32> to vector<8x8xf32>
    %cst_256 = arith.constant dense<0.000000e+00> : vector<8x128xf32>
    %341 = tpu.matmul %340, %338, %cst_256 {dimension_numbers = #tpu.dot_dimension_numbers<[1], [0], [0], [1], [0, 0, 1, 1], [], []>} : vector<8x8xf32>, vector<8x128xf32>, vector<8x128xf32> -> vector<8x128xf32>
    %342 = arith.addf %335, %341 : vector<8x128xf32>
    %343 = vector.extract_strided_slice %337 {offsets = [0, 1], sizes = [8, 128], strides = [1, 1]} : vector<8x130xf32> to vector<8x128xf32>
    %c7_257 = arith.constant 7 : index
    %c0_258 = arith.constant 0 : index
    %c0_259 = arith.constant 0 : index
    %344 = vector.load %arg4[%c7_257, %c0_258, %c0_259] : memref<9x8x8xf32, #tpu.memory_space<vmem>>, vector<1x8x8xf32>
    %345 = vector.shape_cast %344 : vector<1x8x8xf32> to vector<8x8xf32>
    %cst_260 = arith.constant dense<0.000000e+00> : vector<8x128xf32>
    %346 = tpu.matmul %345, %343, %cst_260 {dimension_numbers = #tpu.dot_dimension_numbers<[1], [0], [0], [1], [0, 0, 1, 1], [], []>} : vector<8x8xf32>, vector<8x128xf32>, vector<8x128xf32> -> vector<8x128xf32>
    %347 = arith.addf %342, %346 : vector<8x128xf32>
    %348 = vector.extract_strided_slice %337 {offsets = [0, 2], sizes = [8, 128], strides = [1, 1]} : vector<8x130xf32> to vector<8x128xf32>
    %c8_261 = arith.constant 8 : index
    %c0_262 = arith.constant 0 : index
    %c0_263 = arith.constant 0 : index
    %349 = vector.load %arg4[%c8_261, %c0_262, %c0_263] : memref<9x8x8xf32, #tpu.memory_space<vmem>>, vector<1x8x8xf32>
    %350 = vector.shape_cast %349 : vector<1x8x8xf32> to vector<8x8xf32>
    %cst_264 = arith.constant dense<0.000000e+00> : vector<8x128xf32>
    %351 = tpu.matmul %350, %348, %cst_264 {dimension_numbers = #tpu.dot_dimension_numbers<[1], [0], [0], [1], [0, 0, 1, 1], [], []>} : vector<8x8xf32>, vector<8x128xf32>, vector<8x128xf32> -> vector<8x128xf32>
    %352 = arith.addf %347, %351 : vector<8x128xf32>
    %353 = vector.broadcast %3 : vector<8x1xf32> to vector<8x128xf32>
    %354 = arith.addf %352, %353 : vector<8x128xf32>
    %c8_i32_265 = arith.constant 8 : i32
    %355 = arith.muli %arg1, %c8_i32_265 : i32
    %c4_i32 = arith.constant 4 : i32
    %356 = arith.addi %355, %c4_i32 : i32
    %c16_i32_266 = arith.constant 16 : i32
    %357 = arith.cmpi slt, %356, %c16_i32_266 : i32
    %358 = vector.broadcast %357 : i1 to vector<1x128xi1>
    %359 = arith.andi %6, %358 : vector<1x128xi1>
    %360 = arith.extui %359 : vector<1x128xi1> to vector<1x128xi32>
    %361 = arith.sitofp %360 : vector<1x128xi32> to vector<1x128xf32>
    %362 = vector.broadcast %361 : vector<1x128xf32> to vector<8x128xf32>
    %363 = arith.mulf %354, %362 : vector<8x128xf32>
    %cst_267 = arith.constant dense<0.000000e+00> : vector<8xf32>
    %364 = vector.multi_reduction <add>, %363, %cst_267 [1] : vector<8x128xf32> to vector<8xf32>
    %365 = vector.shape_cast %364 : vector<8xf32> to vector<8x1xf32>
    %366 = arith.addf %293, %365 : vector<8x1xf32>
    %367 = arith.mulf %363, %354 : vector<8x128xf32>
    %cst_268 = arith.constant dense<0.000000e+00> : vector<8xf32>
    %368 = vector.multi_reduction <add>, %367, %cst_268 [1] : vector<8x128xf32> to vector<8xf32>
    %369 = vector.shape_cast %368 : vector<8xf32> to vector<8x1xf32>
    %370 = arith.addf %297, %369 : vector<8x1xf32>
    %c0_269 = arith.constant 0 : index
    %c0_270 = arith.constant 0 : index
    %c512 = arith.constant 512 : index
    %371 = vector.load %arg6[%c0_269, %c0_270, %c512] : memref<1x8x1024xf32, #tpu.memory_space<vmem>>, vector<1x8x128xf32>
    %372 = vector.shape_cast %371 : vector<1x8x128xf32> to vector<8x128xf32>
    %373 = vector.shape_cast %354 : vector<8x128xf32> to vector<1x8x128xf32>
    tpu.vector_store %arg6[%c0_269, %c0_270, %c512], %373 {strides = array<i32>} : memref<1x8x1024xf32, #tpu.memory_space<vmem>>, vector<1x8x128xf32>,
    %cst_271 = arith.constant 0.000000e+00 : f32
    %374 = vector.broadcast %cst_271 : f32 to vector<8x128xf32>
    %c0_272 = arith.constant 0 : index
    %c0_273 = arith.constant 0 : index
    %c5_274 = arith.constant 5 : index
    %c0_275 = arith.constant 0 : index
    %375 = vector.load %arg2[%c0_272, %c0_273, %c5_274, %c0_275] : memref<1x8x8x130xf32, #tpu.memory_space<vmem>>, vector<1x8x1x130xf32>
    %376 = vector.shape_cast %375 : vector<1x8x1x130xf32> to vector<8x130xf32>
    %377 = vector.extract_strided_slice %376 {offsets = [0, 0], sizes = [8, 128], strides = [1, 1]} : vector<8x130xf32> to vector<8x128xf32>
    %c0_276 = arith.constant 0 : index
    %c0_277 = arith.constant 0 : index
    %c0_278 = arith.constant 0 : index
    %378 = vector.load %arg4[%c0_276, %c0_277, %c0_278] : memref<9x8x8xf32, #tpu.memory_space<vmem>>, vector<1x8x8xf32>
    %379 = vector.shape_cast %378 : vector<1x8x8xf32> to vector<8x8xf32>
    %cst_279 = arith.constant dense<0.000000e+00> : vector<8x128xf32>
    %380 = tpu.matmul %379, %377, %cst_279 {dimension_numbers = #tpu.dot_dimension_numbers<[1], [0], [0], [1], [0, 0, 1, 1], [], []>} : vector<8x8xf32>, vector<8x128xf32>, vector<8x128xf32> -> vector<8x128xf32>
    %381 = arith.addf %374, %380 : vector<8x128xf32>
    %382 = vector.extract_strided_slice %376 {offsets = [0, 1], sizes = [8, 128], strides = [1, 1]} : vector<8x130xf32> to vector<8x128xf32>
    %c1_280 = arith.constant 1 : index
    %c0_281 = arith.constant 0 : index
    %c0_282 = arith.constant 0 : index
    %383 = vector.load %arg4[%c1_280, %c0_281, %c0_282] : memref<9x8x8xf32, #tpu.memory_space<vmem>>, vector<1x8x8xf32>
    %384 = vector.shape_cast %383 : vector<1x8x8xf32> to vector<8x8xf32>
    %cst_283 = arith.constant dense<0.000000e+00> : vector<8x128xf32>
    %385 = tpu.matmul %384, %382, %cst_283 {dimension_numbers = #tpu.dot_dimension_numbers<[1], [0], [0], [1], [0, 0, 1, 1], [], []>} : vector<8x8xf32>, vector<8x128xf32>, vector<8x128xf32> -> vector<8x128xf32>
    %386 = arith.addf %381, %385 : vector<8x128xf32>
    %387 = vector.extract_strided_slice %376 {offsets = [0, 2], sizes = [8, 128], strides = [1, 1]} : vector<8x130xf32> to vector<8x128xf32>
    %c2_284 = arith.constant 2 : index
    %c0_285 = arith.constant 0 : index
    %c0_286 = arith.constant 0 : index
    %388 = vector.load %arg4[%c2_284, %c0_285, %c0_286] : memref<9x8x8xf32, #tpu.memory_space<vmem>>, vector<1x8x8xf32>
    %389 = vector.shape_cast %388 : vector<1x8x8xf32> to vector<8x8xf32>
    %cst_287 = arith.constant dense<0.000000e+00> : vector<8x128xf32>
    %390 = tpu.matmul %389, %387, %cst_287 {dimension_numbers = #tpu.dot_dimension_numbers<[1], [0], [0], [1], [0, 0, 1, 1], [], []>} : vector<8x8xf32>, vector<8x128xf32>, vector<8x128xf32> -> vector<8x128xf32>
    %391 = arith.addf %386, %390 : vector<8x128xf32>
    %c0_288 = arith.constant 0 : index
    %c0_289 = arith.constant 0 : index
    %c6_290 = arith.constant 6 : index
    %c0_291 = arith.constant 0 : index
    %392 = vector.load %arg2[%c0_288, %c0_289, %c6_290, %c0_291] : memref<1x8x8x130xf32, #tpu.memory_space<vmem>>, vector<1x8x1x130xf32>
    %393 = vector.shape_cast %392 : vector<1x8x1x130xf32> to vector<8x130xf32>
    %394 = vector.extract_strided_slice %393 {offsets = [0, 0], sizes = [8, 128], strides = [1, 1]} : vector<8x130xf32> to vector<8x128xf32>
    %c3_292 = arith.constant 3 : index
    %c0_293 = arith.constant 0 : index
    %c0_294 = arith.constant 0 : index
    %395 = vector.load %arg4[%c3_292, %c0_293, %c0_294] : memref<9x8x8xf32, #tpu.memory_space<vmem>>, vector<1x8x8xf32>
    %396 = vector.shape_cast %395 : vector<1x8x8xf32> to vector<8x8xf32>
    %cst_295 = arith.constant dense<0.000000e+00> : vector<8x128xf32>
    %397 = tpu.matmul %396, %394, %cst_295 {dimension_numbers = #tpu.dot_dimension_numbers<[1], [0], [0], [1], [0, 0, 1, 1], [], []>} : vector<8x8xf32>, vector<8x128xf32>, vector<8x128xf32> -> vector<8x128xf32>
    %398 = arith.addf %391, %397 : vector<8x128xf32>
    %399 = vector.extract_strided_slice %393 {offsets = [0, 1], sizes = [8, 128], strides = [1, 1]} : vector<8x130xf32> to vector<8x128xf32>
    %c4_296 = arith.constant 4 : index
    %c0_297 = arith.constant 0 : index
    %c0_298 = arith.constant 0 : index
    %400 = vector.load %arg4[%c4_296, %c0_297, %c0_298] : memref<9x8x8xf32, #tpu.memory_space<vmem>>, vector<1x8x8xf32>
    %401 = vector.shape_cast %400 : vector<1x8x8xf32> to vector<8x8xf32>
    %cst_299 = arith.constant dense<0.000000e+00> : vector<8x128xf32>
    %402 = tpu.matmul %401, %399, %cst_299 {dimension_numbers = #tpu.dot_dimension_numbers<[1], [0], [0], [1], [0, 0, 1, 1], [], []>} : vector<8x8xf32>, vector<8x128xf32>, vector<8x128xf32> -> vector<8x128xf32>
    %403 = arith.addf %398, %402 : vector<8x128xf32>
    %404 = vector.extract_strided_slice %393 {offsets = [0, 2], sizes = [8, 128], strides = [1, 1]} : vector<8x130xf32> to vector<8x128xf32>
    %c5_300 = arith.constant 5 : index
    %c0_301 = arith.constant 0 : index
    %c0_302 = arith.constant 0 : index
    %405 = vector.load %arg4[%c5_300, %c0_301, %c0_302] : memref<9x8x8xf32, #tpu.memory_space<vmem>>, vector<1x8x8xf32>
    %406 = vector.shape_cast %405 : vector<1x8x8xf32> to vector<8x8xf32>
    %cst_303 = arith.constant dense<0.000000e+00> : vector<8x128xf32>
    %407 = tpu.matmul %406, %404, %cst_303 {dimension_numbers = #tpu.dot_dimension_numbers<[1], [0], [0], [1], [0, 0, 1, 1], [], []>} : vector<8x8xf32>, vector<8x128xf32>, vector<8x128xf32> -> vector<8x128xf32>
    %408 = arith.addf %403, %407 : vector<8x128xf32>
    %c0_304 = arith.constant 0 : index
    %c0_305 = arith.constant 0 : index
    %c7_306 = arith.constant 7 : index
    %c0_307 = arith.constant 0 : index
    %409 = vector.load %arg2[%c0_304, %c0_305, %c7_306, %c0_307] : memref<1x8x8x130xf32, #tpu.memory_space<vmem>>, vector<1x8x1x130xf32>
    %410 = vector.shape_cast %409 : vector<1x8x1x130xf32> to vector<8x130xf32>
    %411 = vector.extract_strided_slice %410 {offsets = [0, 0], sizes = [8, 128], strides = [1, 1]} : vector<8x130xf32> to vector<8x128xf32>
    %c6_308 = arith.constant 6 : index
    %c0_309 = arith.constant 0 : index
    %c0_310 = arith.constant 0 : index
    %412 = vector.load %arg4[%c6_308, %c0_309, %c0_310] : memref<9x8x8xf32, #tpu.memory_space<vmem>>, vector<1x8x8xf32>
    %413 = vector.shape_cast %412 : vector<1x8x8xf32> to vector<8x8xf32>
    %cst_311 = arith.constant dense<0.000000e+00> : vector<8x128xf32>
    %414 = tpu.matmul %413, %411, %cst_311 {dimension_numbers = #tpu.dot_dimension_numbers<[1], [0], [0], [1], [0, 0, 1, 1], [], []>} : vector<8x8xf32>, vector<8x128xf32>, vector<8x128xf32> -> vector<8x128xf32>
    %415 = arith.addf %408, %414 : vector<8x128xf32>
    %416 = vector.extract_strided_slice %410 {offsets = [0, 1], sizes = [8, 128], strides = [1, 1]} : vector<8x130xf32> to vector<8x128xf32>
    %c7_312 = arith.constant 7 : index
    %c0_313 = arith.constant 0 : index
    %c0_314 = arith.constant 0 : index
    %417 = vector.load %arg4[%c7_312, %c0_313, %c0_314] : memref<9x8x8xf32, #tpu.memory_space<vmem>>, vector<1x8x8xf32>
    %418 = vector.shape_cast %417 : vector<1x8x8xf32> to vector<8x8xf32>
    %cst_315 = arith.constant dense<0.000000e+00> : vector<8x128xf32>
    %419 = tpu.matmul %418, %416, %cst_315 {dimension_numbers = #tpu.dot_dimension_numbers<[1], [0], [0], [1], [0, 0, 1, 1], [], []>} : vector<8x8xf32>, vector<8x128xf32>, vector<8x128xf32> -> vector<8x128xf32>
    %420 = arith.addf %415, %419 : vector<8x128xf32>
    %421 = vector.extract_strided_slice %410 {offsets = [0, 2], sizes = [8, 128], strides = [1, 1]} : vector<8x130xf32> to vector<8x128xf32>
    %c8_316 = arith.constant 8 : index
    %c0_317 = arith.constant 0 : index
    %c0_318 = arith.constant 0 : index
    %422 = vector.load %arg4[%c8_316, %c0_317, %c0_318] : memref<9x8x8xf32, #tpu.memory_space<vmem>>, vector<1x8x8xf32>
    %423 = vector.shape_cast %422 : vector<1x8x8xf32> to vector<8x8xf32>
    %cst_319 = arith.constant dense<0.000000e+00> : vector<8x128xf32>
    %424 = tpu.matmul %423, %421, %cst_319 {dimension_numbers = #tpu.dot_dimension_numbers<[1], [0], [0], [1], [0, 0, 1, 1], [], []>} : vector<8x8xf32>, vector<8x128xf32>, vector<8x128xf32> -> vector<8x128xf32>
    %425 = arith.addf %420, %424 : vector<8x128xf32>
    %426 = vector.broadcast %3 : vector<8x1xf32> to vector<8x128xf32>
    %427 = arith.addf %425, %426 : vector<8x128xf32>
    %c8_i32_320 = arith.constant 8 : i32
    %428 = arith.muli %arg1, %c8_i32_320 : i32
    %c5_i32 = arith.constant 5 : i32
    %429 = arith.addi %428, %c5_i32 : i32
    %c16_i32_321 = arith.constant 16 : i32
    %430 = arith.cmpi slt, %429, %c16_i32_321 : i32
    %431 = vector.broadcast %430 : i1 to vector<1x128xi1>
    %432 = arith.andi %6, %431 : vector<1x128xi1>
    %433 = arith.extui %432 : vector<1x128xi1> to vector<1x128xi32>
    %434 = arith.sitofp %433 : vector<1x128xi32> to vector<1x128xf32>
    %435 = vector.broadcast %434 : vector<1x128xf32> to vector<8x128xf32>
    %436 = arith.mulf %427, %435 : vector<8x128xf32>
    %cst_322 = arith.constant dense<0.000000e+00> : vector<8xf32>
    %437 = vector.multi_reduction <add>, %436, %cst_322 [1] : vector<8x128xf32> to vector<8xf32>
    %438 = vector.shape_cast %437 : vector<8xf32> to vector<8x1xf32>
    %439 = arith.addf %366, %438 : vector<8x1xf32>
    %440 = arith.mulf %436, %427 : vector<8x128xf32>
    %cst_323 = arith.constant dense<0.000000e+00> : vector<8xf32>
    %441 = vector.multi_reduction <add>, %440, %cst_323 [1] : vector<8x128xf32> to vector<8xf32>
    %442 = vector.shape_cast %441 : vector<8xf32> to vector<8x1xf32>
    %443 = arith.addf %370, %442 : vector<8x1xf32>
    %c0_324 = arith.constant 0 : index
    %c0_325 = arith.constant 0 : index
    %c640 = arith.constant 640 : index
    %444 = vector.load %arg6[%c0_324, %c0_325, %c640] : memref<1x8x1024xf32, #tpu.memory_space<vmem>>, vector<1x8x128xf32>
    %445 = vector.shape_cast %444 : vector<1x8x128xf32> to vector<8x128xf32>
    %446 = vector.shape_cast %427 : vector<8x128xf32> to vector<1x8x128xf32>
    tpu.vector_store %arg6[%c0_324, %c0_325, %c640], %446 {strides = array<i32>} : memref<1x8x1024xf32, #tpu.memory_space<vmem>>, vector<1x8x128xf32>,
    %cst_326 = arith.constant 0.000000e+00 : f32
    %447 = vector.broadcast %cst_326 : f32 to vector<8x128xf32>
    %c0_327 = arith.constant 0 : index
    %c0_328 = arith.constant 0 : index
    %c6_329 = arith.constant 6 : index
    %c0_330 = arith.constant 0 : index
    %448 = vector.load %arg2[%c0_327, %c0_328, %c6_329, %c0_330] : memref<1x8x8x130xf32, #tpu.memory_space<vmem>>, vector<1x8x1x130xf32>
    %449 = vector.shape_cast %448 : vector<1x8x1x130xf32> to vector<8x130xf32>
    %450 = vector.extract_strided_slice %449 {offsets = [0, 0], sizes = [8, 128], strides = [1, 1]} : vector<8x130xf32> to vector<8x128xf32>
    %c0_331 = arith.constant 0 : index
    %c0_332 = arith.constant 0 : index
    %c0_333 = arith.constant 0 : index
    %451 = vector.load %arg4[%c0_331, %c0_332, %c0_333] : memref<9x8x8xf32, #tpu.memory_space<vmem>>, vector<1x8x8xf32>
    %452 = vector.shape_cast %451 : vector<1x8x8xf32> to vector<8x8xf32>
    %cst_334 = arith.constant dense<0.000000e+00> : vector<8x128xf32>
    %453 = tpu.matmul %452, %450, %cst_334 {dimension_numbers = #tpu.dot_dimension_numbers<[1], [0], [0], [1], [0, 0, 1, 1], [], []>} : vector<8x8xf32>, vector<8x128xf32>, vector<8x128xf32> -> vector<8x128xf32>
    %454 = arith.addf %447, %453 : vector<8x128xf32>
    %455 = vector.extract_strided_slice %449 {offsets = [0, 1], sizes = [8, 128], strides = [1, 1]} : vector<8x130xf32> to vector<8x128xf32>
    %c1_335 = arith.constant 1 : index
    %c0_336 = arith.constant 0 : index
    %c0_337 = arith.constant 0 : index
    %456 = vector.load %arg4[%c1_335, %c0_336, %c0_337] : memref<9x8x8xf32, #tpu.memory_space<vmem>>, vector<1x8x8xf32>
    %457 = vector.shape_cast %456 : vector<1x8x8xf32> to vector<8x8xf32>
    %cst_338 = arith.constant dense<0.000000e+00> : vector<8x128xf32>
    %458 = tpu.matmul %457, %455, %cst_338 {dimension_numbers = #tpu.dot_dimension_numbers<[1], [0], [0], [1], [0, 0, 1, 1], [], []>} : vector<8x8xf32>, vector<8x128xf32>, vector<8x128xf32> -> vector<8x128xf32>
    %459 = arith.addf %454, %458 : vector<8x128xf32>
    %460 = vector.extract_strided_slice %449 {offsets = [0, 2], sizes = [8, 128], strides = [1, 1]} : vector<8x130xf32> to vector<8x128xf32>
    %c2_339 = arith.constant 2 : index
    %c0_340 = arith.constant 0 : index
    %c0_341 = arith.constant 0 : index
    %461 = vector.load %arg4[%c2_339, %c0_340, %c0_341] : memref<9x8x8xf32, #tpu.memory_space<vmem>>, vector<1x8x8xf32>
    %462 = vector.shape_cast %461 : vector<1x8x8xf32> to vector<8x8xf32>
    %cst_342 = arith.constant dense<0.000000e+00> : vector<8x128xf32>
    %463 = tpu.matmul %462, %460, %cst_342 {dimension_numbers = #tpu.dot_dimension_numbers<[1], [0], [0], [1], [0, 0, 1, 1], [], []>} : vector<8x8xf32>, vector<8x128xf32>, vector<8x128xf32> -> vector<8x128xf32>
    %464 = arith.addf %459, %463 : vector<8x128xf32>
    %c0_343 = arith.constant 0 : index
    %c0_344 = arith.constant 0 : index
    %c7_345 = arith.constant 7 : index
    %c0_346 = arith.constant 0 : index
    %465 = vector.load %arg2[%c0_343, %c0_344, %c7_345, %c0_346] : memref<1x8x8x130xf32, #tpu.memory_space<vmem>>, vector<1x8x1x130xf32>
    %466 = vector.shape_cast %465 : vector<1x8x1x130xf32> to vector<8x130xf32>
    %467 = vector.extract_strided_slice %466 {offsets = [0, 0], sizes = [8, 128], strides = [1, 1]} : vector<8x130xf32> to vector<8x128xf32>
    %c3_347 = arith.constant 3 : index
    %c0_348 = arith.constant 0 : index
    %c0_349 = arith.constant 0 : index
    %468 = vector.load %arg4[%c3_347, %c0_348, %c0_349] : memref<9x8x8xf32, #tpu.memory_space<vmem>>, vector<1x8x8xf32>
    %469 = vector.shape_cast %468 : vector<1x8x8xf32> to vector<8x8xf32>
    %cst_350 = arith.constant dense<0.000000e+00> : vector<8x128xf32>
    %470 = tpu.matmul %469, %467, %cst_350 {dimension_numbers = #tpu.dot_dimension_numbers<[1], [0], [0], [1], [0, 0, 1, 1], [], []>} : vector<8x8xf32>, vector<8x128xf32>, vector<8x128xf32> -> vector<8x128xf32>
    %471 = arith.addf %464, %470 : vector<8x128xf32>
    %472 = vector.extract_strided_slice %466 {offsets = [0, 1], sizes = [8, 128], strides = [1, 1]} : vector<8x130xf32> to vector<8x128xf32>
    %c4_351 = arith.constant 4 : index
    %c0_352 = arith.constant 0 : index
    %c0_353 = arith.constant 0 : index
    %473 = vector.load %arg4[%c4_351, %c0_352, %c0_353] : memref<9x8x8xf32, #tpu.memory_space<vmem>>, vector<1x8x8xf32>
    %474 = vector.shape_cast %473 : vector<1x8x8xf32> to vector<8x8xf32>
    %cst_354 = arith.constant dense<0.000000e+00> : vector<8x128xf32>
    %475 = tpu.matmul %474, %472, %cst_354 {dimension_numbers = #tpu.dot_dimension_numbers<[1], [0], [0], [1], [0, 0, 1, 1], [], []>} : vector<8x8xf32>, vector<8x128xf32>, vector<8x128xf32> -> vector<8x128xf32>
    %476 = arith.addf %471, %475 : vector<8x128xf32>
    %477 = vector.extract_strided_slice %466 {offsets = [0, 2], sizes = [8, 128], strides = [1, 1]} : vector<8x130xf32> to vector<8x128xf32>
    %c5_355 = arith.constant 5 : index
    %c0_356 = arith.constant 0 : index
    %c0_357 = arith.constant 0 : index
    %478 = vector.load %arg4[%c5_355, %c0_356, %c0_357] : memref<9x8x8xf32, #tpu.memory_space<vmem>>, vector<1x8x8xf32>
    %479 = vector.shape_cast %478 : vector<1x8x8xf32> to vector<8x8xf32>
    %cst_358 = arith.constant dense<0.000000e+00> : vector<8x128xf32>
    %480 = tpu.matmul %479, %477, %cst_358 {dimension_numbers = #tpu.dot_dimension_numbers<[1], [0], [0], [1], [0, 0, 1, 1], [], []>} : vector<8x8xf32>, vector<8x128xf32>, vector<8x128xf32> -> vector<8x128xf32>
    %481 = arith.addf %476, %480 : vector<8x128xf32>
    %c0_359 = arith.constant 0 : index
    %c0_360 = arith.constant 0 : index
    %c0_361 = arith.constant 0 : index
    %c0_362 = arith.constant 0 : index
    %482 = vector.load %arg3[%c0_359, %c0_360, %c0_361, %c0_362] : memref<1x8x8x130xf32, #tpu.memory_space<vmem>>, vector<1x8x1x130xf32>
    %483 = vector.shape_cast %482 : vector<1x8x1x130xf32> to vector<8x130xf32>
    %484 = vector.extract_strided_slice %483 {offsets = [0, 0], sizes = [8, 128], strides = [1, 1]} : vector<8x130xf32> to vector<8x128xf32>
    %c6_363 = arith.constant 6 : index
    %c0_364 = arith.constant 0 : index
    %c0_365 = arith.constant 0 : index
    %485 = vector.load %arg4[%c6_363, %c0_364, %c0_365] : memref<9x8x8xf32, #tpu.memory_space<vmem>>, vector<1x8x8xf32>
    %486 = vector.shape_cast %485 : vector<1x8x8xf32> to vector<8x8xf32>
    %cst_366 = arith.constant dense<0.000000e+00> : vector<8x128xf32>
    %487 = tpu.matmul %486, %484, %cst_366 {dimension_numbers = #tpu.dot_dimension_numbers<[1], [0], [0], [1], [0, 0, 1, 1], [], []>} : vector<8x8xf32>, vector<8x128xf32>, vector<8x128xf32> -> vector<8x128xf32>
    %488 = arith.addf %481, %487 : vector<8x128xf32>
    %489 = vector.extract_strided_slice %483 {offsets = [0, 1], sizes = [8, 128], strides = [1, 1]} : vector<8x130xf32> to vector<8x128xf32>
    %c7_367 = arith.constant 7 : index
    %c0_368 = arith.constant 0 : index
    %c0_369 = arith.constant 0 : index
    %490 = vector.load %arg4[%c7_367, %c0_368, %c0_369] : memref<9x8x8xf32, #tpu.memory_space<vmem>>, vector<1x8x8xf32>
    %491 = vector.shape_cast %490 : vector<1x8x8xf32> to vector<8x8xf32>
    %cst_370 = arith.constant dense<0.000000e+00> : vector<8x128xf32>
    %492 = tpu.matmul %491, %489, %cst_370 {dimension_numbers = #tpu.dot_dimension_numbers<[1], [0], [0], [1], [0, 0, 1, 1], [], []>} : vector<8x8xf32>, vector<8x128xf32>, vector<8x128xf32> -> vector<8x128xf32>
    %493 = arith.addf %488, %492 : vector<8x128xf32>
    %494 = vector.extract_strided_slice %483 {offsets = [0, 2], sizes = [8, 128], strides = [1, 1]} : vector<8x130xf32> to vector<8x128xf32>
    %c8_371 = arith.constant 8 : index
    %c0_372 = arith.constant 0 : index
    %c0_373 = arith.constant 0 : index
    %495 = vector.load %arg4[%c8_371, %c0_372, %c0_373] : memref<9x8x8xf32, #tpu.memory_space<vmem>>, vector<1x8x8xf32>
    %496 = vector.shape_cast %495 : vector<1x8x8xf32> to vector<8x8xf32>
    %cst_374 = arith.constant dense<0.000000e+00> : vector<8x128xf32>
    %497 = tpu.matmul %496, %494, %cst_374 {dimension_numbers = #tpu.dot_dimension_numbers<[1], [0], [0], [1], [0, 0, 1, 1], [], []>} : vector<8x8xf32>, vector<8x128xf32>, vector<8x128xf32> -> vector<8x128xf32>
    %498 = arith.addf %493, %497 : vector<8x128xf32>
    %499 = vector.broadcast %3 : vector<8x1xf32> to vector<8x128xf32>
    %500 = arith.addf %498, %499 : vector<8x128xf32>
    %c8_i32_375 = arith.constant 8 : i32
    %501 = arith.muli %arg1, %c8_i32_375 : i32
    %c6_i32 = arith.constant 6 : i32
    %502 = arith.addi %501, %c6_i32 : i32
    %c16_i32_376 = arith.constant 16 : i32
    %503 = arith.cmpi slt, %502, %c16_i32_376 : i32
    %504 = vector.broadcast %503 : i1 to vector<1x128xi1>
    %505 = arith.andi %6, %504 : vector<1x128xi1>
    %506 = arith.extui %505 : vector<1x128xi1> to vector<1x128xi32>
    %507 = arith.sitofp %506 : vector<1x128xi32> to vector<1x128xf32>
    %508 = vector.broadcast %507 : vector<1x128xf32> to vector<8x128xf32>
    %509 = arith.mulf %500, %508 : vector<8x128xf32>
    %cst_377 = arith.constant dense<0.000000e+00> : vector<8xf32>
    %510 = vector.multi_reduction <add>, %509, %cst_377 [1] : vector<8x128xf32> to vector<8xf32>
    %511 = vector.shape_cast %510 : vector<8xf32> to vector<8x1xf32>
    %512 = arith.addf %439, %511 : vector<8x1xf32>
    %513 = arith.mulf %509, %500 : vector<8x128xf32>
    %cst_378 = arith.constant dense<0.000000e+00> : vector<8xf32>
    %514 = vector.multi_reduction <add>, %513, %cst_378 [1] : vector<8x128xf32> to vector<8xf32>
    %515 = vector.shape_cast %514 : vector<8xf32> to vector<8x1xf32>
    %516 = arith.addf %443, %515 : vector<8x1xf32>
    %c0_379 = arith.constant 0 : index
    %c0_380 = arith.constant 0 : index
    %c768 = arith.constant 768 : index
    %517 = vector.load %arg6[%c0_379, %c0_380, %c768] : memref<1x8x1024xf32, #tpu.memory_space<vmem>>, vector<1x8x128xf32>
    %518 = vector.shape_cast %517 : vector<1x8x128xf32> to vector<8x128xf32>
    %519 = vector.shape_cast %500 : vector<8x128xf32> to vector<1x8x128xf32>
    tpu.vector_store %arg6[%c0_379, %c0_380, %c768], %519 {strides = array<i32>} : memref<1x8x1024xf32, #tpu.memory_space<vmem>>, vector<1x8x128xf32>,
    %cst_381 = arith.constant 0.000000e+00 : f32
    %520 = vector.broadcast %cst_381 : f32 to vector<8x128xf32>
    %c0_382 = arith.constant 0 : index
    %c0_383 = arith.constant 0 : index
    %c7_384 = arith.constant 7 : index
    %c0_385 = arith.constant 0 : index
    %521 = vector.load %arg2[%c0_382, %c0_383, %c7_384, %c0_385] : memref<1x8x8x130xf32, #tpu.memory_space<vmem>>, vector<1x8x1x130xf32>
    %522 = vector.shape_cast %521 : vector<1x8x1x130xf32> to vector<8x130xf32>
    %523 = vector.extract_strided_slice %522 {offsets = [0, 0], sizes = [8, 128], strides = [1, 1]} : vector<8x130xf32> to vector<8x128xf32>
    %c0_386 = arith.constant 0 : index
    %c0_387 = arith.constant 0 : index
    %c0_388 = arith.constant 0 : index
    %524 = vector.load %arg4[%c0_386, %c0_387, %c0_388] : memref<9x8x8xf32, #tpu.memory_space<vmem>>, vector<1x8x8xf32>
    %525 = vector.shape_cast %524 : vector<1x8x8xf32> to vector<8x8xf32>
    %cst_389 = arith.constant dense<0.000000e+00> : vector<8x128xf32>
    %526 = tpu.matmul %525, %523, %cst_389 {dimension_numbers = #tpu.dot_dimension_numbers<[1], [0], [0], [1], [0, 0, 1, 1], [], []>} : vector<8x8xf32>, vector<8x128xf32>, vector<8x128xf32> -> vector<8x128xf32>
    %527 = arith.addf %520, %526 : vector<8x128xf32>
    %528 = vector.extract_strided_slice %522 {offsets = [0, 1], sizes = [8, 128], strides = [1, 1]} : vector<8x130xf32> to vector<8x128xf32>
    %c1_390 = arith.constant 1 : index
    %c0_391 = arith.constant 0 : index
    %c0_392 = arith.constant 0 : index
    %529 = vector.load %arg4[%c1_390, %c0_391, %c0_392] : memref<9x8x8xf32, #tpu.memory_space<vmem>>, vector<1x8x8xf32>
    %530 = vector.shape_cast %529 : vector<1x8x8xf32> to vector<8x8xf32>
    %cst_393 = arith.constant dense<0.000000e+00> : vector<8x128xf32>
    %531 = tpu.matmul %530, %528, %cst_393 {dimension_numbers = #tpu.dot_dimension_numbers<[1], [0], [0], [1], [0, 0, 1, 1], [], []>} : vector<8x8xf32>, vector<8x128xf32>, vector<8x128xf32> -> vector<8x128xf32>
    %532 = arith.addf %527, %531 : vector<8x128xf32>
    %533 = vector.extract_strided_slice %522 {offsets = [0, 2], sizes = [8, 128], strides = [1, 1]} : vector<8x130xf32> to vector<8x128xf32>
    %c2_394 = arith.constant 2 : index
    %c0_395 = arith.constant 0 : index
    %c0_396 = arith.constant 0 : index
    %534 = vector.load %arg4[%c2_394, %c0_395, %c0_396] : memref<9x8x8xf32, #tpu.memory_space<vmem>>, vector<1x8x8xf32>
    %535 = vector.shape_cast %534 : vector<1x8x8xf32> to vector<8x8xf32>
    %cst_397 = arith.constant dense<0.000000e+00> : vector<8x128xf32>
    %536 = tpu.matmul %535, %533, %cst_397 {dimension_numbers = #tpu.dot_dimension_numbers<[1], [0], [0], [1], [0, 0, 1, 1], [], []>} : vector<8x8xf32>, vector<8x128xf32>, vector<8x128xf32> -> vector<8x128xf32>
    %537 = arith.addf %532, %536 : vector<8x128xf32>
    %c0_398 = arith.constant 0 : index
    %c0_399 = arith.constant 0 : index
    %c0_400 = arith.constant 0 : index
    %c0_401 = arith.constant 0 : index
    %538 = vector.load %arg3[%c0_398, %c0_399, %c0_400, %c0_401] : memref<1x8x8x130xf32, #tpu.memory_space<vmem>>, vector<1x8x1x130xf32>
    %539 = vector.shape_cast %538 : vector<1x8x1x130xf32> to vector<8x130xf32>
    %540 = vector.extract_strided_slice %539 {offsets = [0, 0], sizes = [8, 128], strides = [1, 1]} : vector<8x130xf32> to vector<8x128xf32>
    %c3_402 = arith.constant 3 : index
    %c0_403 = arith.constant 0 : index
    %c0_404 = arith.constant 0 : index
    %541 = vector.load %arg4[%c3_402, %c0_403, %c0_404] : memref<9x8x8xf32, #tpu.memory_space<vmem>>, vector<1x8x8xf32>
    %542 = vector.shape_cast %541 : vector<1x8x8xf32> to vector<8x8xf32>
    %cst_405 = arith.constant dense<0.000000e+00> : vector<8x128xf32>
    %543 = tpu.matmul %542, %540, %cst_405 {dimension_numbers = #tpu.dot_dimension_numbers<[1], [0], [0], [1], [0, 0, 1, 1], [], []>} : vector<8x8xf32>, vector<8x128xf32>, vector<8x128xf32> -> vector<8x128xf32>
    %544 = arith.addf %537, %543 : vector<8x128xf32>
    %545 = vector.extract_strided_slice %539 {offsets = [0, 1], sizes = [8, 128], strides = [1, 1]} : vector<8x130xf32> to vector<8x128xf32>
    %c4_406 = arith.constant 4 : index
    %c0_407 = arith.constant 0 : index
    %c0_408 = arith.constant 0 : index
    %546 = vector.load %arg4[%c4_406, %c0_407, %c0_408] : memref<9x8x8xf32, #tpu.memory_space<vmem>>, vector<1x8x8xf32>
    %547 = vector.shape_cast %546 : vector<1x8x8xf32> to vector<8x8xf32>
    %cst_409 = arith.constant dense<0.000000e+00> : vector<8x128xf32>
    %548 = tpu.matmul %547, %545, %cst_409 {dimension_numbers = #tpu.dot_dimension_numbers<[1], [0], [0], [1], [0, 0, 1, 1], [], []>} : vector<8x8xf32>, vector<8x128xf32>, vector<8x128xf32> -> vector<8x128xf32>
    %549 = arith.addf %544, %548 : vector<8x128xf32>
    %550 = vector.extract_strided_slice %539 {offsets = [0, 2], sizes = [8, 128], strides = [1, 1]} : vector<8x130xf32> to vector<8x128xf32>
    %c5_410 = arith.constant 5 : index
    %c0_411 = arith.constant 0 : index
    %c0_412 = arith.constant 0 : index
    %551 = vector.load %arg4[%c5_410, %c0_411, %c0_412] : memref<9x8x8xf32, #tpu.memory_space<vmem>>, vector<1x8x8xf32>
    %552 = vector.shape_cast %551 : vector<1x8x8xf32> to vector<8x8xf32>
    %cst_413 = arith.constant dense<0.000000e+00> : vector<8x128xf32>
    %553 = tpu.matmul %552, %550, %cst_413 {dimension_numbers = #tpu.dot_dimension_numbers<[1], [0], [0], [1], [0, 0, 1, 1], [], []>} : vector<8x8xf32>, vector<8x128xf32>, vector<8x128xf32> -> vector<8x128xf32>
    %554 = arith.addf %549, %553 : vector<8x128xf32>
    %c0_414 = arith.constant 0 : index
    %c0_415 = arith.constant 0 : index
    %c1_416 = arith.constant 1 : index
    %c0_417 = arith.constant 0 : index
    %555 = vector.load %arg3[%c0_414, %c0_415, %c1_416, %c0_417] : memref<1x8x8x130xf32, #tpu.memory_space<vmem>>, vector<1x8x1x130xf32>
    %556 = vector.shape_cast %555 : vector<1x8x1x130xf32> to vector<8x130xf32>
    %557 = vector.extract_strided_slice %556 {offsets = [0, 0], sizes = [8, 128], strides = [1, 1]} : vector<8x130xf32> to vector<8x128xf32>
    %c6_418 = arith.constant 6 : index
    %c0_419 = arith.constant 0 : index
    %c0_420 = arith.constant 0 : index
    %558 = vector.load %arg4[%c6_418, %c0_419, %c0_420] : memref<9x8x8xf32, #tpu.memory_space<vmem>>, vector<1x8x8xf32>
    %559 = vector.shape_cast %558 : vector<1x8x8xf32> to vector<8x8xf32>
    %cst_421 = arith.constant dense<0.000000e+00> : vector<8x128xf32>
    %560 = tpu.matmul %559, %557, %cst_421 {dimension_numbers = #tpu.dot_dimension_numbers<[1], [0], [0], [1], [0, 0, 1, 1], [], []>} : vector<8x8xf32>, vector<8x128xf32>, vector<8x128xf32> -> vector<8x128xf32>
    %561 = arith.addf %554, %560 : vector<8x128xf32>
    %562 = vector.extract_strided_slice %556 {offsets = [0, 1], sizes = [8, 128], strides = [1, 1]} : vector<8x130xf32> to vector<8x128xf32>
    %c7_422 = arith.constant 7 : index
    %c0_423 = arith.constant 0 : index
    %c0_424 = arith.constant 0 : index
    %563 = vector.load %arg4[%c7_422, %c0_423, %c0_424] : memref<9x8x8xf32, #tpu.memory_space<vmem>>, vector<1x8x8xf32>
    %564 = vector.shape_cast %563 : vector<1x8x8xf32> to vector<8x8xf32>
    %cst_425 = arith.constant dense<0.000000e+00> : vector<8x128xf32>
    %565 = tpu.matmul %564, %562, %cst_425 {dimension_numbers = #tpu.dot_dimension_numbers<[1], [0], [0], [1], [0, 0, 1, 1], [], []>} : vector<8x8xf32>, vector<8x128xf32>, vector<8x128xf32> -> vector<8x128xf32>
    %566 = arith.addf %561, %565 : vector<8x128xf32>
    %567 = vector.extract_strided_slice %556 {offsets = [0, 2], sizes = [8, 128], strides = [1, 1]} : vector<8x130xf32> to vector<8x128xf32>
    %c8_426 = arith.constant 8 : index
    %c0_427 = arith.constant 0 : index
    %c0_428 = arith.constant 0 : index
    %568 = vector.load %arg4[%c8_426, %c0_427, %c0_428] : memref<9x8x8xf32, #tpu.memory_space<vmem>>, vector<1x8x8xf32>
    %569 = vector.shape_cast %568 : vector<1x8x8xf32> to vector<8x8xf32>
    %cst_429 = arith.constant dense<0.000000e+00> : vector<8x128xf32>
    %570 = tpu.matmul %569, %567, %cst_429 {dimension_numbers = #tpu.dot_dimension_numbers<[1], [0], [0], [1], [0, 0, 1, 1], [], []>} : vector<8x8xf32>, vector<8x128xf32>, vector<8x128xf32> -> vector<8x128xf32>
    %571 = arith.addf %566, %570 : vector<8x128xf32>
    %572 = vector.broadcast %3 : vector<8x1xf32> to vector<8x128xf32>
    %573 = arith.addf %571, %572 : vector<8x128xf32>
    %c8_i32_430 = arith.constant 8 : i32
    %574 = arith.muli %arg1, %c8_i32_430 : i32
    %c7_i32 = arith.constant 7 : i32
    %575 = arith.addi %574, %c7_i32 : i32
    %c16_i32_431 = arith.constant 16 : i32
    %576 = arith.cmpi slt, %575, %c16_i32_431 : i32
    %577 = vector.broadcast %576 : i1 to vector<1x128xi1>
    %578 = arith.andi %6, %577 : vector<1x128xi1>
    %579 = arith.extui %578 : vector<1x128xi1> to vector<1x128xi32>
    %580 = arith.sitofp %579 : vector<1x128xi32> to vector<1x128xf32>
    %581 = vector.broadcast %580 : vector<1x128xf32> to vector<8x128xf32>
    %582 = arith.mulf %573, %581 : vector<8x128xf32>
    %cst_432 = arith.constant dense<0.000000e+00> : vector<8xf32>
    %583 = vector.multi_reduction <add>, %582, %cst_432 [1] : vector<8x128xf32> to vector<8xf32>
    %584 = vector.shape_cast %583 : vector<8xf32> to vector<8x1xf32>
    %585 = arith.addf %512, %584 : vector<8x1xf32>
    %586 = arith.mulf %582, %573 : vector<8x128xf32>
    %cst_433 = arith.constant dense<0.000000e+00> : vector<8xf32>
    %587 = vector.multi_reduction <add>, %586, %cst_433 [1] : vector<8x128xf32> to vector<8xf32>
    %588 = vector.shape_cast %587 : vector<8xf32> to vector<8x1xf32>
    %589 = arith.addf %516, %588 : vector<8x1xf32>
    %c0_434 = arith.constant 0 : index
    %c0_435 = arith.constant 0 : index
    %c896 = arith.constant 896 : index
    %590 = vector.load %arg6[%c0_434, %c0_435, %c896] : memref<1x8x1024xf32, #tpu.memory_space<vmem>>, vector<1x8x128xf32>
    %591 = vector.shape_cast %590 : vector<1x8x128xf32> to vector<8x128xf32>
    %592 = vector.shape_cast %573 : vector<8x128xf32> to vector<1x8x128xf32>
    tpu.vector_store %arg6[%c0_434, %c0_435, %c896], %592 {strides = array<i32>} : memref<1x8x1024xf32, #tpu.memory_space<vmem>>, vector<1x8x128xf32>,
    %c0_436 = arith.constant 0 : index
    %c0_437 = arith.constant 0 : index
    %c0_438 = arith.constant 0 : index
    %593 = vector.load %arg7[%c0_436, %c0_437, %c0_438] : memref<1x8x2xf32, #tpu.memory_space<vmem>>, vector<1x8x1xf32>
    %594 = vector.shape_cast %593 : vector<1x8x1xf32> to vector<8x1xf32>
    %595 = arith.addf %594, %585 : vector<8x1xf32>
    %c0_439 = arith.constant 0 : index
    %c0_440 = arith.constant 0 : index
    %c0_441 = arith.constant 0 : index
    %596 = vector.load %arg7[%c0_439, %c0_440, %c0_441] : memref<1x8x2xf32, #tpu.memory_space<vmem>>, vector<1x8x1xf32>
    %597 = vector.shape_cast %596 : vector<1x8x1xf32> to vector<8x1xf32>
    %598 = vector.shape_cast %595 : vector<8x1xf32> to vector<1x8x1xf32>
    tpu.vector_store %arg7[%c0_439, %c0_440, %c0_441], %598 {strides = array<i32>} : memref<1x8x2xf32, #tpu.memory_space<vmem>>, vector<1x8x1xf32>,
    %c0_442 = arith.constant 0 : index
    %c0_443 = arith.constant 0 : index
    %c1_444 = arith.constant 1 : index
    %599 = vector.load %arg7[%c0_442, %c0_443, %c1_444] : memref<1x8x2xf32, #tpu.memory_space<vmem>>, vector<1x8x1xf32>
    %600 = vector.shape_cast %599 : vector<1x8x1xf32> to vector<8x1xf32>
    %601 = arith.addf %600, %589 : vector<8x1xf32>
    %c0_445 = arith.constant 0 : index
    %c0_446 = arith.constant 0 : index
    %c1_447 = arith.constant 1 : index
    %602 = vector.load %arg7[%c0_445, %c0_446, %c1_447] : memref<1x8x2xf32, #tpu.memory_space<vmem>>, vector<1x8x1xf32>
    %603 = vector.shape_cast %602 : vector<1x8x1xf32> to vector<8x1xf32>
    %604 = vector.shape_cast %601 : vector<8x1xf32> to vector<1x8x1xf32>
    tpu.vector_store %arg7[%c0_445, %c0_446, %c1_447], %604 {strides = array<i32>} : memref<1x8x2xf32, #tpu.memory_space<vmem>>, vector<1x8x1xf32>,
    return
  }
  func.func @transform_0(%arg0: i32, %arg1: i32) -> (i32, i32, i32, i32) {
    %c0_i32 = arith.constant 0 : i32
    %c0_i32_0 = arith.constant 0 : i32
    %c0_i32_1 = arith.constant 0 : i32
    return %arg0, %c0_i32, %arg1, %c0_i32_0 : i32, i32, i32, i32
  }
  func.func @transform_1(%arg0: i32, %arg1: i32) -> (i32, i32, i32, i32) {
    %c1_i32 = arith.constant 1 : i32
    %0 = arith.addi %arg1, %c1_i32 : i32
    %c0_i32 = arith.constant 0 : i32
    %c0_i32_0 = arith.constant 0 : i32
    %c0_i32_1 = arith.constant 0 : i32
    return %arg0, %c0_i32, %0, %c0_i32_0 : i32, i32, i32, i32
  }
  func.func @transform_2(%arg0: i32, %arg1: i32) -> (i32, i32, i32) {
    %c0_i32 = arith.constant 0 : i32
    %c0_i32_0 = arith.constant 0 : i32
    %c0_i32_1 = arith.constant 0 : i32
    %c0_i32_2 = arith.constant 0 : i32
    return %c0_i32, %c0_i32_0, %c0_i32_1 : i32, i32, i32
  }
  func.func @transform_3(%arg0: i32, %arg1: i32) -> (i32, i32) {
    %c0_i32 = arith.constant 0 : i32
    %c0_i32_0 = arith.constant 0 : i32
    %c0_i32_1 = arith.constant 0 : i32
    return %c0_i32, %c0_i32_0 : i32, i32
  }
  func.func @transform_4(%arg0: i32, %arg1: i32) -> (i32, i32, i32) {
    %c0_i32 = arith.constant 0 : i32
    %c0_i32_0 = arith.constant 0 : i32
    return %arg0, %c0_i32, %arg1 : i32, i32, i32
  }
  func.func @transform_5(%arg0: i32, %arg1: i32) -> (i32, i32, i32) {
    %c0_i32 = arith.constant 0 : i32
    %c0_i32_0 = arith.constant 0 : i32
    %c0_i32_1 = arith.constant 0 : i32
    return %arg0, %c0_i32, %c0_i32_0 : i32, i32, i32
  }
}

</mosaic_0001>

<bundles_post_ra>
// kernel: basic_conv2d.3
= control target key start
LH: loop header
LB: loop body
LE: loop exit
PB: predicated region body
PF: predicated region fallthrough
CT: control target
= control target key end

     0   :  { %s531_s9 = smov 0   ;;  %s533_s10 = smov 0   ;;  %s605_s0 = inlined_call_operand.vmem [shape: f32[2,8,2048], index: 0, kind: input, shape index: {}]   ;;  %s606_s1 = inlined_call_operand.vmem [shape: f32[2,8,2], index: 1, kind: input, shape index: {}]   ;;  %s607_s2 = inlined_call_operand.vmem [shape: f32[2,8,2048], index: 2, kind: output, shape index: {}]  }
   0x1   :  { %s535_s11 = smov 0   ;;  %s537_s12 = smov 0  }
   0x2   :  { %s539_s13 = smov 0  }
   0x3 LB: > { %s21_s14 = sadd.s32 1, %s503_s11  ;;  %s24_s15 = sadd.s32 1, %s507_s12  ;;  %s511_s13 = sphi %s539_s13, %s12_s13   ;;  %s507_s12 = sphi %s537_s12, %s611_s12   ;;  %s503_s11 = sphi %s535_s11, %s610_s11   ;;  %s499_s10 = sphi %s533_s10, %s609_s10   ;;  %s495_s9 = sphi %s531_s9, %s608_s9  }
   0x4   : > { %p22_p0 = scmp.ge.s32.totalorder %s21_s14, 2  ;;  %p399_p1 = scmp.ge.s32.totalorder %s511_s13, 1 }
   0x5   : > { %p142_p2 = scmp.lt.s32.totalorder %s511_s13, 5 }
   0x6   : > { %s613_s14 = smov (%p22_p0, %s21_s14), 0  ;;  %s615_s15 = smov (!%p22_p0, %s24_s15), %s507_s12 }
   0x7   : > { %p143_p3 = pnand %p399_p1, %p142_p2  ;;  %p26_p4 = scmp.ge.s32.totalorder %s615_s15, 2 }
   0x8   : > { %p177_p5 = scmp.lt.s32.totalorder (!%p143_p3), %s499_s10, 1  ;;  %v513_v0 = vmov (!%p143_p3), 0   ;;  %v514_v1 = vmov (!%p143_p3), 1   ;;  %s515_s20 = smov (!%p143_p3), 1  }
   0x9   : > { %s617_s15 = smov (%p26_p4, %s615_s15), 0  ;;  %146 = sbr.rel (%p143_p3) target bundleno = 311 (0x137), region = 28 }
   0xa   : > { %452 = vset.pattern.permute.xlu0 (!%p143_p3), %v513_v0  ;;  %453 = vset.pattern.permute.xlu1 (!%p143_p3), %v514_v1  ;;  %s400_s21 = sshll.u32 (!%p143_p3), %s495_s9, 3 }
   0xb   : > { %p179_p6 = scmp.lt.s32.totalorder (!%p143_p3), %s400_s21, 15 }
  0x10   : > { %s619_s10 = smov (!%p177_p5, %s499_s10), 1  ;;  %s621_s21 = smov (!%p179_p6, %s400_s21), 15 }
  0x11   : > { %s403_s16 = sshll.u32 %s619_s10, 3  ;;  %s401_s22 = sshll.u32 %s619_s10, 4 }
  0x12   : > { %s189_s19 = scalar_lea.vmem %s606_s1, %s403_s16  ;;  %s567_s23 = sadd.s32 %s401_s22, %s621_s21 }
  0x13   : > { %v200_v2 = vld [vmem:[%s189_s19] sm:$0xff]  ;;  %s402_s24 = sshll.u32 %s567_s23, 3 }
  0x14   : > { %v201_v3 = vmul.f32 0.00390625, %v200_v2  ;;  %s184_s27 = scalar_lea.vmem %s605_s0, %s402_s24  ;;  %s580_s30 = scalar_lea.vmem %s607_s2, %s402_s24 }
  0x15   : > { %v211_v11 = vld [vmem:[%s184_s27] sm:$0xff]  ;;  %v212_v12 = vld [vmem:[%s184_s27 + $0x8] sm:$0xff]  ;;  %v213_v13 = vld [vmem:[%s184_s27 + $0x10] sm:$0xff] }
  0x16   : > { %v202_v4 = vmul.f32 %v201_v3, %v201_v3  ;;  %v214_v14 = vld [vmem:[%s184_s27 + $0x18] sm:$0xff]  ;;  %v215_v15 = vld [vmem:[%s184_s27 + $0x20] sm:$0xff]  ;;  %v216_v16 = vld [vmem:[%s184_s27 + $0x28] sm:$0xff] }
  0x17   : > { %v217_v20 = vld [vmem:[%s184_s27 + $0x30] sm:$0xff]  ;;  %v218_v22 = vld [vmem:[%s184_s27 + $0x38] sm:$0xff] }
  0x18   : > { %204 = vrot.lane.b32.xlu0 %v202_v4, %s515_s20 }
  0x1c   : > { %221 = vperm.xlu0 %452, %v201_v3  }
  0x20   : > { %454 = vset.pattern.permute.xlu0 %v514_v1 }
  0x8a   : > { %v205_v5 = vpop.permute.xlu0 %204 }
  0x8b   : > { %v207_v6 = vsub.f32 %v201_v3, %v205_v5 }
  0x8d   : > { %v208_v7 = vmax.f32 %v207_v6, 0.0 }
  0x8f   : > { %v209_v8 = vadd.f32 1e-05, %v208_v7 }
  0x91   : > { %455 = vrsqrt.f32 %v209_v8 }
  0x9b   : > { %v456_v9 = vpop.eup %455  ;;  %v222_v10 = vpop.permute.xlu0 %221 }
  0x9c   : > { %234 = vperm.xlu1 %453, %v456_v9   ;;  %v224_v17 = vsub.f32 %v211_v11, %v222_v10  ;;  %v225_v18 = vsub.f32 %v212_v12, %v222_v10  ;;  %v226_v19 = vsub.f32 %v213_v13, %v222_v10  ;;  %v227_v21 = vsub.f32 %v214_v14, %v222_v10 }
  0x9d   : > { %v228_v23 = vsub.f32 %v215_v15, %v222_v10  ;;  %v229_v24 = vsub.f32 %v216_v16, %v222_v10  ;;  %v230_v26 = vsub.f32 %v217_v20, %v222_v10  ;;  %v231_v30 = vsub.f32 %v218_v22, %v222_v10 }
 0x11b   : > { %v235_v25 = vpop.permute.xlu1 %234 }
 0x11c   : > { %v237_v27 = vmul.f32 %v235_v25, %v224_v17  ;;  %v238_v28 = vmul.f32 %v235_v25, %v225_v18  ;;  %v239_v29 = vmul.f32 %v235_v25, %v226_v19  ;;  %v240_v31 = vmul.f32 %v235_v25, %v227_v21 }
 0x11d   : > { %v241_v32 = vmul.f32 %v235_v25, %v228_v23  ;;  %v242_v33 = vmul.f32 %v235_v25, %v229_v24  ;;  %v243_v34 = vmul.f32 %v235_v25, %v230_v26  ;;  %v244_v38 = vmul.f32 %v235_v25, %v231_v30 }
 0x11e   : > { %v253_v35 = vmul.f32 0.70710677, %v237_v27  ;;  %v254_v36 = vmul.f32 0.70710677, %v238_v28  ;;  %v255_v37 = vmul.f32 0.70710677, %v239_v29 }
 0x11f   : > { %v256_v39 = vmul.f32 0.70710677, %v240_v31  ;;  %v257_v40 = vmul.f32 0.70710677, %v241_v32  ;;  %v258_v41 = vmul.f32 0.70710677, %v242_v33 }
 0x120   : > { %457 = verf.f32 %v253_v35  ;;  %v259_v42 = vmul.f32 0.70710677, %v243_v34  ;;  %v260_v43 = vmul.f32 0.70710677, %v244_v38  ;;  %v245_v46 = vmul.f32 0.5, %v237_v27 }
 0x121   : > { %459 = verf.f32 %v254_v36  ;;  %v246_v49 = vmul.f32 0.5, %v238_v28  ;;  %v247_v52 = vmul.f32 0.5, %v239_v29  ;;  %v248_v56 = vmul.f32 0.5, %v240_v31 }
 0x122   : > { %461 = verf.f32 %v255_v37  ;;  %v249_v60 = vmul.f32 0.5, %v241_v32  ;;  %v250_v0 = vmul.f32 0.5, %v242_v33  ;;  %v251_v4 = vmul.f32 0.5, %v243_v34 }
 0x123   : > { %463 = verf.f32 %v256_v39  ;;  %v252_v7 = vmul.f32 0.5, %v244_v38 }
 0x124   : > { %465 = verf.f32 %v257_v40 }
 0x125   : > { %467 = verf.f32 %v258_v41 }
 0x126   : > { %469 = verf.f32 %v259_v42 }
 0x127   : > { %471 = verf.f32 %v260_v43 }
 0x12a   : > { %v458_v44 = vpop.eup %457 }
 0x12b   : > { %v460_v45 = vpop.eup %459  ;;  %v269_v47 = vadd.f32 1.0, %v458_v44 }
 0x12c   : > { %v462_v48 = vpop.eup %461  ;;  %v270_v50 = vadd.f32 1.0, %v460_v45 }
 0x12d   : > { %v464_v51 = vpop.eup %463  ;;  %v271_v53 = vadd.f32 1.0, %v462_v48  ;;  %v277_v54 = vmul.f32 %v269_v47, %v245_v46 }
 0x12e   : > { %v466_v55 = vpop.eup %465  ;;  %v272_v57 = vadd.f32 1.0, %v464_v51  ;;  %v278_v58 = vmul.f32 %v270_v50, %v246_v49 }
 0x12f   : > { %v468_v59 = vpop.eup %467  ;;  %v273_v61 = vadd.f32 1.0, %v466_v55  ;;  %v279_v62 = vmul.f32 %v271_v53, %v247_v52  ;;  %285 = vst [vmem:[%s580_s30] sm:$0xff] %v277_v54 }
 0x130   : > { %v470_v63 = vpop.eup %469  ;;  %v274_v1 = vadd.f32 1.0, %v468_v59  ;;  %v280_v2 = vmul.f32 %v272_v57, %v248_v56  ;;  %286 = vst [vmem:[%s580_s30 + $0x8] sm:$0xff] %v278_v58 }
 0x131   : > { %v472_v3 = vpop.eup %471  ;;  %v275_v5 = vadd.f32 1.0, %v470_v63  ;;  %v281_v6 = vmul.f32 %v273_v61, %v249_v60  ;;  %287 = vst [vmem:[%s580_s30 + $0x10] sm:$0xff] %v279_v62 }
 0x132   : > { %v276_v8 = vadd.f32 1.0, %v472_v3  ;;  %v282_v9 = vmul.f32 %v274_v1, %v250_v0  ;;  %288 = vst [vmem:[%s580_s30 + $0x18] sm:$0xff] %v280_v2 }
 0x133   : > { %v283_v10 = vmul.f32 %v275_v5, %v251_v4  ;;  %289 = vst [vmem:[%s580_s30 + $0x20] sm:$0xff] %v281_v6 }
 0x134   : > { %v284_v11 = vmul.f32 %v276_v8, %v252_v7  ;;  %290 = vst [vmem:[%s580_s30 + $0x28] sm:$0xff] %v282_v9 }
 0x135   : > { %291 = vst [vmem:[%s580_s30 + $0x30] sm:$0xff] %v283_v10 }
 0x136   : > { %292 = vst [vmem:[%s580_s30 + $0x38] sm:$0xff] %v284_v11 }
 0x137 PF: > { %s12_s13 = sadd.s32 1, %s511_s13   ;;  %s608_s9 = smov %s503_s11 }
 0x138   : > { %p9_p7 = scmp.ge.s32.totalorder %s12_s13, 6   ;;  %s609_s10 = smov %s507_s12 }
 0x139   : > { %s610_s11 = smov %s613_s14  ;;  %s611_s12 = smov %s617_s15 }
 0x13a   :  { %11 = sbr.rel (!%p9_p7) target bundleno = 3 (0x3), region = 61 }

// kernel: basic_conv2d.2
= control target key start
LH: loop header
LB: loop body
LE: loop exit
PB: predicated region body
PF: predicated region fallthrough
CT: control target
= control target key end

     0   :  { %s10912_s0 = inlined_call_operand.vmem [shape: f32[2,8,24,130], index: 0, kind: input, shape index: {}, may-alias: {0,1}]   ;;  %s10913_s1 = inlined_call_operand.vmem [shape: f32[2,8,24,130], index: 1, kind: input, shape index: {}, may-alias: {0,1}]   ;;  %s10914_s2 = inlined_call_operand.vmem [shape: f32[9,8,8], index: 2, kind: input, shape index: {}]   ;;  %s10915_s3 = inlined_call_operand.vmem [shape: f32[8,1], index: 3, kind: input, shape index: {}]   ;;  %s10916_s4 = inlined_call_operand.vmem [shape: f32[2,8,2048], index: 4, kind: output, shape index: {0}]   ;;  %s10917_s5 = inlined_call_operand.vmem [shape: f32[2,8,2], index: 5, kind: output, shape index: {1}]  }
   0x1   :  { %10918 = sst [smem:[#allocation4_spill]] %s10912_s0 }
   0x2   :  { %10919 = sst [smem:[#allocation5_spill]] %s10913_s1 }
   0x3   :  { %s9523_s18 = smov 0   ;;  %s9525_s19 = smov 0  }
   0x4   :  { %s9527_s20 = smov 0   ;;  %s9529_s21 = smov 0  }
   0x5   :  { %s9531_s22 = smov 0   ;;  %s9533_s23 = smov 0  }
   0x6   :  { %s9535_s24 = smov 0   ;;  %s9537_s25 = smov 0  }
   0x7   :  { %s9539_s26 = smov 0  }
   0x8 LB: > { %s25_s27 = sadd.s32 1, %s9476_s24  ;;  %s28_s28 = sadd.s32 1, %s9480_s25  ;;  %s9484_s26 = sphi %s9539_s26, %s16_s26   ;;  %s9480_s25 = sphi %s9537_s25, %s10932_s25   ;;  %s9476_s24 = sphi %s9535_s24, %s10931_s24   ;;  %s9472_s23 = sphi %s9533_s23, %s10930_s23   ;;  %s9468_s22 = sphi %s9531_s22, %s10929_s22   ;;  %s9464_s21 = sphi %s9529_s21, %s10928_s21   ;;  %s9460_s20 = sphi %s9527_s20, %s10927_s20   ;;  %s9456_s19 = sphi %s9525_s19, %s10926_s19   ;;  %s9452_s18 = sphi %s9523_s18, %s10925_s18  }
   0x9   : > { %p26_p0 = scmp.ge.s32.totalorder %s25_s27, 2  ;;  %p44_p1 = scmp.ne.s32.totalorder %s9464_s21, %s9460_s20 }
   0xa   : > { %p45_p2 = scmp.eq.s32.totalorder %s9484_s26, 0  ;;  %s37_s9 = sadd.s32 1, %s9464_s21 }
   0xb   : > { %s9573_s29 = scalar_select %p26_p0, 0, %s25_s27  }
   0xc   : > { %s10934_s28 = smov (!%p26_p0, %s28_s28), %s9480_s25  ;;  %p9578_p3 = por %p45_p2, %p44_p1 }
   0xd   : > { %p30_p4 = scmp.ge.s32.totalorder %s10934_s28, 2  ;;  %s61_s6 = sadd.s32 1, %s9573_s29 }
   0xe   : > { %s33_s7 = ssub.s32 %s9476_s24, %s9573_s29  ;;  %s63_s8 = ssub.s32 %s25_s27, %s61_s6 }
   0xf   : > { %s10936_s28 = smov (%p30_p4, %s10934_s28), 0  ;;  %p74_p5 = scmp.ne.s32.totalorder %s9456_s19, %s9452_s18 }
  0x10   : > { %s32_s10 = ssub.s32 %s9480_s25, %s10936_s28  ;;  %s67_s11 = sadd.s32 1, %s9456_s19 }
  0x11   : > { %s34_s12 = sor.u32 %s33_s7, %s32_s10  ;;  %s64_s13 = sor.u32 %s63_s8, %s32_s10 }
  0x12   : > { %p35_p6 = scmp.eq.s32.totalorder %s34_s12, 0  ;;  %p65_p7 = scmp.eq.s32.totalorder %s64_s13, 0 }
  0x13   : > { %p9595_p8 = por %p74_p5, %p45_p2  ;;  %p8460_p9 = scmp.ge.s32.totalorder %s9484_s26, 4 }
  0x14   : > { %s9600_s15 = scalar_select %p35_p6, %s9464_s21, %s37_s9  }
  0x15   : > { %s9603_s16 = scalar_select %p65_p7, %s9456_s19, %s67_s11  }
  0x16   : > { %202 = sbr.rel (%p8460_p9) target bundleno = 65 (0x41), region = 24 }
  0x1d   : > { %205 = sbr.rel (!%p9578_p3) target bundleno = 47 (0x2f), region = 28  ;;  %s207_s17 = sand.u32 (%p9578_p3), 1, %s9464_s21  }
  0x1e   : > { %s8462_s27 = sshll.u32 (%p9578_p3), %s9476_s24, 1  ;;  %s8461_s6 = sshll.u32 (%p9578_p3), %s207_s17, 7 }
  0x1f   : > { %s9331_s7 = smul.u32 (%p9578_p3), 48, %s9480_s25  ;;  %s10922_s0 = sld [smem:[#allocation4_spill]] (%p9578_p3) }
  0x20   : > { %s209_s30 = scalar_lea.vmem (%p9578_p3), [#allocation2], %s8461_s6 }
  0x21   : > { %s212_s8 = sadd.s32 (%p9578_p3), %s9331_s7, %s8462_s27 }
  0x22   : > { %s8463_s10 = sshll.u32 (%p9578_p3), %s212_s8, 3 }
  0x25   : > { %s9614_s11 = scalar_lea.vmem %s10922_s0, %s8463_s10 }
  0x26   : > { %v227_v0 = vld [vmem:[%s9614_s11] sm:$0xff]  ;;  %v229_v1 = vld [vmem:[%s9614_s11 + $0x8] sm:$0xff]  ;;  %v231_v2 = vld [vmem:[%s9614_s11 + $0x30] sm:$0xff] }
  0x27   : > { %228 = vst [vmem:[%s209_s30] sm:$0xff] %v227_v0  ;;  %230 = vst [vmem:[%s209_s30 + $0x8] sm:$0xff] %v229_v1  ;;  %v233_v3 = vld [vmem:[%s9614_s11 + $0x38] sm:$0xff]  ;;  %v235_v4 = vld [vmem:[%s9614_s11 + $0x60] sm:$0xff] }
  0x28   : > { %232 = vst [vmem:[%s209_s30 + $0x10] sm:$0xff] %v231_v2  ;;  %v237_v5 = vld [vmem:[%s9614_s11 + $0x68] sm:$0xff]  ;;  %234 = vst [vmem:[%s209_s30 + $0x18] sm:$0xff] %v233_v3  ;;  %v239_v6 = vld [vmem:[%s9614_s11 + $0x90] sm:$0xff] }
  0x29   : > { %236 = vst [vmem:[%s209_s30 + $0x20] sm:$0xff] %v235_v4  ;;  %238 = vst [vmem:[%s209_s30 + $0x28] sm:$0xff] %v237_v5  ;;  %v241_v7 = vld [vmem:[%s9614_s11 + $0x98] sm:$0xff]  ;;  %v243_v8 = vld [vmem:[%s9614_s11 + $0xc0] sm:$0xff] }
  0x2a   : > { %240 = vst [vmem:[%s209_s30 + $0x30] sm:$0xff] %v239_v6  ;;  %242 = vst [vmem:[%s209_s30 + $0x38] sm:$0xff] %v241_v7  ;;  %v245_v9 = vld [vmem:[%s9614_s11 + $0xc8] sm:$0xff]  ;;  %v247_v10 = vld [vmem:[%s9614_s11 + $0xf0] sm:$0xff] }
  0x2b   : > { %244 = vst [vmem:[%s209_s30 + $0x40] sm:$0xff] %v243_v8  ;;  %v249_v11 = vld [vmem:[%s9614_s11 + $0xf8] sm:$0xff]  ;;  %246 = vst [vmem:[%s209_s30 + $0x48] sm:$0xff] %v245_v9  ;;  %v251_v12 = vld [vmem:[%s9614_s11 + $0x120] sm:$0xff] }
  0x2c   : > { %248 = vst [vmem:[%s209_s30 + $0x50] sm:$0xff] %v247_v10  ;;  %250 = vst [vmem:[%s209_s30 + $0x58] sm:$0xff] %v249_v11  ;;  %v253_v13 = vld [vmem:[%s9614_s11 + $0x128] sm:$0xff]  ;;  %v255_v14 = vld [vmem:[%s9614_s11 + $0x150] sm:$0xff] }
  0x2d   : > { %252 = vst [vmem:[%s209_s30 + $0x60] sm:$0xff] %v251_v12  ;;  %254 = vst [vmem:[%s209_s30 + $0x68] sm:$0xff] %v253_v13  ;;  %v257_v15 = vld [vmem:[%s9614_s11 + $0x158] sm:$0xff] }
  0x2e   : > { %256 = vst [vmem:[%s209_s30 + $0x70] sm:$0xff] %v255_v14  ;;  %258 = vst [vmem:[%s209_s30 + $0x78] sm:$0xff] %v257_v15 }
  0x2f PF: > { %264 = sbr.rel (!%p9595_p8) target bundleno = 65 (0x41), region = 51  ;;  %s266_s13 = sand.u32 (%p9595_p8), 1, %s9456_s19  }
  0x30   : > { %s8465_s17 = sshll.u32 (%p9595_p8), %s9476_s24, 1  ;;  %s8464_s27 = sshll.u32 (%p9595_p8), %s266_s13, 7 }
  0x31   : > { %s8365_s6 = smul.u32 (%p9595_p8), 48, %s9480_s25  ;;  %s10923_s1 = sld [smem:[#allocation5_spill]] (%p9595_p8) }
  0x32   : > { %s268_s14 = scalar_lea.vmem (%p9595_p8), [#allocation3], %s8464_s27 }
  0x33   : > { %s8366_s7 = sadd.s32 (%p9595_p8), %s8465_s17, %s8365_s6 }
  0x34   : > { %s8466_s8 = sshll.u32 (%p9595_p8), %s8366_s7, 3 }
  0x37   : > { %s9640_s9 = scalar_lea.vmem %s10923_s1, %s8466_s8 }
  0x38   : > { %v8467_v16 = vld [vmem:[%s9640_s9 + $0x10] sm:$0xff]  ;;  %v8468_v17 = vld [vmem:[%s9640_s9 + $0x18] sm:$0xff]  ;;  %v8469_v18 = vld [vmem:[%s9640_s9 + $0x40] sm:$0xff] }
  0x39   : > { %288 = vst [vmem:[%s268_s14] sm:$0xff] %v8467_v16  ;;  %290 = vst [vmem:[%s268_s14 + $0x8] sm:$0xff] %v8468_v17  ;;  %v8470_v19 = vld [vmem:[%s9640_s9 + $0x48] sm:$0xff]  ;;  %v8471_v20 = vld [vmem:[%s9640_s9 + $0x70] sm:$0xff] }
  0x3a   : > { %292 = vst [vmem:[%s268_s14 + $0x10] sm:$0xff] %v8469_v18  ;;  %v8472_v21 = vld [vmem:[%s9640_s9 + $0x78] sm:$0xff]  ;;  %294 = vst [vmem:[%s268_s14 + $0x18] sm:$0xff] %v8470_v19  ;;  %v8473_v22 = vld [vmem:[%s9640_s9 + $0xa0] sm:$0xff] }
  0x3b   : > { %296 = vst [vmem:[%s268_s14 + $0x20] sm:$0xff] %v8471_v20  ;;  %298 = vst [vmem:[%s268_s14 + $0x28] sm:$0xff] %v8472_v21  ;;  %v8474_v23 = vld [vmem:[%s9640_s9 + $0xa8] sm:$0xff]  ;;  %v8475_v24 = vld [vmem:[%s9640_s9 + $0xd0] sm:$0xff] }
  0x3c   : > { %300 = vst [vmem:[%s268_s14 + $0x30] sm:$0xff] %v8473_v22  ;;  %302 = vst [vmem:[%s268_s14 + $0x38] sm:$0xff] %v8474_v23  ;;  %v8476_v25 = vld [vmem:[%s9640_s9 + $0xd8] sm:$0xff]  ;;  %v8477_v26 = vld [vmem:[%s9640_s9 + $0x100] sm:$0xff] }
  0x3d   : > { %304 = vst [vmem:[%s268_s14 + $0x40] sm:$0xff] %v8475_v24  ;;  %v8478_v27 = vld [vmem:[%s9640_s9 + $0x108] sm:$0xff]  ;;  %306 = vst [vmem:[%s268_s14 + $0x48] sm:$0xff] %v8476_v25  ;;  %v8479_v28 = vld [vmem:[%s9640_s9 + $0x130] sm:$0xff] }
  0x3e   : > { %308 = vst [vmem:[%s268_s14 + $0x50] sm:$0xff] %v8477_v26  ;;  %310 = vst [vmem:[%s268_s14 + $0x58] sm:$0xff] %v8478_v27  ;;  %v8480_v29 = vld [vmem:[%s9640_s9 + $0x138] sm:$0xff]  ;;  %v8481_v30 = vld [vmem:[%s9640_s9 + $0x160] sm:$0xff] }
  0x3f   : > { %312 = vst [vmem:[%s268_s14 + $0x60] sm:$0xff] %v8479_v28  ;;  %314 = vst [vmem:[%s268_s14 + $0x68] sm:$0xff] %v8480_v29  ;;  %v8482_v31 = vld [vmem:[%s9640_s9 + $0x168] sm:$0xff] }
  0x40   : > { %316 = vst [vmem:[%s268_s14 + $0x70] sm:$0xff] %v8481_v30  ;;  %318 = vst [vmem:[%s268_s14 + $0x78] sm:$0xff] %v8482_v31 }
  0x41 PF: > { %p8483_p10 = scmp.ge.s32.totalorder %s9484_s26, 1  ;;  %p323_p11 = scmp.lt.s32.totalorder %s9484_s26, 5 }
  0x43   : > { %p324_p12 = pnand %p8483_p10, %p323_p11 }
  0x44   : > { %s330_s11 = sand.u32 (!%p324_p12), 1, %s9460_s20   ;;  %s337_s30 = sand.u32 (!%p324_p12), 1, %s9452_s18  }
  0x45   : > { %327 = sbr.rel (%p324_p12) target bundleno = 782 (0x30e), region = 74  ;;  %s8484_s13 = sshll.u32 (!%p324_p12), %s330_s11, 7 }
  0x46   : > { %s8485_s17 = sshll.u32 (!%p324_p12), %s337_s30, 7  ;;  %s9663_s27 = sshll.u32 (!%p324_p12), %s9468_s22, 3 }
  0x47   : > { %p378_p13 = scmp.lt.s32.totalorder (!%p324_p12), %s9472_s23, 1  ;;  %p380_p0 = scmp.lt.s32.totalorder (!%p324_p12), %s9663_s27, 15 }
  0x48   : > { %s9679_s0 = scalar_lea.vmem (!%p324_p12), [#allocation2], %s8484_s13  ;;  %s9681_s1 = scalar_lea.vmem (!%p324_p12), [#allocation3], %s8485_s17 }
  0x49   : > { %p8490_p1 = scmp.ne.s32.totalorder (!%p324_p12), %s9468_s22, 0 }
  0x4c   : > { %s10938_s23 = smov (!%p378_p13, %s9472_s23), 1  ;;  %394 = sbr.rel (%p8490_p1) target bundleno = 83 (0x53), region = 86 }
  0x4d   : > { %s381_s6 = scalar_select %p380_p0, %s9663_s27, 15 }
  0x4e   : > { %s8487_s7 = sshll.u32 %s10938_s23, 4  ;;  %s8489_s8 = sshll.u32 %s10938_s23, 3  ;;  %vm395_vm0 = vcmask (!%p8490_p1), 15360   ;;  %v9486_v32 = vmov (!%p8490_p1), 0.0  }
  0x4f   : > { %s383_s10 = sadd.s32 %s8487_s7, %s381_s6  ;;  %s9672_s14 = scalar_lea.vmem %s10917_s5, %s8489_s8 }
  0x50   : > { %s8488_s20 = sshll.u32 %s383_s10, 3  ;;  %396 = vst.msk [vmem:[%s9672_s14] sm:$0xff] (!%p8490_p1), %vm395_vm0, %v9486_v32 }
  0x51   : > { %s9677_s30 = scalar_lea.vmem %s10916_s4, %s8488_s20 }
  0x53 PF: > { %v398_v33 = vlaneseq  ;;  %v401_v34 = vld [vmem:[%s9679_s0] ss:$8 sm:$0x3]  ;;  %v8491_v35 = vld [vmem:[%s9679_s0 + $0x10] ss:$8 sm:$0x3] }
  0x54   : > { %v8492_v36 = vld [vmem:[%s9679_s0 + $0x20] ss:$8 sm:$0x3]  ;;  %v8493_v37 = vld [vmem:[%s9679_s0 + $0x30] ss:$8 sm:$0x3]  ;;  %v427_v47 = vcombine.low %v401_v34, %v8491_v35 }
  0x55   : > { %v8494_v38 = vld [vmem:[%s9679_s0 + $0x40] ss:$8 sm:$0x3]  ;;  %v8495_v39 = vld [vmem:[%s9679_s0 + $0x50] ss:$8 sm:$0x3]  ;;  %v428_v50 = vcombine.low %v8492_v36, %v8493_v37 }
  0x56   : > { %v8496_v40 = vld [vmem:[%s9679_s0 + $0x60] ss:$8 sm:$0x3]  ;;  %v8497_v41 = vld [vmem:[%s9679_s0 + $0x70] ss:$8 sm:$0x3]  ;;  %v429_v51 = vcombine.low %v8494_v38, %v8495_v39 }
  0x57   : > { %v435_v42 = vshrl.u32 %v398_v33, 7  ;;  %v9487_v43 = vmov 1966171168   ;;  %v8503_v45 = vld [vmem:[%s9679_s0 + $0x1] ss:$8 sm:$0x3]  ;;  %v430_v52 = vcombine.low %v8496_v40, %v8497_v41 }
  0x58   : > { %v432_v44 = vunpack.c.l.s4 %v9487_v43  ;;  %v8504_v46 = vld [vmem:[%s9679_s0 + $0x11] ss:$8 sm:$0x3]  ;;  %v8505_v48 = vld [vmem:[%s9679_s0 + $0x21] ss:$8 sm:$0x3] }
  0x59   : > { %v8506_v49 = vld [vmem:[%s9679_s0 + $0x31] ss:$8 sm:$0x3]  ;;  %v8507_v54 = vld [vmem:[%s9679_s0 + $0x41] ss:$8 sm:$0x3]  ;;  %v757_v58 = vcombine.low %v8503_v45, %v8504_v46 }
  0x5a   : > { %v433_v53 = vunpack.c.0.s8 %v432_v44  ;;  %v8508_v55 = vld [vmem:[%s9679_s0 + $0x51] ss:$8 sm:$0x3]  ;;  %v8509_v56 = vld [vmem:[%s9679_s0 + $0x61] ss:$8 sm:$0x3]  ;;  %v758_v59 = vcombine.low %v8505_v48, %v8506_v49 }
  0x5b   : > { %v8510_v57 = vld [vmem:[%s9679_s0 + $0x71] ss:$8 sm:$0x3]  ;;  %v759_v60 = vcombine.low %v8507_v54, %v8508_v55  ;;  %v8517_v63 = vld [vmem:[%s9679_s0 + $0x2] ss:$8 sm:$0x3] }
  0x5c   : > { %v9702_v61 = vsub.s32 %v433_v53, %v435_v42  ;;  %v760_v62 = vcombine.low %v8509_v56, %v8510_v57  ;;  %v8518_v0 = vld [vmem:[%s9679_s0 + $0x12] ss:$8 sm:$0x3]  ;;  %v8519_v14 = vld [vmem:[%s9679_s0 + $0x22] ss:$8 sm:$0x3] }
  0x5d   : > { %v1088_v1 = vcombine.low %v8517_v63, %v8518_v0  ;;  %v8520_v15 = vld [vmem:[%s9679_s0 + $0x32] ss:$8 sm:$0x3]  ;;  %v8521_v20 = vld [vmem:[%s9679_s0 + $0x42] ss:$8 sm:$0x3] }
  0x5e   : > { %v437_v2 = vrot.slane %v427_v47, %v9702_v61  ;;  %v444_v3 = vrot.slane %v428_v50, %v9702_v61  ;;  %v451_v4 = vrot.slane %v429_v51, %v9702_v61  ;;  %v458_v5 = vrot.slane %v430_v52, %v9702_v61  ;;  %v8522_v21 = vld [vmem:[%s9679_s0 + $0x52] ss:$8 sm:$0x3]  ;;  %v8523_v26 = vld [vmem:[%s9679_s0 + $0x62] ss:$8 sm:$0x3] }
  0x5f   : > { %v767_v6 = vrot.slane %v757_v58, %v9702_v61  ;;  %v774_v7 = vrot.slane %v758_v59, %v9702_v61  ;;  %v781_v8 = vrot.slane %v759_v60, %v9702_v61  ;;  %v788_v9 = vrot.slane %v760_v62, %v9702_v61  ;;  %v8524_v27 = vld [vmem:[%s9679_s0 + $0x72] ss:$8 sm:$0x3]  ;;  %v8533_v29 = vld [vmem:[%s9679_s0 + $0x1] ss:$8 sm:$0x3] }
  0x60   : > { %v459_v10 = vcombine.low %v437_v2, %v444_v3  ;;  %v461_v11 = vcombine.low %v451_v4, %v458_v5  ;;  %v460_v12 = vcombine.high %v437_v2, %v444_v3  ;;  %v462_v13 = vcombine.high %v451_v4, %v458_v5  ;;  %v8534_v30 = vld [vmem:[%s9679_s0 + $0x11] ss:$8 sm:$0x3]  ;;  %v8535_v31 = vld [vmem:[%s9679_s0 + $0x21] ss:$8 sm:$0x3] }
  0x61   : > { %v883_v16 = vcombine.high %v767_v6, %v774_v7  ;;  %v884_v17 = vcombine.high %v781_v8, %v788_v9  ;;  %v789_v18 = vcombine.low %v767_v6, %v774_v7  ;;  %v790_v19 = vcombine.low %v781_v8, %v788_v9  ;;  %v8536_v32 = vld [vmem:[%s9679_s0 + $0x31] ss:$8 sm:$0x3]  ;;  %v8537_v38 = vld [vmem:[%s9679_s0 + $0x41] ss:$8 sm:$0x3] }
  0x62   : > { %v469_v22 = vrot.slane %v459_v10, %v9702_v61  ;;  %v483_v23 = vrot.slane %v461_v11, %v9702_v61  ;;  %v476_v24 = vrot.slane %v460_v12, %v9702_v61  ;;  %v490_v25 = vrot.slane %v462_v13, %v9702_v61  ;;  %v8538_v39 = vld [vmem:[%s9679_s0 + $0x51] ss:$8 sm:$0x3]  ;;  %v8539_v44 = vld [vmem:[%s9679_s0 + $0x61] ss:$8 sm:$0x3] }
  0x63   : > { %v891_v28 = vrot.slane %v883_v16, %v9702_v61  ;;  %v898_v35 = vrot.slane %v884_v17, %v9702_v61  ;;  %v1089_v36 = vcombine.low %v8519_v14, %v8520_v15  ;;  %v1090_v37 = vcombine.low %v8521_v20, %v8522_v21  ;;  %v8540_v45 = vld [vmem:[%s9679_s0 + $0x71] ss:$8 sm:$0x3]  ;;  %s9488_s22 = smov 126   ;;  %s9489_s23 = smov 127  }
  0x64   : > { %v9729_v34 = vcombine.low %v469_v22, %v483_v23  ;;  %v797_v40 = vrot.slane %v789_v18, %v9702_v61  ;;  %v804_v41 = vrot.slane %v790_v19, %v9702_v61  ;;  %v1091_v42 = vcombine.low %v8523_v26, %v8524_v27  ;;  %v8546_v60 = vld [vmem:[%s9679_s0 + $0x2] ss:$8 sm:$0x3]  ;;  %v8547_v62 = vld [vmem:[%s9679_s0 + $0x12] ss:$8 sm:$0x3] }
  0x65   : > { %v1098_v43 = vrot.slane %v1088_v1, %v9702_v61  ;;  %v492_v46 = vcombine.low %v476_v24, %v490_v25  ;;  %v1105_v47 = vrot.slane %v1089_v36, %v9702_v61  ;;  %v1112_v48 = vrot.slane %v1090_v37, %v9702_v61  ;;  %v8548_v3 = vld [vmem:[%s9679_s0 + $0x22] ss:$8 sm:$0x3]  ;;  %v8549_v4 = vld [vmem:[%s9679_s0 + $0x32] ss:$8 sm:$0x3] }
  0x66   : > { %650 = vrot.lane.b32.xlu1 %v9729_v34, %s9488_s22  ;;  %493 = vrot.lane.b32.xlu0 %v9729_v34, %s9489_s23  ;;  %v1119_v49 = vrot.slane %v1091_v42, %v9702_v61  ;;  %v1434_v50 = vcombine.low %v8533_v29, %v8534_v30  ;;  %v1435_v51 = vcombine.low %v8535_v31, %v8536_v32  ;;  %v8550_v6 = vld [vmem:[%s9679_s0 + $0x42] ss:$8 sm:$0x3]  ;;  %v8551_v7 = vld [vmem:[%s9679_s0 + $0x52] ss:$8 sm:$0x3] }
  0x67   : > { %v1436_v52 = vcombine.low %v8537_v38, %v8538_v39  ;;  %v1437_v53 = vcombine.low %v8539_v44, %v8540_v45  ;;  %v899_v54 = vcombine.low %v891_v28, %v898_v35  ;;  %v9746_v55 = vcombine.low %v797_v40, %v804_v41  ;;  %v8552_v11 = vld [vmem:[%s9679_s0 + $0x62] ss:$8 sm:$0x3]  ;;  %v8553_v12 = vld [vmem:[%s9679_s0 + $0x72] ss:$8 sm:$0x3] }
  0x68   : > { %v1214_v56 = vcombine.high %v1098_v43, %v1105_v47  ;;  %v1215_v57 = vcombine.high %v1112_v48, %v1119_v49  ;;  %v1120_v58 = vcombine.low %v1098_v43, %v1105_v47  ;;  %v1121_v59 = vcombine.low %v1112_v48, %v1119_v49  ;;  %v8560_v23 = vld [vmem:[%s9679_s0 + $0x3] ss:$8 sm:$0x3]  ;;  %v8561_v24 = vld [vmem:[%s9679_s0 + $0x13] ss:$8 sm:$0x3] }
  0x69   : > { %v1444_v63 = vrot.slane %v1434_v50, %v9702_v61  ;;  %v1451_v0 = vrot.slane %v1435_v51, %v9702_v61  ;;  %v1458_v1 = vrot.slane %v1436_v52, %v9702_v61  ;;  %v1465_v2 = vrot.slane %v1437_v53, %v9702_v61  ;;  %v8562_v25 = vld [vmem:[%s9679_s0 + $0x23] ss:$8 sm:$0x3]  ;;  %v8563_v26 = vld [vmem:[%s9679_s0 + $0x33] ss:$8 sm:$0x3] }
  0x6a   : > { %652 = vrot.lane.b32.xlu1 %v492_v46, %s9488_s22  ;;  %495 = vrot.lane.b32.xlu0 %v492_v46, %s9489_s23  ;;  %v1222_v5 = vrot.slane %v1214_v56, %v9702_v61  ;;  %v1229_v8 = vrot.slane %v1215_v57, %v9702_v61  ;;  %v1128_v9 = vrot.slane %v1120_v58, %v9702_v61  ;;  %v8564_v29 = vld [vmem:[%s9679_s0 + $0x43] ss:$8 sm:$0x3]  ;;  %v8565_v30 = vld [vmem:[%s9679_s0 + $0x53] ss:$8 sm:$0x3] }
  0x6b   : > { %v1135_v10 = vrot.slane %v1121_v59, %v9702_v61  ;;  %v1467_v13 = vcombine.high %v1444_v63, %v1451_v0  ;;  %v1469_v14 = vcombine.high %v1458_v1, %v1465_v2  ;;  %v1751_v15 = vcombine.low %v8546_v60, %v8547_v62  ;;  %v8566_v37 = vld [vmem:[%s9679_s0 + $0x63] ss:$8 sm:$0x3]  ;;  %v8567_v38 = vld [vmem:[%s9679_s0 + $0x73] ss:$8 sm:$0x3] }
  0x6c   : > { %v1466_v16 = vcombine.low %v1444_v63, %v1451_v0  ;;  %v1752_v17 = vcombine.low %v8548_v3, %v8549_v4  ;;  %v1753_v18 = vcombine.low %v8550_v6, %v8551_v7  ;;  %v1754_v19 = vcombine.low %v8552_v11, %v8553_v12  ;;  %v8575_v56 = vld [vmem:[%s9679_s0 + $0x2] ss:$8 sm:$0x3]  ;;  %v8576_v57 = vld [vmem:[%s9679_s0 + $0x12] ss:$8 sm:$0x3] }
  0x6d   : > { %v1230_v20 = vcombine.low %v1222_v5, %v1229_v8  ;;  %v9772_v21 = vcombine.low %v1128_v9, %v1135_v10  ;;  %v1468_v22 = vcombine.low %v1458_v1, %v1465_v2  ;;  %v1483_v27 = vrot.slane %v1467_v13, %v9702_v61  ;;  %v8577_v60 = vld [vmem:[%s9679_s0 + $0x22] ss:$8 sm:$0x3]  ;;  %v8578_v62 = vld [vmem:[%s9679_s0 + $0x32] ss:$8 sm:$0x3] }
  0x6e   : > { %902 = vrot.lane.b32.xlu1 %v899_v54, %s9489_s23  ;;  %900 = vrot.lane.b32.xlu0 %v9746_v55, %s9489_s23  ;;  %v1497_v28 = vrot.slane %v1469_v14, %v9702_v61  ;;  %v1761_v31 = vrot.slane %v1751_v15, %v9702_v61  ;;  %v1768_v32 = vrot.slane %v1752_v17, %v9702_v61  ;;  %v8579_v1 = vld [vmem:[%s9679_s0 + $0x42] ss:$8 sm:$0x3]  ;;  %v8580_v2 = vld [vmem:[%s9679_s0 + $0x52] ss:$8 sm:$0x3] }
  0x6f   : > { %v1775_v35 = vrot.slane %v1753_v18, %v9702_v61  ;;  %v1782_v36 = vrot.slane %v1754_v19, %v9702_v61  ;;  %v1476_v39 = vrot.slane %v1466_v16, %v9702_v61  ;;  %v1490_v40 = vrot.slane %v1468_v22, %v9702_v61  ;;  %v8581_v3 = vld [vmem:[%s9679_s0 + $0x62] ss:$8 sm:$0x3]  ;;  %v8582_v4 = vld [vmem:[%s9679_s0 + $0x72] ss:$8 sm:$0x3] }
  0x70   : > { %v2079_v41 = vcombine.low %v8560_v23, %v8561_v24  ;;  %v2080_v42 = vcombine.low %v8562_v25, %v8563_v26  ;;  %v2081_v43 = vcombine.low %v8564_v29, %v8565_v30  ;;  %v2082_v44 = vcombine.low %v8566_v37, %v8567_v38  ;;  %v8588_v15 = vld [vmem:[%s9679_s0 + $0x3] ss:$8 sm:$0x3]  ;;  %v8589_v16 = vld [vmem:[%s9679_s0 + $0x13] ss:$8 sm:$0x3] }
  0x71   : > { %v1499_v45 = vcombine.low %v1483_v27, %v1497_v28  ;;  %v1876_v46 = vcombine.high %v1761_v31, %v1768_v32  ;;  %v1877_v47 = vcombine.high %v1775_v35, %v1782_v36  ;;  %v9796_v48 = vcombine.low %v1476_v39, %v1490_v40  ;;  %v8590_v19 = vld [vmem:[%s9679_s0 + $0x23] ss:$8 sm:$0x3]  ;;  %v8593_v26 = vld [vmem:[%s9679_s0 + $0x53] ss:$8 sm:$0x3] }
  0x72   : > { %984 = vrot.lane.b32.xlu1 %v899_v54, %s9488_s22  ;;  %982 = vrot.lane.b32.xlu0 %v9746_v55, %s9488_s22  ;;  %v1783_v49 = vcombine.low %v1761_v31, %v1768_v32  ;;  %v1784_v50 = vcombine.low %v1775_v35, %v1782_v36  ;;  %v2089_v51 = vrot.slane %v2079_v41, %v9702_v61  ;;  %v8592_v25 = vld [vmem:[%s9679_s0 + $0x43] ss:$8 sm:$0x3]  ;;  %v8595_v31 = vld [vmem:[%s9679_s0 + $0x73] ss:$8 sm:$0x3] }
  0x73   : > { %v2096_v52 = vrot.slane %v2080_v42, %v9702_v61  ;;  %v2103_v53 = vrot.slane %v2081_v43, %v9702_v61  ;;  %v2110_v54 = vrot.slane %v2082_v44, %v9702_v61  ;;  %v1884_v58 = vrot.slane %v1876_v46, %v9702_v61  ;;  %v8594_v30 = vld [vmem:[%s9679_s0 + $0x63] ss:$8 sm:$0x3]  ;;  %v8602_v44 = vld [vmem:[%s9679_s0 + $0x4] ss:$8 sm:$0x3] }
  0x74   : > { %v1891_v59 = vrot.slane %v1877_v47, %v9702_v61  ;;  %v1791_v63 = vrot.slane %v1783_v49, %v9702_v61  ;;  %v1798_v0 = vrot.slane %v1784_v50, %v9702_v61  ;;  %v2418_v7 = vcombine.low %v8575_v56, %v8576_v57  ;;  %v8604_v49 = vld [vmem:[%s9679_s0 + $0x24] ss:$8 sm:$0x3]  ;;  %v8605_v50 = vld [vmem:[%s9679_s0 + $0x34] ss:$8 sm:$0x3] }
  0x75   : > { %v2204_v5 = vcombine.high %v2089_v51, %v2096_v52  ;;  %v2205_v6 = vcombine.high %v2103_v53, %v2110_v54  ;;  %v2111_v9 = vcombine.low %v2089_v51, %v2096_v52  ;;  %v2419_v10 = vcombine.low %v8577_v60, %v8578_v62  ;;  %v8607_v56 = vld [vmem:[%s9679_s0 + $0x54] ss:$8 sm:$0x3]  ;;  %v8608_v60 = vld [vmem:[%s9679_s0 + $0x64] ss:$8 sm:$0x3] }
  0x76   : > { %1233 = vrot.lane.b32.xlu1 %v1230_v20, %s9489_s23  ;;  %1231 = vrot.lane.b32.xlu0 %v9772_v21, %s9489_s23  ;;  %v1892_v8 = vcombine.low %v1884_v58, %v1891_v59  ;;  %v2420_v11 = vcombine.low %v8579_v1, %v8580_v2  ;;  %v9820_v12 = vcombine.low %v1791_v63, %v1798_v0  ;;  %v8609_v62 = vld [vmem:[%s9679_s0 + $0x74] ss:$8 sm:$0x3]  ;;  %vm9491_vm1 = vmmov 0   ;;  %p1400_p2 = scmp.lt.s32.totalorder %s9663_s27, 16  ;;  %s2383_s6 = sadd.s32 1, %s9663_s27 }
  0x77   : > { %v2112_v13 = vcombine.low %v2103_v53, %v2110_v54  ;;  %v2421_v14 = vcombine.low %v8581_v3, %v8582_v4  ;;  %v2212_v17 = vrot.slane %v2204_v5, %v9702_v61  ;;  %v2219_v18 = vrot.slane %v2205_v6, %v9702_v61  ;;  %v8606_v54 = vld [vmem:[%s9679_s0 + $0x44] ss:$8 sm:$0x3]  ;;  %p2384_p3 = scmp.lt.s32.totalorder %s2383_s6, 16  ;;  %s3367_s8 = sadd.s32 2, %s9663_s27 }
  0x78   : > { %v2119_v22 = vrot.slane %v2111_v9, %v9702_v61  ;;  %v2428_v23 = vrot.slane %v2418_v7, %v9702_v61  ;;  %v2435_v24 = vrot.slane %v2419_v10, %v9702_v61  ;;  %v2442_v28 = vrot.slane %v2420_v11, %v9702_v61  ;;  %v8617_v9 = vld [vmem:[%s9679_s0 + $0x3] ss:$8 sm:$0x3]  ;;  %s1401_s17 = scalar_select %p1400_p2, 1, 0 }
  0x79   : > { %v2126_v27 = vrot.slane %v2112_v13, %v9702_v61  ;;  %v2449_v29 = vrot.slane %v2421_v14, %v9702_v61  ;;  %v2220_v32 = vcombine.low %v2212_v17, %v2219_v18  ;;  %v2735_v35 = vcombine.low %v8588_v15, %v8589_v16  ;;  %v8618_v15 = vld [vmem:[%s9679_s0 + $0x13] ss:$8 sm:$0x3]  ;;  %v8619_v16 = vld [vmem:[%s9679_s0 + $0x23] ss:$8 sm:$0x3] }
  0x7a   : > { %1315 = vrot.lane.b32.xlu1 %v1230_v20, %s9488_s22  ;;  %1313 = vrot.lane.b32.xlu0 %v9772_v21, %s9488_s22  ;;  %v8591_v20 = vld [vmem:[%s9679_s0 + $0x33] ss:$8 sm:$0x3]  ;;  %v2451_v37 = vcombine.high %v2428_v23, %v2435_v24  ;;  %v2450_v38 = vcombine.low %v2428_v23, %v2435_v24  ;;  %v2737_v39 = vcombine.low %v8592_v25, %v8593_v26  ;;  %v8621_v23 = vld [vmem:[%s9679_s0 + $0x43] ss:$8 sm:$0x3] }
  0x7b   : > { %v2736_v36 = vcombine.low %v8590_v19, %v8591_v20  ;;  %v2738_v40 = vcombine.low %v8594_v30, %v8595_v31  ;;  %v9844_v41 = vcombine.low %v2119_v22, %v2126_v27  ;;  %v2453_v42 = vcombine.high %v2442_v28, %v2449_v29  ;;  %v8620_v22 = vld [vmem:[%s9679_s0 + $0x33] ss:$8 sm:$0x3]  ;;  %v8623_v25 = vld [vmem:[%s9679_s0 + $0x63] ss:$8 sm:$0x3] }
  0x7c   : > { %v2452_v43 = vcombine.low %v2442_v28, %v2449_v29  ;;  %v2745_v46 = vrot.slane %v2735_v35, %v9702_v61  ;;  %v2467_v51 = vrot.slane %v2451_v37, %v9702_v61  ;;  %v2759_v52 = vrot.slane %v2737_v39, %v9702_v61  ;;  %v8622_v24 = vld [vmem:[%s9679_s0 + $0x53] ss:$8 sm:$0x3]  ;;  %s2385_s7 = scalar_select %p2384_p3, 1, 0 }
  0x7d   : > { %v2752_v47 = vrot.slane %v2736_v36, %v9702_v61  ;;  %v2766_v53 = vrot.slane %v2738_v40, %v9702_v61  ;;  %v2481_v57 = vrot.slane %v2453_v42, %v9702_v61  ;;  %v2460_v58 = vrot.slane %v2450_v38, %v9702_v61  ;;  %v8624_v26 = vld [vmem:[%s9679_s0 + $0x73] ss:$8 sm:$0x3]  ;;  %v8630_v40 = vld [vmem:[%s9679_s0 + $0x4] ss:$8 sm:$0x3] }
  0x7e   : > { %1502 = vrot.lane.b32.xlu1 %v1499_v45, %s9489_s23  ;;  %1500 = vrot.lane.b32.xlu0 %v9796_v48, %s9489_s23  ;;  %v2474_v59 = vrot.slane %v2452_v43, %v9702_v61  ;;  %v3064_v2 = vcombine.low %v8604_v49, %v8605_v50  ;;  %v3065_v5 = vcombine.low %v8606_v54, %v8607_v56  ;;  %v9490_v27 = vmov 0.0   ;;  %v8631_v42 = vld [vmem:[%s9679_s0 + $0x14] ss:$8 sm:$0x3]  ;;  %p3368_p4 = scmp.lt.s32.totalorder %s3367_s8, 16  ;;  %s4351_s12 = sadd.s32 3, %s9663_s27 }
  0x7f   : > { %v2860_v63 = vcombine.high %v2745_v46, %v2752_v47  ;;  %v2767_v0 = vcombine.low %v2745_v46, %v2752_v47  ;;  %v2861_v3 = vcombine.high %v2759_v52, %v2766_v53  ;;  %v2768_v4 = vcombine.low %v2759_v52, %v2766_v53  ;;  %8971 = vmatprep.subr.mxu0 %v9490_v27  ;;  %v8634_v50 = vld [vmem:[%s9679_s0 + $0x44] ss:$8 sm:$0x3]  ;;  %p10846_p5 = scmp.lt.s32.totalorder %s4351_s12, 16  ;;  %s5335_s9 = sadd.s32 4, %s9663_s27 }
  0x80   : > { %v3066_v6 = vcombine.low %v8608_v60, %v8609_v62  ;;  %v2483_v7 = vcombine.low %v2467_v51, %v2481_v57  ;;  %v3080_v14 = vrot.slane %v3064_v2, %v9702_v61  ;;  %v3087_v19 = vrot.slane %v3065_v5, %v9702_v61  ;;  %8976 = vmatprep.subr.mxu1 %v9490_v27  ;;  %v8635_v51 = vld [vmem:[%s9679_s0 + $0x54] ss:$8 sm:$0x3]  ;;  %v8636_v56 = vld [vmem:[%s9679_s0 + $0x64] ss:$8 sm:$0x3] }
  0x81   : > { %v2868_v10 = vrot.slane %v2860_v63, %v9702_v61  ;;  %v2775_v11 = vrot.slane %v2767_v0, %v9702_v61  ;;  %v2875_v17 = vrot.slane %v2861_v3, %v9702_v61  ;;  %v2782_v18 = vrot.slane %v2768_v4, %v9702_v61  ;;  %8977 = vmatpush3.msra.mxu1 %v9729_v34  ;;  %v8637_v57 = vld [vmem:[%s9679_s0 + $0x74] ss:$8 sm:$0x3]  ;;  %v9924_v62 = vld [vmem:[%s10914_s2] sm:$0xff]  ;;  %s3369_s10 = scalar_select %p3368_p4, 1, 0 }
  0x82   : > { %1656 = vrot.lane.b32.xlu1 %v1499_v45, %s9488_s22  ;;  %1654 = vrot.lane.b32.xlu0 %v9796_v48, %s9488_s22  ;;  %v8603_v45 = vld [vmem:[%s9679_s0 + $0x14] ss:$8 sm:$0x3]  ;;  %v3094_v20 = vrot.slane %v3066_v6, %v9702_v61  ;;  %v3402_v29 = vcombine.low %v8617_v9, %v8618_v15  ;;  %v3403_v30 = vcombine.low %v8619_v16, %v8620_v22  ;;  %vm500_vm2 = vcmask 64512   ;;  %p5336_p6 = scmp.lt.s32.totalorder %s5335_s9, 16  ;;  %s7302_s18 = sadd.s32 6, %s9663_s27 }
  0x83   : > { %v3063_v1 = vcombine.low %v8602_v44, %v8603_v45  ;;  %v2876_v31 = vcombine.low %v2868_v10, %v2875_v17  ;;  %v3404_v38 = vcombine.low %v8621_v23, %v8622_v24  ;;  %v3405_v39 = vcombine.low %v8623_v25, %v8624_v26  ;;  %8973 = vmatprep.mubr.msk.f32.mxu0 %vm9491_vm1, %v9490_v27  ;;  %v8632_v44 = vld [vmem:[%s9679_s0 + $0x24] ss:$8 sm:$0x3]  ;;  %v8633_v45 = vld [vmem:[%s9679_s0 + $0x34] ss:$8 sm:$0x3] }
  0x84   : > { %v3189_v35 = vcombine.high %v3087_v19, %v3094_v20  ;;  %v3096_v37 = vcombine.low %v3087_v19, %v3094_v20  ;;  %v3412_v43 = vrot.slane %v3402_v29, %v9702_v61  ;;  %v3419_v34 = vrot.slane %v3403_v30, %v9702_v61  ;;  %8978 = vmatprep.mubr.msk.f32.mxu1 %vm9491_vm1, %v9490_v27  ;;  %v8644_v6 = vld [vmem:[%s9679_s0 + $0x5] ss:$8 sm:$0x3]  ;;  %v8647_v10 = vld [vmem:[%s9679_s0 + $0x35] ss:$8 sm:$0x3] }
  0x85   : > { %v3073_v13 = vrot.slane %v3063_v1, %v9702_v61  ;;  %8986 = vmatprep.subr.mxu1 %v9490_v27  ;;  %v3426_v53 = vrot.slane %v3404_v38, %v9702_v61  ;;  %v3433_v54 = vrot.slane %v3405_v39, %v9702_v61  ;;  %v3719_v60 = vcombine.low %v8630_v40, %v8631_v42  ;;  %v8646_v9 = vld [vmem:[%s9679_s0 + $0x25] ss:$8 sm:$0x3]  ;;  %v9946_v15 = vld [vmem:[%s10914_s2 + $0x18] sm:$0xff]  ;;  %s5337_s20 = scalar_select %p5336_p6, 1, 0 }
  0x86   : > { %1895 = vrot.lane.b32.xlu1 %v1892_v8, %s9489_s23  ;;  %1893 = vrot.lane.b32.xlu0 %v9820_v12, %s9489_s23  ;;  %v3203_v47 = vrot.slane %v3189_v35, %v9702_v61  ;;  %v3110_v52 = vrot.slane %v3096_v37, %v9702_v61  ;;  %v3720_v0 = vcombine.low %v8632_v44, %v8633_v45  ;;  %v8650_v20 = vld [vmem:[%s9679_s0 + $0x65] ss:$8 sm:$0x3]  ;;  %v8651_v22 = vld [vmem:[%s9679_s0 + $0x75] ss:$8 sm:$0x3] }
  0x87   : > { %v3188_v28 = vcombine.high %v3073_v13, %v3080_v14  ;;  %v3095_v36 = vcombine.low %v3073_v13, %v3080_v14  ;;  %v3721_v1 = vcombine.low %v8634_v50, %v8635_v51  ;;  %v3722_v2 = vcombine.low %v8636_v56, %v8637_v57  ;;  %8979 = vmatmul.mubr.msk.f32.vlgmr.msra.gmra.mrb[0].mxu1 %vm500_vm2, %v9924_v62  ;;  %v8649_v14 = vld [vmem:[%s9679_s0 + $0x55] ss:$8 sm:$0x3]  ;;  %v8660_v44 = vld [vmem:[%s9679_s0 + $0x14] ss:$8 sm:$0x3] }
  0x88   : > { %v3437_v4 = vcombine.high %v3426_v53, %v3433_v54  ;;  %v3436_v5 = vcombine.low %v3426_v53, %v3433_v54  ;;  %8987 = vmatpush3.msra.mxu1 %v9746_v55  ;;  %8988 = vmatprep.mubr.msk.f32.mxu1 %vm9491_vm1, %v9490_v27  ;;  %v3729_v16 = vrot.slane %v3719_v60, %v9702_v61  ;;  %v8664_v53 = vld [vmem:[%s9679_s0 + $0x54] ss:$8 sm:$0x3]  ;;  %v8665_v54 = vld [vmem:[%s9679_s0 + $0x64] ss:$8 sm:$0x3] }
  0x89   : > { %v3196_v46 = vrot.slane %v3188_v28, %v9702_v61  ;;  %v3103_v49 = vrot.slane %v3095_v36, %v9702_v61  ;;  %v3736_v17 = vrot.slane %v3720_v0, %v9702_v61  ;;  %v3750_v19 = vrot.slane %v3722_v2, %v9702_v61  ;;  %8996 = vmatprep.subr.mxu1 %v9490_v27  ;;  %v8666_v56 = vld [vmem:[%s9679_s0 + $0x74] ss:$8 sm:$0x3]  ;;  %p7303_p8 = scmp.lt.s32.totalorder %s7302_s18, 16  ;;  %s8286_s13 = sadd.s32 7, %s9663_s27 }
  0x8a   : > { %1976 = vrot.lane.b32.xlu1 %v1892_v8, %s9488_s22  ;;  %1974 = vrot.lane.b32.xlu0 %v9820_v12, %s9488_s22  ;;  %v9868_v8 = vcombine.low %v2460_v58, %v2474_v59  ;;  %v3435_v58 = vcombine.high %v3412_v43, %v3419_v34  ;;  %v3434_v59 = vcombine.low %v3412_v43, %v3419_v34  ;;  %v8659_v34 = vld [vmem:[%s9679_s0 + $0x4] ss:$8 sm:$0x3]  ;;  %vm654_vm3 = vcmask 1031168   ;;  %p8287_p9 = scmp.lt.s32.totalorder %s8286_s13, 16 }
  0x8b   : > { %v3204_v63 = vcombine.low %v3196_v46, %v3203_v47  ;;  %v9929_v3 = vcombine.low %v3103_v49, %v3110_v52  ;;  %v3465_v55 = vrot.slane %v3437_v4, %v9702_v61  ;;  %v3458_v24 = vrot.slane %v3436_v5, %v9702_v61  ;;  %8989 = vmatmul.mubr.msk.f32.vlgmr.msra.gmra.mrb[2].mxu1 %vm500_vm2, %v9946_v15  ;;  %v8661_v47 = vld [vmem:[%s9679_s0 + $0x24] ss:$8 sm:$0x3]  ;;  %v8662_v49 = vld [vmem:[%s9679_s0 + $0x34] ss:$8 sm:$0x3] }
  0x8c   : > { %v3451_v13 = vrot.slane %v3435_v58, %v9702_v61  ;;  %v3444_v23 = vrot.slane %v3434_v59, %v9702_v61  ;;  %v4048_v26 = vcombine.low %v8646_v9, %v8647_v10  ;;  %v4050_v29 = vcombine.low %v8650_v20, %v8651_v22  ;;  %8998 = vmatprep.mubr.msk.f32.mxu1 %vm9491_vm1, %v9490_v27  ;;  %v8663_v52 = vld [vmem:[%s9679_s0 + $0x44] ss:$8 sm:$0x3]  ;;  %v8677_v20 = vld [vmem:[%s9679_s0 + $0x55] ss:$8 sm:$0x3] }
  0x8d   : > { %v3844_v30 = vcombine.high %v3729_v16, %v3736_v17  ;;  %v3751_v35 = vcombine.low %v3729_v16, %v3736_v17  ;;  %v4386_v59 = vcombine.low %v8659_v34, %v8660_v44  ;;  %v4388_v4 = vcombine.low %v8663_v52, %v8664_v53  ;;  %v8688_v44 = vld [vmem:[%s9679_s0 + $0x26] ss:$8 sm:$0x3]  ;;  %s7304_s11 = scalar_select %p7303_p8, 1, 0 }
  0x8e   : > { %2223 = vrot.lane.b32.xlu1 %v2220_v32, %s9489_s23  ;;  %2221 = vrot.lane.b32.xlu0 %v9844_v41, %s9489_s23  ;;  %v3467_v36 = vcombine.low %v3451_v13, %v3465_v55  ;;  %v9968_v37 = vcombine.low %v3444_v23, %v3458_v24  ;;  %v4064_v40 = vrot.slane %v4048_v26, %v9702_v61  ;;  %v8675_v13 = vld [vmem:[%s9679_s0 + $0x35] ss:$8 sm:$0x3]  ;;  %v8678_v23 = vld [vmem:[%s9679_s0 + $0x65] ss:$8 sm:$0x3] }
  0x8f   : > { %v4078_v43 = vrot.slane %v4050_v29, %v9702_v61  ;;  %v3852_v45 = vrot.slane %v3844_v30, %v9702_v61  ;;  %v3759_v50 = vrot.slane %v3751_v35, %v9702_v61  ;;  %v4389_v5 = vcombine.low %v8665_v54, %v8666_v56  ;;  %v8679_v24 = vld [vmem:[%s9679_s0 + $0x75] ss:$8 sm:$0x3]  ;;  %v8692_v56 = vld [vmem:[%s9679_s0 + $0x66] ss:$8 sm:$0x3] }
  0x90   : > { %v4396_v17 = vrot.slane %v4386_v59, %v9702_v61  ;;  %v4410_v22 = vrot.slane %v4388_v4, %v9702_v61  ;;  %v4706_v35 = vcombine.low %v8678_v23, %v8679_v24  ;;  %v8705_v23 = vld [vmem:[%s9679_s0 + $0x45] ss:$8 sm:$0x3]  ;;  %v8706_v24 = vld [vmem:[%s9679_s0 + $0x55] ss:$8 sm:$0x3] }
  0x91   : > { %v4417_v55 = vrot.slane %v4389_v5, %v9702_v61  ;;  %vm497_vm4 = vcmask 1039360  }
  0x92   : > { %2304 = vrot.lane.b32.xlu1 %v2220_v32, %s9488_s22  ;;  %2302 = vrot.lane.b32.xlu0 %v9844_v41, %s9488_s22  ;;  %v9891_v32 = vcombine.low %v2775_v11, %v2782_v18  ;;  %v8648_v11 = vld [vmem:[%s9679_s0 + $0x45] ss:$8 sm:$0x3]  ;;  %v3743_v18 = vrot.slane %v3721_v1, %v9702_v61  ;;  %v4387_v1 = vcombine.low %v8661_v47, %v8662_v49 }
  0x93   : > { %v4049_v28 = vcombine.low %v8648_v11, %v8649_v14  ;;  %v8674_v11 = vld [vmem:[%s9679_s0 + $0x25] ss:$8 sm:$0x3]  ;;  %v4734_v49 = vrot.slane %v4706_v35, %v9702_v61 }
  0x94   : > { %v3752_v38 = vcombine.low %v3743_v18, %v3750_v19 }
  0x95   : > { %v4071_v42 = vrot.slane %v4049_v28, %v9702_v61  ;;  %v4704_v28 = vcombine.low %v8674_v11, %v8675_v13 }
  0x96   : > { %2486 = vrot.lane.b32.xlu1 %v2483_v7, %s9489_s23  ;;  %2484 = vrot.lane.b32.xlu0 %v9868_v8, %s9489_s23  ;;  %v3766_v51 = vrot.slane %v3752_v38, %v9702_v61 }
  0x97   : > { %v4173_v58 = vcombine.high %v4071_v42, %v4078_v43  ;;  %v4080_v0 = vcombine.low %v4071_v42, %v4078_v43  ;;  %v8687_v42 = vld [vmem:[%s9679_s0 + $0x16] ss:$8 sm:$0x3]  ;;  %v4720_v34 = vrot.slane %v4704_v28, %v9702_v61 }
  0x98   : > { %v9992_v2 = vcombine.low %v3759_v50, %v3766_v51  ;;  %v8690_v50 = vld [vmem:[%s9679_s0 + $0x46] ss:$8 sm:$0x3]  ;;  %v8691_v51 = vld [vmem:[%s9679_s0 + $0x56] ss:$8 sm:$0x3] }
  0x99   : > { %v4187_v10 = vrot.slane %v4173_v58, %v9702_v61  ;;  %v4094_v16 = vrot.slane %v4080_v0, %v9702_v61  ;;  %v5033_v4 = vcombine.low %v8690_v50, %v8691_v51 }
  0x9a   : > { %2640 = vrot.lane.b32.xlu1 %v2483_v7, %s9488_s22  ;;  %2638 = vrot.lane.b32.xlu0 %v9868_v8, %s9488_s22  ;;  %v8645_v7 = vld [vmem:[%s9679_s0 + $0x15] ss:$8 sm:$0x3] }
  0x9b   : > { %v4047_v25 = vcombine.low %v8644_v6, %v8645_v7  ;;  %v8672_v6 = vld [vmem:[%s9679_s0 + $0x5] ss:$8 sm:$0x3]  ;;  %v8673_v7 = vld [vmem:[%s9679_s0 + $0x15] ss:$8 sm:$0x3] }
  0x9c   : > { %v4703_v26 = vcombine.low %v8672_v6, %v8673_v7 }
  0x9d   : > { %v4057_v39 = vrot.slane %v4047_v25, %v9702_v61 }
  0x9e   : > { %2879 = vrot.lane.b32.xlu1 %v2876_v31, %s9489_s23  ;;  %2877 = vrot.lane.b32.xlu0 %v9891_v32, %s9489_s23  ;;  %v4713_v43 = vrot.slane %v4703_v26, %v9702_v61  ;;  %v8708_v26 = vld [vmem:[%s9679_s0 + $0x75] ss:$8 sm:$0x3] }
  0x9f   : > { %v4172_v57 = vcombine.high %v4057_v39, %v4064_v40 }
  0xa0   : > { %v4828_v58 = vcombine.high %v4713_v43, %v4720_v34  ;;  %v4735_v59 = vcombine.low %v4713_v43, %v4720_v34  ;;  %v8714_v34 = vld [vmem:[%s9679_s0 + $0x6] ss:$8 sm:$0x3] }
  0xa1   : > { %v4180_v9 = vrot.slane %v4172_v57, %v9702_v61  ;;  %v8693_v57 = vld [vmem:[%s9679_s0 + $0x76] ss:$8 sm:$0x3] }
  0xa2   : > { %2960 = vrot.lane.b32.xlu1 %v2876_v31, %s9488_s22  ;;  %2958 = vrot.lane.b32.xlu0 %v9891_v32, %s9488_s22  ;;  %v3845_v31 = vcombine.high %v3743_v18, %v3750_v19  ;;  %v4403_v18 = vrot.slane %v4387_v1, %v9702_v61  ;;  %v8676_v19 = vld [vmem:[%s9679_s0 + $0x45] ss:$8 sm:$0x3]  ;;  %v5034_v5 = vcombine.low %v8692_v56, %v8693_v57 }
  0xa3   : > { %v4188_v25 = vcombine.low %v4180_v9, %v4187_v10  ;;  %v4836_v9 = vrot.slane %v4828_v58, %v9702_v61  ;;  %v4743_v10 = vrot.slane %v4735_v59, %v9702_v61  ;;  %v8720_v59 = vld [vmem:[%s9679_s0 + $0x66] ss:$8 sm:$0x3] }
  0xa4   : > { %v3859_v46 = vrot.slane %v3845_v31, %v9702_v61  ;;  %v4419_v30 = vcombine.high %v4396_v17, %v4403_v18  ;;  %v4705_v31 = vcombine.low %v8676_v19, %v8677_v20  ;;  %v4418_v38 = vcombine.low %v4396_v17, %v4403_v18 }
  0xa5   : > { %v5055_v19 = vrot.slane %v5033_v4, %v9702_v61  ;;  %v5062_v20 = vrot.slane %v5034_v5, %v9702_v61 }
  0xa6   : > { %3207 = vrot.lane.b32.xlu1 %v3204_v63, %s9489_s23  ;;  %3205 = vrot.lane.b32.xlu0 %v9929_v3, %s9489_s23  ;;  %v3860_v60 = vcombine.low %v3852_v45, %v3859_v46  ;;  %v8689_v45 = vld [vmem:[%s9679_s0 + $0x36] ss:$8 sm:$0x3]  ;;  %v4435_v46 = vrot.slane %v4419_v30, %v9702_v61  ;;  %v4727_v47 = vrot.slane %v4705_v31, %v9702_v61 }
  0xa7   : > { %v4428_v53 = vrot.slane %v4418_v38, %v9702_v61  ;;  %v5157_v38 = vcombine.high %v5055_v19, %v5062_v20 }
  0xa8   : > { %v4829_v0 = vcombine.high %v4727_v47, %v4734_v49  ;;  %v4736_v1 = vcombine.low %v4727_v47, %v4734_v49  ;;  %v8716_v47 = vld [vmem:[%s9679_s0 + $0x26] ss:$8 sm:$0x3]  ;;  %v8717_v49 = vld [vmem:[%s9679_s0 + $0x36] ss:$8 sm:$0x3] }
  0xa9   : > { %v5171_v51 = vrot.slane %v5157_v38, %v9702_v61 }
  0xaa   : > { %3288 = vrot.lane.b32.xlu1 %v3204_v63, %s9488_s22  ;;  %3286 = vrot.lane.b32.xlu0 %v9929_v3, %s9488_s22  ;;  %v4079_v63 = vcombine.low %v4057_v39, %v4064_v40  ;;  %v4420_v39 = vcombine.low %v4410_v22, %v4417_v55  ;;  %v8686_v40 = vld [vmem:[%s9679_s0 + $0x6] ss:$8 sm:$0x3]  ;;  %v4843_v17 = vrot.slane %v4829_v0, %v9702_v61 }
  0xab   : > { %v4750_v18 = vrot.slane %v4736_v1, %v9702_v61  ;;  %v5688_v1 = vcombine.low %v8716_v47, %v8717_v49 }
  0xac   : > { %v4087_v14 = vrot.slane %v4079_v63, %v9702_v61  ;;  %v4442_v54 = vrot.slane %v4420_v39, %v9702_v61  ;;  %v5032_v63 = vcombine.low %v8688_v44, %v8689_v45  ;;  %v4844_v35 = vcombine.low %v4836_v9, %v4843_v17  ;;  %v8715_v44 = vld [vmem:[%s9679_s0 + $0x16] ss:$8 sm:$0x3]  ;;  %v8730_v17 = vld [vmem:[%s9679_s0 + $0x27] ss:$8 sm:$0x3] }
  0xad   : > { %v5687_v0 = vcombine.low %v8714_v34, %v8715_v44 }
  0xae   : > { %3470 = vrot.lane.b32.xlu1 %v3467_v36, %s9489_s23  ;;  %3468 = vrot.lane.b32.xlu0 %v9968_v37, %s9489_s23  ;;  %v10013_v29 = vcombine.low %v4087_v14, %v4094_v16  ;;  %v10040_v7 = vcombine.low %v4428_v53, %v4442_v54  ;;  %v5048_v13 = vrot.slane %v5032_v63, %v9702_v61  ;;  %v8701_v14 = vld [vmem:[%s9679_s0 + $0x5] ss:$8 sm:$0x3]  ;;  %v8702_v16 = vld [vmem:[%s9679_s0 + $0x15] ss:$8 sm:$0x3] }
  0xaf   : > { %v5370_v30 = vcombine.low %v8701_v14, %v8702_v16  ;;  %v8718_v53 = vld [vmem:[%s9679_s0 + $0x46] ss:$8 sm:$0x3]  ;;  %v8719_v54 = vld [vmem:[%s9679_s0 + $0x56] ss:$8 sm:$0x3] }
  0xb0   : > { %v8728_v14 = vld [vmem:[%s9679_s0 + $0x7] ss:$8 sm:$0x3]  ;;  %v8729_v16 = vld [vmem:[%s9679_s0 + $0x17] ss:$8 sm:$0x3] }
  0xb1   : > { %v5380_v45 = vrot.slane %v5370_v30, %v9702_v61  ;;  %v6015_v38 = vcombine.low %v8728_v14, %v8729_v16 }
  0xb2   : > { %3624 = vrot.lane.b32.xlu1 %v3467_v36, %s9488_s22  ;;  %3622 = vrot.lane.b32.xlu0 %v9968_v37, %s9488_s22  ;;  %v4421_v36 = vcombine.high %v4410_v22, %v4417_v55  ;;  %v8703_v22 = vld [vmem:[%s9679_s0 + $0x25] ss:$8 sm:$0x3]  ;;  %v8704_v55 = vld [vmem:[%s9679_s0 + $0x35] ss:$8 sm:$0x3] }
  0xb3   : > { %v5371_v31 = vcombine.low %v8703_v22, %v8704_v55  ;;  %v5697_v22 = vrot.slane %v5687_v0, %v9702_v61  ;;  %v5704_v55 = vrot.slane %v5688_v1, %v9702_v61 }
  0xb4   : > { %v4449_v52 = vrot.slane %v4421_v36, %v9702_v61  ;;  %v10061_v36 = vcombine.low %v4743_v10, %v4750_v18  ;;  %v8731_v18 = vld [vmem:[%s9679_s0 + $0x37] ss:$8 sm:$0x3] }
  0xb5   : > { %v5812_v44 = vcombine.high %v5697_v22, %v5704_v55 }
  0xb6   : > { %3863 = vrot.lane.b32.xlu1 %v3860_v60, %s9489_s23  ;;  %3861 = vrot.lane.b32.xlu0 %v9992_v2, %s9489_s23  ;;  %v4451_v6 = vcombine.low %v4435_v46, %v4449_v52  ;;  %v5387_v46 = vrot.slane %v5371_v31, %v9702_v61 }
  0xb8   : > { %v5403_v63 = vcombine.high %v5380_v45, %v5387_v46  ;;  %v5402_v5 = vcombine.low %v5380_v45, %v5387_v46  ;;  %v5719_v46 = vcombine.low %v5697_v22, %v5704_v55 }
  0xba   : > { %3944 = vrot.lane.b32.xlu1 %v3860_v60, %s9488_s22  ;;  %3942 = vrot.lane.b32.xlu0 %v9992_v2, %s9488_s22  ;;  %v5031_v60 = vcombine.low %v8686_v40, %v8687_v42  ;;  %v5064_v40 = vcombine.low %v5055_v19, %v5062_v20  ;;  %v5372_v42 = vcombine.low %v8705_v23, %v8706_v24  ;;  %v8732_v19 = vld [vmem:[%s9679_s0 + $0x47] ss:$8 sm:$0x3]  ;;  %v8733_v20 = vld [vmem:[%s9679_s0 + $0x57] ss:$8 sm:$0x3] }
  0xbb   : > { %v8734_v23 = vld [vmem:[%s9679_s0 + $0x67] ss:$8 sm:$0x3]  ;;  %v8735_v24 = vld [vmem:[%s9679_s0 + $0x77] ss:$8 sm:$0x3]  ;;  %v5412_v31 = vrot.slane %v5402_v5, %v9702_v61 }
  0xbc   : > { %v5041_v11 = vrot.slane %v5031_v60, %v9702_v61  ;;  %v5078_v56 = vrot.slane %v5064_v40, %v9702_v61  ;;  %v5394_v57 = vrot.slane %v5372_v42, %v9702_v61  ;;  %v8721_v60 = vld [vmem:[%s9679_s0 + $0x76] ss:$8 sm:$0x3]  ;;  %v6017_v40 = vcombine.low %v8732_v19, %v8733_v20 }
  0xbd   : > { %v5690_v9 = vcombine.low %v8720_v59, %v8721_v60  ;;  %v6018_v42 = vcombine.low %v8734_v23, %v8735_v24  ;;  %v5820_v59 = vrot.slane %v5812_v44, %v9702_v61  ;;  %v8743_v60 = vld [vmem:[%s9679_s0 + $0x6] ss:$8 sm:$0x3] }
  0xbe   : > { %4191 = vrot.lane.b32.xlu1 %v4188_v25, %s9489_s23  ;;  %4189 = vrot.lane.b32.xlu0 %v10013_v29, %s9489_s23  ;;  %v5156_v28 = vcombine.high %v5041_v11, %v5048_v13  ;;  %v5063_v39 = vcombine.low %v5041_v11, %v5048_v13 }
  0xc0   : > { %v5164_v50 = vrot.slane %v5156_v28, %v9702_v61  ;;  %v5071_v52 = vrot.slane %v5063_v39, %v9702_v61  ;;  %v5718_v28 = vrot.slane %v5690_v9, %v9702_v61  ;;  %v6016_v39 = vcombine.low %v8730_v17, %v8731_v18  ;;  %v8746_v9 = vld [vmem:[%s9679_s0 + $0x36] ss:$8 sm:$0x3]  ;;  %v8749_v17 = vld [vmem:[%s9679_s0 + $0x66] ss:$8 sm:$0x3] }
  0xc1   : > { %v8750_v18 = vld [vmem:[%s9679_s0 + $0x76] ss:$8 sm:$0x3] }
  0xc2   : > { %4272 = vrot.lane.b32.xlu1 %v4188_v25, %s9488_s22  ;;  %4270 = vrot.lane.b32.xlu0 %v10013_v29, %s9488_s22  ;;  %v8707_v25 = vld [vmem:[%s9679_s0 + $0x65] ss:$8 sm:$0x3]  ;;  %v5172_v4 = vcombine.low %v5164_v50, %v5171_v51  ;;  %v10088_v10 = vcombine.low %v5071_v52, %v5078_v56  ;;  %v6025_v52 = vrot.slane %v6015_v38, %v9702_v61 }
  0xc3   : > { %v5373_v43 = vcombine.low %v8707_v25, %v8708_v26  ;;  %v5419_v25 = vrot.slane %v5403_v63, %v9702_v61  ;;  %v10117_v51 = vld [vmem:[%s10914_s2 + $0x8] sm:$0xff]  ;;  %v6046_v56 = vrot.slane %v6018_v42, %v9702_v61  ;;  %v8744_v63 = vld [vmem:[%s9679_s0 + $0x16] ss:$8 sm:$0x3]  ;;  %v6357_v38 = vcombine.low %v8749_v17, %v8750_v18  ;;  %v10162_v42 = vld [vmem:[%s10914_s2 + $0x20] sm:$0xff] }
  0xc4   : > { %v6354_v19 = vcombine.low %v8743_v60, %v8744_v63  ;;  %v8763_v60 = vld [vmem:[%s9679_s0 + $0x77] ss:$8 sm:$0x3]  ;;  %v10187_v63 = vld [vmem:[%s10914_s2 + $0x28] sm:$0xff] }
  0xc5   : > { %v5401_v58 = vrot.slane %v5373_v43, %v9702_v61  ;;  %v10204_v18 = vld [vmem:[%s10914_s2 + $0x30] sm:$0xff] }
  0xc6   : > { %4454 = vrot.lane.b32.xlu1 %v4451_v6, %s9489_s23  ;;  %4452 = vrot.lane.b32.xlu0 %v10040_v7, %s9489_s23 }
  0xc7   : > { %v5405_v11 = vcombine.high %v5394_v57, %v5401_v58  ;;  %v5404_v13 = vcombine.low %v5394_v57, %v5401_v58 }
  0xc9   : > { %v5433_v30 = vrot.slane %v5405_v11, %v9702_v61  ;;  %v8747_v11 = vld [vmem:[%s9679_s0 + $0x46] ss:$8 sm:$0x3] }
  0xca   : > { %4608 = vrot.lane.b32.xlu1 %v4451_v6, %s9488_s22  ;;  %4606 = vrot.lane.b32.xlu0 %v10040_v7, %s9488_s22  ;;  %v5689_v6 = vcombine.low %v8718_v53, %v8719_v54  ;;  %v6032_v53 = vrot.slane %v6016_v39, %v9702_v61  ;;  %v6039_v54 = vrot.slane %v6017_v40, %v9702_v61  ;;  %v8756_v39 = vld [vmem:[%s9679_s0 + $0x7] ss:$8 sm:$0x3]  ;;  %v8757_v40 = vld [vmem:[%s9679_s0 + $0x17] ss:$8 sm:$0x3] }
  0xcb   : > { %v5435_v49 = vcombine.low %v5419_v25, %v5433_v30  ;;  %v10148_v25 = vld [vmem:[%s10914_s2 + $0x10] sm:$0xff] }
  0xcc   : > { %v5711_v26 = vrot.slane %v5689_v6, %v9702_v61  ;;  %v8745_v6 = vld [vmem:[%s9679_s0 + $0x26] ss:$8 sm:$0x3]  ;;  %v6140_v14 = vcombine.high %v6025_v52, %v6032_v53  ;;  %v6141_v16 = vcombine.high %v6039_v54, %v6046_v56  ;;  %v6047_v23 = vcombine.low %v6025_v52, %v6032_v53  ;;  %v8760_v53 = vld [vmem:[%s9679_s0 + $0x47] ss:$8 sm:$0x3] }
  0xcd   : > { %v6048_v24 = vcombine.low %v6039_v54, %v6046_v56  ;;  %v6355_v30 = vcombine.low %v8745_v6, %v8746_v9  ;;  %v8761_v54 = vld [vmem:[%s9679_s0 + $0x57] ss:$8 sm:$0x3] }
  0xce   : > { %4847 = vrot.lane.b32.xlu1 %v4844_v35, %s9489_s23  ;;  %4845 = vrot.lane.b32.xlu0 %v10061_v36, %s9489_s23  ;;  %v5813_v45 = vcombine.high %v5711_v26, %v5718_v28  ;;  %v5720_v47 = vcombine.low %v5711_v26, %v5718_v28 }
  0xcf   : > { %v6062_v52 = vrot.slane %v6048_v24, %v9702_v61 }
  0xd0   : > { %v5827_v1 = vrot.slane %v5813_v45, %v9702_v61  ;;  %v5734_v5 = vrot.slane %v5720_v47, %v9702_v61  ;;  %v6155_v47 = vrot.slane %v6141_v16, %v9702_v61 }
  0xd2   : > { %4928 = vrot.lane.b32.xlu1 %v4844_v35, %s9488_s22  ;;  %4926 = vrot.lane.b32.xlu0 %v10061_v36, %s9488_s22  ;;  %v5426_v35 = vrot.slane %v5404_v13, %v9702_v61  ;;  %v8748_v13 = vld [vmem:[%s9679_s0 + $0x56] ss:$8 sm:$0x3]  ;;  %v5828_v26 = vcombine.low %v5820_v59, %v5827_v1  ;;  %v8762_v59 = vld [vmem:[%s9679_s0 + $0x67] ss:$8 sm:$0x3]  ;;  %v6385_v1 = vrot.slane %v6357_v38, %v9702_v61 }
  0xd3   : > { %v10230_v38 = vld [vmem:[%s10914_s2 + $0x40] sm:$0xff] }
  0xd4   : > { %v10112_v50 = vcombine.low %v5412_v31, %v5426_v35  ;;  %v6356_v35 = vcombine.low %v8747_v11, %v8748_v13  ;;  %v6673_v13 = vcombine.low %v8760_v53, %v8761_v54  ;;  %v8775_v54 = vld [vmem:[%s9681_s1 + $0x60] ss:$8 sm:$0x3] }
  0xd6   : > { %5175 = vrot.lane.b32.xlu1 %v5172_v4, %s9489_s23  ;;  %5173 = vrot.lane.b32.xlu0 %v10088_v10, %s9489_s23 }
  0xd8   : > { %v651_v43 = vpop.permute.xlu1 %650  ;;  %v494_v34 = vpop.permute.xlu0 %493 }
  0xda   : > { %5256 = vrot.lane.b32.xlu1 %v5172_v4, %s9488_s22  ;;  %5254 = vrot.lane.b32.xlu0 %v10088_v10, %s9488_s22  ;;  %v5727_v4 = vrot.slane %v5719_v46, %v9702_v61  ;;  %v6148_v46 = vrot.slane %v6140_v14, %v9702_v61  ;;  %v6674_v14 = vcombine.low %v8762_v59, %v8763_v60 }
  0xdc   : > { %v653_v57 = vpop.permute.xlu1 %652  ;;  %v496_v58 = vpop.permute.xlu0 %495  ;;  %v10150_v28 = vcombine.low %v5727_v4, %v5734_v5  ;;  %v6671_v4 = vcombine.low %v8756_v39, %v8757_v40  ;;  %v6156_v11 = vcombine.low %v6148_v46, %v6155_v47  ;;  %v10233_v39 = vrot.slane %v6673_v13, %v9702_v61  ;;  %v8773_v46 = vld [vmem:[%s9681_s1 + $0x40] ss:$8 sm:$0x3]  ;;  %v8774_v47 = vld [vmem:[%s9681_s1 + $0x50] ss:$8 sm:$0x3] }
  0xdd   : > { %v498_v0 = vsel %vm497_vm4, %v494_v34, %v496_v58  ;;  %v655_v20 = vsel %vm654_vm3, %v651_v43, %v653_v57  ;;  %v8758_v43 = vld [vmem:[%s9679_s0 + $0x27] ss:$8 sm:$0x3]  ;;  %v8759_v34 = vld [vmem:[%s9679_s0 + $0x37] ss:$8 sm:$0x3]  ;;  %v6364_v57 = vrot.slane %v6354_v19, %v9702_v61  ;;  %v6371_v58 = vrot.slane %v6355_v30, %v9702_v61 }
  0xde   : > { %5438 = vrot.lane.b32.xlu1 %v5435_v49, %s9489_s23  ;;  %5436 = vrot.lane.b32.xlu0 %v10112_v50, %s9489_s23  ;;  %v6672_v5 = vcombine.low %v8758_v43, %v8759_v34  ;;  %v8770_v30 = vld [vmem:[%s9681_s1 + $0x10] ss:$8 sm:$0x3]  ;;  %v10236_v40 = vrot.slane %v6674_v14, %v9702_v61  ;;  %v8771_v43 = vld [vmem:[%s9681_s1 + $0x20] ss:$8 sm:$0x3] }
  0xdf   : > { %8972 = vmatpush3.msra.mxu0 %v498_v0  ;;  %v6378_v0 = vrot.slane %v6356_v35, %v9702_v61  ;;  %v6387_v19 = vcombine.high %v6364_v57, %v6371_v58  ;;  %v8772_v34 = vld [vmem:[%s9681_s1 + $0x30] ss:$8 sm:$0x3] }
  0xe0   : > { %8974 = vmatmul.mubr.msk.f32.vlgmr.msra.gmra.mrb[0].mxu0 %vm500_vm2, %v10117_v51  ;;  %8981 = vmatprep.subr.mxu0 %v9490_v27  ;;  %v903_v22 = vpop.permute.xlu1 %902  ;;  %v901_v55 = vpop.permute.xlu0 %900  ;;  %v10220_v24 = vrot.slane %v6672_v5, %v9702_v61 }
  0xe1   : > { %8982 = vmatpush3.msra.mxu0 %v655_v20  ;;  %8983 = vmatprep.mubr.msk.f32.mxu0 %vm9491_vm1, %v9490_v27  ;;  %v904_v31 = vsel %vm497_vm4, %v901_v55, %v903_v22  ;;  %v10212_v20 = vld [vmem:[%s10914_s2 + $0x38] sm:$0xff]  ;;  %v6389_v22 = vcombine.high %v6378_v0, %v6385_v1  ;;  %v6388_v55 = vcombine.low %v6378_v0, %v6385_v1 }
  0xe2   : > { %5592 = vrot.lane.b32.xlu1 %v5435_v49, %s9488_s22  ;;  %5590 = vrot.lane.b32.xlu0 %v10112_v50, %s9488_s22  ;;  %v6055_v49 = vrot.slane %v6047_v23, %v9702_v61  ;;  %v10217_v23 = vrot.slane %v6671_v4, %v9702_v61  ;;  %v6797_v0 = vcombine.high %v10233_v39, %v10236_v40 }
  0xe3   : > { %8991 = vmatprep.subr.mxu0 %v9490_v27  ;;  %v6410_v53 = vrot.slane %v6388_v55, %v9702_v61  ;;  %v6999_v1 = vcombine.low %v8771_v43, %v8772_v34  ;;  %v7000_v4 = vcombine.low %v8773_v46, %v8774_v47  ;;  %v8786_v55 = vld [vmem:[%s9679_s0 + $0x27] ss:$8 sm:$0x3] }
  0xe4   : > { %8984 = vmatmul.mubr.msk.f32.vlgmr.msra.gmra.mrb[2].mxu0 %vm500_vm2, %v10148_v25  ;;  %v985_v44 = vpop.permute.xlu1 %984  ;;  %v983_v45 = vpop.permute.xlu0 %982  ;;  %v10199_v17 = vcombine.low %v6055_v49, %v6062_v52  ;;  %v6417_v49 = vrot.slane %v6389_v22, %v9702_v61  ;;  %v8785_v22 = vld [vmem:[%s9679_s0 + $0x17] ss:$8 sm:$0x3]  ;;  %v8790_v34 = vld [vmem:[%s9679_s0 + $0x67] ss:$8 sm:$0x3] }
  0xe5   : > { %8992 = vmatpush3.msra.mxu0 %v904_v31  ;;  %v986_v56 = vsel %vm654_vm3, %v983_v45, %v985_v44  ;;  %8993 = vmatprep.mubr.msk.f32.mxu0 %vm9491_vm1, %v9490_v27  ;;  %v6403_v45 = vrot.slane %v6387_v19, %v9702_v61  ;;  %v8784_v19 = vld [vmem:[%s9679_s0 + $0x7] ss:$8 sm:$0x3] }
  0xe6   : > { %5831 = vrot.lane.b32.xlu1 %v5828_v26, %s9489_s23  ;;  %5829 = vrot.lane.b32.xlu0 %v10150_v28, %s9489_s23  ;;  %v7337_v47 = vcombine.low %v8784_v19, %v8785_v22 }
  0xe7   : > { %8997 = vmatpush3.msra.mxu1 %v986_v56  ;;  %9001 = vmatprep.subr.mxu0 %v9490_v27  ;;  %v8776_v56 = vld [vmem:[%s9681_s1 + $0x70] ss:$8 sm:$0x3]  ;;  %v6419_v13 = vcombine.low %v6403_v45, %v6417_v49 }
  0xe8   : > { %v1234_v6 = vpop.permute.xlu1 %1233  ;;  %v1232_v9 = vpop.permute.xlu0 %1231  ;;  %9006 = vmatprep.subr.mxu1 %v9490_v27  ;;  %8994 = vmatmul.mubr.msk.f32.vlgmr.msra.gmra.mrb[4].mxu0 %vm500_vm2, %v10162_v42 }
  0xe9   : > { %v1235_v16 = vsel %vm497_vm4, %v1232_v9, %v1234_v6  ;;  %8999 = vmatmul.mubr.msk.f32.vlgmr.msra.gmra.mrb[4].mxu1 %vm500_vm2, %v10187_v63  ;;  %9002 = vmatpush3.msra.mxu0 %v9772_v21  ;;  %v6386_v21 = vcombine.low %v6364_v57, %v6371_v58  ;;  %v6796_v57 = vcombine.high %v10217_v23, %v10220_v24 }
  0xea   : > { %5912 = vrot.lane.b32.xlu1 %v5828_v26, %s9488_s22  ;;  %5910 = vrot.lane.b32.xlu0 %v10150_v28, %s9488_s22  ;;  %v6974_v26 = vld [vmem:[%s9681_s1] ss:$8 sm:$0x3]  ;;  %v6703_v6 = vcombine.low %v10217_v23, %v10220_v24  ;;  %v7001_v9 = vcombine.low %v8775_v54, %v8776_v56 }
  0xeb   : > { %9007 = vmatpush3.msra.mxu1 %v1235_v16  ;;  %9003 = vmatprep.mubr.msk.f32.mxu0 %vm9491_vm1, %v9490_v27  ;;  %v6396_v52 = vrot.slane %v6386_v21, %v9702_v61  ;;  %v6998_v58 = vcombine.low %v6974_v26, %v8770_v30  ;;  %v6704_v16 = vcombine.low %v10233_v39, %v10236_v40 }
  0xec   : > { %v1316_v31 = vpop.permute.xlu1 %1315  ;;  %v1314_v35 = vpop.permute.xlu0 %1313  ;;  %9011 = vmatprep.subr.mxu0 %v9490_v27  ;;  %9004 = vmatmul.mubr.msk.f32.vlgmr.msra.gmra.mrb[6].mxu0 %vm500_vm2, %v10204_v18  ;;  %v6804_v21 = vrot.slane %v6796_v57, %v9702_v61  ;;  %v6811_v26 = vrot.slane %v6797_v0, %v9702_v61  ;;  %v7022_v40 = vrot.slane %v7000_v4, %v9702_v61  ;;  %v7637_v4 = vld [vmem:[%s9681_s1] ss:$8 sm:$0x3] }
  0xed   : > { %v1317_v44 = vsel %vm654_vm3, %v1314_v35, %v1316_v31  ;;  %9008 = vmatprep.mubr.msk.f32.mxu1 %vm9491_vm1, %v9490_v27  ;;  %9016 = vmatprep.subr.mxu1 %v9490_v27  ;;  %v10274_v14 = vcombine.low %v6396_v52, %v6410_v53  ;;  %v7008_v30 = vrot.slane %v6998_v58, %v9702_v61  ;;  %v8789_v35 = vld [vmem:[%s9679_s0 + $0x57] ss:$8 sm:$0x3] }
  0xee   : > { %6159 = vrot.lane.b32.xlu1 %v6156_v11, %s9489_s23  ;;  %6157 = vrot.lane.b32.xlu0 %v10199_v17, %s9489_s23  ;;  %v7015_v31 = vrot.slane %v6999_v1, %v9702_v61  ;;  %v7029_v43 = vrot.slane %v7001_v9, %v9702_v61  ;;  %v6711_v45 = vrot.slane %v6703_v6, %v9702_v61 }
  0xef   : > { %9012 = vmatpush3.msra.mxu0 %v1317_v44  ;;  %9009 = vmatmul.mubr.msk.f32.vlgmr.msra.gmra.mrb[6].mxu1 %vm500_vm2, %v10212_v20  ;;  %v8791_v44 = vld [vmem:[%s9679_s0 + $0x77] ss:$8 sm:$0x3]  ;;  %v6718_v46 = vrot.slane %v6704_v16, %v9702_v61  ;;  %v6812_v54 = vcombine.low %v6804_v21, %v6811_v26  ;;  %v10324_v6 = vrot.slane %v7337_v47, %v9702_v61  ;;  %v8799_v16 = vld [vmem:[%s9681_s1 + $0x30] ss:$8 sm:$0x3] }
  0xf0   : > { %v1503_v59 = vpop.permute.xlu1 %1502  ;;  %v1501_v60 = vpop.permute.xlu0 %1500  ;;  %9013 = vmatprep.mubr.msk.f32.mxu0 %vm9491_vm1, %v9490_v27  ;;  %9018 = vmatprep.mubr.msk.f32.mxu1 %vm9491_vm1, %v9490_v27  ;;  %v7340_v57 = vcombine.low %v8790_v34, %v8791_v44  ;;  %v7030_v0 = vcombine.low %v7008_v30, %v7015_v31  ;;  %v7031_v1 = vcombine.low %v7022_v40, %v7029_v43 }
  0xf1   : > { %v1504_v5 = vsel %vm497_vm4, %v1501_v60, %v1503_v59  ;;  %9014 = vmatmul.mubr.msk.f32.vlgmr.msra.gmra.mrb[8].mxu0 %vm500_vm2, %v10230_v38  ;;  %9021 = vmatprep.subr.mxu0 %v9490_v27  ;;  %v7124_v59 = vcombine.high %v7022_v40, %v7029_v43  ;;  %v10318_v60 = vcombine.low %v6711_v45, %v6718_v46 }
  0xf2   : > { %6240 = vrot.lane.b32.xlu1 %v6156_v11, %s9488_s22  ;;  %6238 = vrot.lane.b32.xlu0 %v10199_v17, %s9488_s22  ;;  %v8787_v11 = vld [vmem:[%s9679_s0 + $0x37] ss:$8 sm:$0x3] }
  0xf3   : > { %9017 = vmatpush3.msra.mxu1 %v1504_v5  ;;  %9022 = vmatpush3.msra.mxu0 %v9796_v48  ;;  %v8788_v48 = vld [vmem:[%s9679_s0 + $0x47] ss:$8 sm:$0x3]  ;;  %v7338_v49 = vcombine.low %v8786_v55, %v8787_v11  ;;  %v8797_v5 = vld [vmem:[%s9681_s1 + $0x10] ss:$8 sm:$0x3]  ;;  %v7138_v26 = vrot.slane %v7124_v59, %v9702_v61 }
  0xf4   : > { %v1657_v23 = vpop.permute.xlu1 %1656  ;;  %v1655_v24 = vpop.permute.xlu0 %1654  ;;  %9026 = vmatprep.subr.mxu1 %v9490_v27  ;;  %9019 = vmatmul.mubr.msk.f32.vlgmr.msra.gmra.mrb[8].mxu1 %vm500_vm2, %v10117_v51  ;;  %v7339_v56 = vcombine.low %v8788_v48, %v8789_v35  ;;  %v8800_v55 = vld [vmem:[%s9681_s1 + $0x40] ss:$8 sm:$0x3]  ;;  %v8801_v11 = vld [vmem:[%s9681_s1 + $0x50] ss:$8 sm:$0x3]  ;;  %v7045_v48 = vrot.slane %v7031_v1, %v9702_v61 }
  0xf5   : > { %v1658_v39 = vsel %vm654_vm3, %v1655_v24, %v1657_v23  ;;  %9023 = vmatprep.mubr.msk.f32.mxu0 %vm9491_vm1, %v9490_v27  ;;  %9028 = vmatprep.mubr.msk.f32.mxu1 %vm9491_vm1, %v9490_v27  ;;  %v10327_v9 = vrot.slane %v7338_v49, %v9702_v61  ;;  %v7656_v45 = vcombine.low %v8800_v55, %v8801_v11  ;;  %v8816_v55 = vld [vmem:[%s9681_s1 + $0x61] ss:$8 sm:$0x3]  ;;  %v8817_v11 = vld [vmem:[%s9681_s1 + $0x71] ss:$8 sm:$0x3] }
  0xf6   : > { %6422 = vrot.lane.b32.xlu1 %v6419_v13, %s9489_s23  ;;  %6420 = vrot.lane.b32.xlu0 %v10274_v14, %s9489_s23  ;;  %v7361_v21 = vrot.slane %v7339_v56, %v9702_v61 }
  0xf7   : > { %9027 = vmatpush3.msra.mxu1 %v1658_v39  ;;  %9024 = vmatmul.mubr.msk.f32.vlgmr.msra.gmra.mrb[10].mxu0 %vm500_vm2, %v9924_v62  ;;  %v7123_v62 = vcombine.high %v7008_v30, %v7015_v31  ;;  %v8802_v30 = vld [vmem:[%s9681_s1 + $0x60] ss:$8 sm:$0x3]  ;;  %v7038_v31 = vrot.slane %v7030_v0, %v9702_v61  ;;  %v7370_v35 = vcombine.high %v10324_v6, %v10327_v9 }
  0xf8   : > { %v1896_v52 = vpop.permute.xlu1 %1895  ;;  %v1894_v53 = vpop.permute.xlu0 %1893  ;;  %9036 = vmatprep.subr.mxu1 %v9490_v27  ;;  %9029 = vmatmul.mubr.msk.f32.vlgmr.msra.gmra.mrb[10].mxu1 %vm500_vm2, %v10148_v25  ;;  %v7654_v39 = vcombine.low %v7637_v4, %v8797_v5  ;;  %v8810_v4 = vld [vmem:[%s9681_s1 + $0x1] ss:$8 sm:$0x3]  ;;  %v8811_v5 = vld [vmem:[%s9681_s1 + $0x11] ss:$8 sm:$0x3] }
  0xf9   : > { %v1897_v58 = vsel %vm497_vm4, %v1894_v53, %v1896_v52  ;;  %9031 = vmatprep.subr.mxu0 %v9490_v27  ;;  %9033 = vmatprep.mubr.msk.f32.mxu0 %vm9491_vm1, %v9490_v27  ;;  %v7131_v24 = vrot.slane %v7123_v62, %v9702_v61  ;;  %v10366_v52 = vcombine.low %v7038_v31, %v7045_v48 }
  0xfa   : > { %6576 = vrot.lane.b32.xlu1 %v6419_v13, %s9488_s22  ;;  %6574 = vrot.lane.b32.xlu0 %v10274_v14, %s9488_s22  ;;  %v8798_v13 = vld [vmem:[%s9681_s1 + $0x20] ss:$8 sm:$0x3]  ;;  %v7369_v53 = vcombine.low %v10324_v6, %v10327_v9  ;;  %v8812_v9 = vld [vmem:[%s9681_s1 + $0x21] ss:$8 sm:$0x3] }
  0xfb   : > { %9037 = vmatpush3.msra.mxu1 %v1897_v58  ;;  %9032 = vmatpush3.msra.mxu0 %v9820_v12  ;;  %v7368_v12 = vrot.slane %v7340_v57, %v9702_v61  ;;  %v7655_v40 = vcombine.low %v8798_v13, %v8799_v16  ;;  %v7139_v49 = vcombine.low %v7131_v24, %v7138_v26  ;;  %v8813_v13 = vld [vmem:[%s9681_s1 + $0x31] ss:$8 sm:$0x3] }
  0xfc   : > { %v1977_v19 = vpop.permute.xlu1 %1976  ;;  %v1975_v22 = vpop.permute.xlu0 %1974  ;;  %9041 = vmatprep.subr.mxu0 %v9490_v27  ;;  %9034 = vmatmul.mubr.msk.f32.vlgmr.msra.gmra.mrb[12].mxu0 %vm500_vm2, %v9946_v15  ;;  %v8803_v15 = vld [vmem:[%s9681_s1 + $0x70] ss:$8 sm:$0x3]  ;;  %v7386_v57 = vrot.slane %v7370_v35, %v9702_v61  ;;  %v7379_v16 = vrot.slane %v7369_v53, %v9702_v61 }
  0xfd   : > { %v1978_v23 = vsel %vm654_vm3, %v1975_v22, %v1977_v19  ;;  %9038 = vmatprep.mubr.msk.f32.mxu1 %vm9491_vm1, %v9490_v27  ;;  %9043 = vmatprep.mubr.msk.f32.mxu0 %vm9491_vm1, %v9490_v27  ;;  %v7372_v44 = vcombine.high %v7361_v21, %v7368_v12  ;;  %v7657_v46 = vcombine.low %v8802_v30, %v8803_v15  ;;  %v8814_v22 = vld [vmem:[%s9681_s1 + $0x41] ss:$8 sm:$0x3] }
  0xfe   : > { %6815 = vrot.lane.b32.xlu1 %v6812_v54, %s9489_s23  ;;  %6813 = vrot.lane.b32.xlu0 %v10318_v60, %s9489_s23  ;;  %v7371_v56 = vcombine.low %v7361_v21, %v7368_v12  ;;  %v7671_v58 = vrot.slane %v7655_v40, %v9702_v61  ;;  %v8815_v21 = vld [vmem:[%s9681_s1 + $0x51] ss:$8 sm:$0x3]  ;;  %s4353_s1 = scalar_select %p10846_p5, 1, 0 }
  0xff   : > { %9042 = vmatpush3.msra.mxu0 %v1978_v23  ;;  %9039 = vmatmul.mubr.msk.f32.vlgmr.msra.gmra.mrb[12].mxu1 %vm500_vm2, %v10162_v42  ;;  %v7400_v0 = vrot.slane %v7372_v44, %v9702_v61  ;;  %v7685_v1 = vrot.slane %v7657_v46, %v9702_v61  ;;  %v7982_v23 = vcombine.low %v8810_v4, %v8811_v5 }
 0x100   : > { %v2224_v43 = vpop.permute.xlu1 %2223  ;;  %v2222_v34 = vpop.permute.xlu0 %2221  ;;  %9051 = vmatprep.subr.mxu0 %v9490_v27  ;;  %9044 = vmatmul.mubr.msk.f32.vlgmr.msra.gmra.mrb[14].mxu0 %vm500_vm2, %v10187_v63  ;;  %v7393_v19 = vrot.slane %v7371_v56, %v9702_v61 }
 0x101   : > { %v2225_v47 = vsel %vm497_vm4, %v2222_v34, %v2224_v43  ;;  %9046 = vmatprep.subr.mxu1 %v9490_v27  ;;  %9048 = vmatprep.mubr.msk.f32.mxu1 %vm9491_vm1, %v9490_v27  ;;  %v7402_v30 = vcombine.low %v7386_v57, %v7400_v0  ;;  %v7984_v43 = vcombine.low %v8814_v22, %v8815_v21  ;;  %v10455_v22 = vld [vmem:[%s10914_s2 + $0x18] sm:$0xff] }
 0x102   : > { %6896 = vrot.lane.b32.xlu1 %v6812_v54, %s9488_s22  ;;  %6894 = vrot.lane.b32.xlu0 %v10318_v60, %s9488_s22  ;;  %v7664_v54 = vrot.slane %v7654_v39, %v9702_v61  ;;  %v7983_v39 = vcombine.low %v8812_v9, %v8813_v13  ;;  %v10410_v40 = vcombine.low %v7379_v16, %v7393_v19 }
 0x103   : > { %9052 = vmatpush3.msra.mxu0 %v2225_v47  ;;  %9047 = vmatpush3.msra.mxu1 %v9844_v41  ;;  %v7678_v41 = vrot.slane %v7656_v45, %v9702_v61  ;;  %v7985_v34 = vcombine.low %v8816_v55, %v8817_v11  ;;  %v7992_v53 = vrot.slane %v7982_v23, %v9702_v61 }
 0x104   : > { %v2305_v62 = vpop.permute.xlu1 %2304  ;;  %v2303_v59 = vpop.permute.xlu0 %2302  ;;  %9056 = vmatprep.subr.mxu1 %v9490_v27  ;;  %9049 = vmatmul.mubr.msk.f32.vlgmr.msra.gmra.mrb[14].mxu1 %vm500_vm2, %v10204_v18  ;;  %v7779_v12 = vcombine.high %v7664_v54, %v7671_v58  ;;  %v7686_v31 = vcombine.low %v7664_v54, %v7671_v58  ;;  %v7999_v57 = vrot.slane %v7983_v39, %v9702_v61 }
 0x105   : > { %v2306_v6 = vsel %vm654_vm3, %v2303_v59, %v2305_v62  ;;  %9053 = vmatprep.mubr.msk.f32.mxu0 %vm9491_vm1, %v9490_v27  ;;  %9061 = vmatprep.subr.mxu0 %v9490_v27  ;;  %v7780_v15 = vcombine.high %v7678_v41, %v7685_v1  ;;  %v7687_v35 = vcombine.low %v7678_v41, %v7685_v1  ;;  %v10435_v62 = vld [vmem:[%s10914_s2] sm:$0xff] }
 0x106   : > { %7142 = vrot.lane.b32.xlu1 %v7139_v49, %s9489_s23  ;;  %7140 = vrot.lane.b32.xlu0 %v10366_v52, %s9489_s23  ;;  %v7787_v44 = vrot.slane %v7779_v12, %v9702_v61  ;;  %v8006_v54 = vrot.slane %v7984_v43, %v9702_v61  ;;  %v8013_v58 = vrot.slane %v7985_v34, %v9702_v61 }
 0x107   : > { %9057 = vmatpush3.msra.mxu1 %v2306_v6  ;;  %9054 = vmatmul.mubr.msk.f32.vlgmr.msra.gmra.mrb[16].mxu0 %vm500_vm2, %v10212_v20  ;;  %v7794_v47 = vrot.slane %v7780_v15, %v9702_v61  ;;  %v8107_v5 = vcombine.high %v7992_v53, %v7999_v57  ;;  %v8014_v9 = vcombine.low %v7992_v53, %v7999_v57  ;;  %v397_v53 = vld [vmem:[%s10915_s3] sm:$0xff]  ;;  %v9492_v57 = vmov 0  }
 0x108   : > { %v2487_v24 = vpop.permute.xlu1 %2486  ;;  %v2485_v26 = vpop.permute.xlu0 %2484  ;;  %9058 = vmatprep.mubr.msk.f32.mxu1 %vm9491_vm1, %v9490_v27  ;;  %9063 = vmatprep.mubr.msk.f32.mxu0 %vm9491_vm1, %v9490_v27  ;;  %v8108_v6 = vcombine.high %v8006_v54, %v8013_v58  ;;  %v8015_v13 = vcombine.low %v8006_v54, %v8013_v58 }
 0x109   : > { %v2488_v48 = vsel %vm497_vm4, %v2485_v26, %v2487_v24  ;;  %9059 = vmatmul.mubr.msk.f32.vlgmr.msra.gmra.mrb[16].mxu1 %vm500_vm2, %v10230_v38  ;;  %9066 = vmatprep.subr.mxu1 %v9490_v27  ;;  %v7795_v41 = vcombine.low %v7787_v44, %v7794_v47  ;;  %v8022_v55 = vrot.slane %v8014_v9, %v9702_v61 }
 0x10a   : > { %7223 = vrot.lane.b32.xlu1 %v7139_v49, %s9488_s22  ;;  %7221 = vrot.lane.b32.xlu0 %v10366_v52, %s9488_s22  ;;  %v7694_v49 = vrot.slane %v7686_v31, %v9702_v61  ;;  %v8122_v12 = vrot.slane %v8108_v6, %v9702_v61  ;;  %v8029_v11 = vrot.slane %v8015_v13, %v9702_v61 }
 0x10b   : > { %9062 = vmatpush3.msra.mxu0 %v2488_v48  ;;  %9067 = vmatpush3.msra.mxu1 %v9868_v8  ;;  %v7701_v8 = vrot.slane %v7687_v35, %v9702_v61 }
 0x10c   : > { %v2641_v45 = vpop.permute.xlu1 %2640  ;;  %v2639_v46 = vpop.permute.xlu0 %2638  ;;  %9071 = vmatprep.subr.mxu0 %v9490_v27  ;;  %9064 = vmatmul.mubr.msk.f32.vlgmr.msra.gmra.mrb[18].mxu0 %vm500_vm2, %v10117_v51 }
 0x10d   : > { %v2642_v56 = vsel %vm654_vm3, %v2639_v46, %v2641_v45  ;;  %9068 = vmatprep.mubr.msk.f32.mxu1 %vm9491_vm1, %v9490_v27  ;;  %9073 = vmatprep.mubr.msk.f32.mxu0 %vm9491_vm1, %v9490_v27  ;;  %v10446_v4 = vcombine.low %v7694_v49, %v7701_v8 }
 0x10e   : > { %7405 = vrot.lane.b32.xlu1 %v7402_v30, %s9489_s23  ;;  %7403 = vrot.lane.b32.xlu0 %v10410_v40, %s9489_s23 }
 0x10f   : > { %9072 = vmatpush3.msra.mxu0 %v2642_v56  ;;  %9069 = vmatmul.mubr.msk.f32.vlgmr.msra.gmra.mrb[18].mxu1 %vm500_vm2, %v10435_v62 }
 0x110   : > { %v2880_v59 = vpop.permute.xlu1 %2879  ;;  %v2878_v0 = vpop.permute.xlu0 %2877  ;;  %9081 = vmatprep.subr.mxu0 %v9490_v27  ;;  %9074 = vmatmul.mubr.msk.f32.vlgmr.msra.gmra.mrb[20].mxu0 %vm500_vm2, %v10148_v25 }
 0x111   : > { %v2881_v1 = vsel %vm497_vm4, %v2878_v0, %v2880_v59  ;;  %9076 = vmatprep.subr.mxu1 %v9490_v27  ;;  %9078 = vmatprep.mubr.msk.f32.mxu1 %vm9491_vm1, %v9490_v27 }
 0x112   : > { %7559 = vrot.lane.b32.xlu1 %v7402_v30, %s9488_s22  ;;  %7557 = vrot.lane.b32.xlu0 %v10410_v40, %s9488_s22  ;;  %v10483_v30 = vcombine.low %v8022_v55, %v8029_v11  ;;  %v10632_v11 = vld [vmem:[%s10914_s2] sm:$0xff] }
 0x113   : > { %9082 = vmatpush3.msra.mxu0 %v2881_v1  ;;  %9077 = vmatpush3.msra.mxu1 %v9891_v32  ;;  %v8115_v32 = vrot.slane %v8107_v5, %v9702_v61 }
 0x114   : > { %v2961_v16 = vpop.permute.xlu1 %2960  ;;  %v2959_v19 = vpop.permute.xlu0 %2958  ;;  %9079 = vmatmul.mubr.msk.f32.vlgmr.msra.gmra.mrb[20].mxu1 %vm500_vm2, %v10455_v22  ;;  %9086 = vmatprep.subr.mxu1 %v9490_v27 }
 0x115   : > { %v2962_v21 = vsel %vm654_vm3, %v2959_v19, %v2961_v16  ;;  %9083 = vmatprep.mubr.msk.f32.mxu0 %vm9491_vm1, %v9490_v27  ;;  %9088 = vmatprep.mubr.msk.f32.mxu1 %vm9491_vm1, %v9490_v27  ;;  %v8123_v61 = vcombine.low %v8115_v32, %v8122_v12  ;;  %v10623_v12 = vld [vmem:[%s10914_s2 + $0x8] sm:$0xff] }
 0x116   : > { %7798 = vrot.lane.b32.xlu1 %v7795_v41, %s9489_s23  ;;  %7796 = vrot.lane.b32.xlu0 %v10446_v4, %s9489_s23 }
 0x117   : > { %9087 = vmatpush3.msra.mxu1 %v2962_v21  ;;  %9084 = vmatmul.mubr.msk.f32.vlgmr.msra.gmra.mrb[22].mxu0 %vm500_vm2, %v10162_v42 }
 0x118   : > { %v3208_v23 = vpop.permute.xlu1 %3207  ;;  %v3206_v24 = vpop.permute.xlu0 %3205  ;;  %9089 = vmatmul.mubr.msk.f32.vlgmr.msra.gmra.mrb[22].mxu1 %vm500_vm2, %v10187_v63  ;;  %9091 = vmatprep.subr.mxu0 %v9490_v27 }
 0x119   : > { %v3209_v26 = vsel %vm497_vm4, %v3206_v24, %v3208_v23  ;;  %9096 = vmatprep.subr.mxu1 %v9490_v27  ;;  %9092 = vmatpush3.msra.mxu0 %v9929_v3  ;;  %v10645_v24 = vld [vmem:[%s10914_s2 + $0x10] sm:$0xff] }
 0x11a   : > { %7879 = vrot.lane.b32.xlu1 %v7795_v41, %s9488_s22  ;;  %7877 = vrot.lane.b32.xlu0 %v10446_v4, %s9488_s22 }
 0x11b   : > { %9093 = vmatprep.mubr.msk.f32.mxu0 %vm9491_vm1, %v9490_v27  ;;  %9097 = vmatpush3.msra.mxu1 %v3209_v26 }
 0x11c   : > { %9094 = vmatmul.mubr.msk.f32.vlgmr.msra.gmra.mrb[24].mxu0 %vm500_vm2, %v10204_v18  ;;  %v3289_v15 = vpop.permute.xlu1 %3288  ;;  %v3287_v31 = vpop.permute.xlu0 %3286  ;;  %9098 = vmatprep.mubr.msk.f32.mxu1 %vm9491_vm1, %v9490_v27 }
 0x11d   : > { %v3290_v3 = vsel %vm654_vm3, %v3287_v31, %v3289_v15  ;;  %9099 = vmatmul.mubr.msk.f32.vlgmr.msra.gmra.mrb[24].mxu1 %vm500_vm2, %v10212_v20  ;;  %9101 = vmatprep.subr.mxu0 %v9490_v27 }
 0x11e   : > { %8126 = vrot.lane.b32.xlu1 %v8123_v61, %s9489_s23  ;;  %8124 = vrot.lane.b32.xlu0 %v10483_v30, %s9489_s23 }
 0x11f   : > { %9102 = vmatpush3.msra.mxu0 %v3290_v3  ;;  %9103 = vmatprep.mubr.msk.f32.mxu0 %vm9491_vm1, %v9490_v27 }
 0x120   : > { %9104 = vmatmul.mubr.msk.f32.vlgmr.msra.gmra.mrb[26].mxu0 %vm500_vm2, %v10230_v38  ;;  %v3471_v48 = vpop.permute.xlu1 %3470  ;;  %v3469_v35 = vpop.permute.xlu0 %3468  ;;  %9106 = vmatprep.subr.mxu1 %v9490_v27 }
 0x121   : > { %v3472_v39 = vsel %vm497_vm4, %v3469_v35, %v3471_v48  ;;  %9108 = vmatprep.mubr.msk.f32.mxu1 %vm9491_vm1, %v9490_v27  ;;  %9111 = vmatprep.subr.mxu0 %v9490_v27 }
 0x122   : > { %8207 = vrot.lane.b32.xlu1 %v8123_v61, %s9488_s22  ;;  %8205 = vrot.lane.b32.xlu0 %v10483_v30, %s9488_s22  ;;  %v10654_v61 = vld [vmem:[%s10914_s2 + $0x18] sm:$0xff]  ;;  %s6319_s22 = sadd.s32 5, %s9663_s27 }
 0x123   : > { %9107 = vmatpush3.msra.mxu1 %v3472_v39  ;;  %9112 = vmatpush3.msra.mxu0 %v9968_v37  ;;  %v10678_v39 = vld [vmem:[%s10914_s2 + $0x28] sm:$0xff]  ;;  %p6320_p7 = scmp.lt.s32.totalorder %s6319_s22, 16 }
 0x124   : > { %v3625_v43 = vpop.permute.xlu1 %3624  ;;  %v3623_v34 = vpop.permute.xlu0 %3622  ;;  %9116 = vmatprep.subr.mxu1 %v9490_v27  ;;  %9109 = vmatmul.mubr.msk.f32.vlgmr.msra.gmra.mrb[26].mxu1 %vm500_vm2, %v10117_v51 }
 0x125   : > { %v3626_v44 = vsel %vm654_vm3, %v3623_v34, %v3625_v43  ;;  %9113 = vmatprep.mubr.msk.f32.mxu0 %vm9491_vm1, %v9490_v27  ;;  %9118 = vmatprep.mubr.msk.f32.mxu1 %vm9491_vm1, %v9490_v27  ;;  %s6321_s23 = scalar_select %p6320_p7, 1, 0 }
 0x126   : > { %9117 = vmatpush3.msra.mxu1 %v3626_v44  ;;  %9114 = vmatmul.mubr.msk.f32.vlgmr.msra.gmra.mrb[28].mxu0 %vm500_vm2, %v10435_v62 }
 0x127   : > { %9126 = vmatprep.subr.mxu1 %v9490_v27  ;;  %9121 = vmatprep.subr.mxu0 %v9490_v27 }
 0x128   : > { %v3864_v37 = vpop.permute.xlu1 %3863  ;;  %v3862_v45 = vpop.permute.xlu0 %3861  ;;  %9119 = vmatmul.mubr.msk.f32.vlgmr.msra.gmra.mrb[28].mxu1 %vm500_vm2, %v10148_v25  ;;  %9122 = vmatpush3.msra.mxu0 %v9992_v2 }
 0x129   : > { %v3865_v46 = vsel %vm497_vm4, %v3862_v45, %v3864_v37  ;;  %9123 = vmatprep.mubr.msk.f32.mxu0 %vm9491_vm1, %v9490_v27  ;;  %9131 = vmatprep.subr.mxu0 %v9490_v27 }
 0x12a   : > { %9127 = vmatpush3.msra.mxu1 %v3865_v46  ;;  %9124 = vmatmul.mubr.msk.f32.vlgmr.msra.gmra.mrb[30].mxu0 %vm500_vm2, %v10455_v22 }
 0x12b   : > { %9128 = vmatprep.mubr.msk.f32.mxu1 %vm9491_vm1, %v9490_v27  ;;  %9133 = vmatprep.mubr.msk.f32.mxu0 %vm9491_vm1, %v9490_v27 }
 0x12c   : > { %v3945_v47 = vpop.permute.xlu1 %3944  ;;  %v3943_v49 = vpop.permute.xlu0 %3942  ;;  %9129 = vmatmul.mubr.msk.f32.vlgmr.msra.gmra.mrb[30].mxu1 %vm500_vm2, %v10162_v42  ;;  %9136 = vmatprep.subr.mxu1 %v9490_v27 }
 0x12d   : > { %v3946_v2 = vsel %vm654_vm3, %v3943_v49, %v3945_v47  ;;  %9137 = vmatpush3.msra.mxu1 %v10013_v29  ;;  %9138 = vmatprep.mubr.msk.f32.mxu1 %vm9491_vm1, %v9490_v27 }
 0x12e   : > { %9132 = vmatpush3.msra.mxu0 %v3946_v2  ;;  %9146 = vmatprep.subr.mxu1 %v9490_v27 }
 0x12f   : > { %9134 = vmatmul.mubr.msk.f32.vlgmr.msra.gmra.mrb[32].mxu0 %vm500_vm2, %v10187_v63  ;;  %9141 = vmatprep.subr.mxu0 %v9490_v27 }
 0x130   : > { %v4192_v56 = vpop.permute.xlu1 %4191  ;;  %v4190_v8 = vpop.permute.xlu0 %4189  ;;  %9139 = vmatmul.mubr.msk.f32.vlgmr.msra.gmra.mrb[32].mxu1 %vm500_vm2, %v10204_v18  ;;  %9143 = vmatprep.mubr.msk.f32.mxu0 %vm9491_vm1, %v9490_v27 }
 0x131   : > { %v4193_v29 = vsel %vm497_vm4, %v4190_v8, %v4192_v56  ;;  %9148 = vmatprep.mubr.msk.f32.mxu1 %vm9491_vm1, %v9490_v27  ;;  %9411 = vset.pattern.permute.xlu0 %v9492_v57  ;;  %v10741_v57 = vld [vmem:[%s10914_s2 + $0x30] sm:$0xff] }
 0x132   : > { %9142 = vmatpush3.msra.mxu0 %v4193_v29  ;;  %1395 = vperm.xlu0 %9411, %v397_v53  }
 0x133   : > { %9144 = vmatmul.mubr.msk.f32.vlgmr.msra.gmra.mrb[34].mxu0 %vm500_vm2, %v10212_v20  ;;  %9151 = vmatprep.subr.mxu0 %v9490_v27 }
 0x134   : > { %v4273_v54 = vpop.permute.xlu1 %4272  ;;  %v4271_v58 = vpop.permute.xlu0 %4270  ;;  %9153 = vmatprep.mubr.msk.f32.mxu0 %vm9491_vm1, %v9490_v27 }
 0x135   : > { %v4274_v59 = vsel %vm654_vm3, %v4271_v58, %v4273_v54 }
 0x136   : > { %9147 = vmatpush3.msra.mxu1 %v4274_v59 }
 0x137   : > { %9149 = vmatmul.mubr.msk.f32.vlgmr.msra.gmra.mrb[34].mxu1 %vm500_vm2, %v10230_v38  ;;  %9156 = vmatprep.subr.mxu1 %v9490_v27 }
 0x138   : > { %v4455_v0 = vpop.permute.xlu1 %4454  ;;  %v4453_v41 = vpop.permute.xlu0 %4452  ;;  %9157 = vmatpush3.msra.mxu1 %v10040_v7  ;;  %9158 = vmatprep.mubr.msk.f32.mxu1 %vm9491_vm1, %v9490_v27 }
 0x139   : > { %v4456_v1 = vsel %vm497_vm4, %v4453_v41, %v4455_v0  ;;  %9166 = vmatprep.subr.mxu1 %v9490_v27  ;;  %v8779_v0 = vld [vmem:[%s10914_s2 + $0x38] sm:$0xff] }
 0x13a   : > { %9152 = vmatpush3.msra.mxu0 %v4456_v1 }
 0x13b   : > { %9161 = vmatprep.subr.mxu0 %v9490_v27  ;;  %9154 = vmatmul.mubr.msk.f32.vlgmr.msra.gmra.mrb[36].mxu0 %vm500_vm2, %v10117_v51 }
 0x13c   : > { %v4609_v5 = vpop.permute.xlu1 %4608  ;;  %v4607_v6 = vpop.permute.xlu0 %4606  ;;  %9159 = vmatmul.mubr.msk.f32.vlgmr.msra.gmra.mrb[36].mxu1 %vm500_vm2, %v10435_v62  ;;  %9163 = vmatprep.mubr.msk.f32.mxu0 %vm9491_vm1, %v9490_v27 }
 0x13d   : > { %v4610_v7 = vsel %vm654_vm3, %v4607_v6, %v4609_v5  ;;  %9167 = vmatpush3.msra.mxu1 %v10061_v36  ;;  %9168 = vmatprep.mubr.msk.f32.mxu1 %vm9491_vm1, %v9490_v27 }
 0x13e   : > { %9162 = vmatpush3.msra.mxu0 %v4610_v7  ;;  %9176 = vmatprep.subr.mxu1 %v9490_v27 }
 0x13f   : > { %9171 = vmatprep.subr.mxu0 %v9490_v27  ;;  %9164 = vmatmul.mubr.msk.f32.vlgmr.msra.gmra.mrb[38].mxu0 %vm500_vm2, %v10148_v25 }
 0x140   : > { %v4848_v51 = vpop.permute.xlu1 %4847  ;;  %v4846_v62 = vpop.permute.xlu0 %4845  ;;  %9169 = vmatmul.mubr.msk.f32.vlgmr.msra.gmra.mrb[38].mxu1 %vm500_vm2, %v10455_v22  ;;  %9173 = vmatprep.mubr.msk.f32.mxu0 %vm9491_vm1, %v9490_v27 }
 0x141   : > { %v4849_v36 = vsel %vm497_vm4, %v4846_v62, %v4848_v51  ;;  %9178 = vmatprep.mubr.msk.f32.mxu1 %vm9491_vm1, %v9490_v27  ;;  %v8781_v51 = vld [vmem:[%s10914_s2 + $0x40] sm:$0xff] }
 0x142   : > { %9172 = vmatpush3.msra.mxu0 %v4849_v36 }
 0x143   : > { %9174 = vmatmul.mubr.msk.f32.vlgmr.msra.gmra.mrb[40].mxu0 %vm500_vm2, %v10162_v42  ;;  %9181 = vmatprep.subr.mxu0 %v9490_v27 }
 0x144   : > { %v4929_v25 = vpop.permute.xlu1 %4928  ;;  %v4927_v9 = vpop.permute.xlu0 %4926  ;;  %9182 = vmatpush3.msra.mxu0 %v10088_v10  ;;  %9183 = vmatprep.mubr.msk.f32.mxu0 %vm9491_vm1, %v9490_v27 }
 0x145   : > { %v4930_v13 = vsel %vm654_vm3, %v4927_v9, %v4929_v25  ;;  %9191 = vmatprep.subr.mxu0 %v9490_v27 }
 0x146   : > { %9177 = vmatpush3.msra.mxu1 %v4930_v13 }
 0x147   : > { %9179 = vmatmul.mubr.msk.f32.vlgmr.msra.gmra.mrb[40].mxu1 %vm500_vm2, %v10187_v63  ;;  %9186 = vmatprep.subr.mxu1 %v9490_v27 }
 0x148   : > { %v5176_v42 = vpop.permute.xlu1 %5175  ;;  %v5174_v16 = vpop.permute.xlu0 %5173  ;;  %9184 = vmatmul.mubr.msk.f32.vlgmr.msra.gmra.mrb[42].mxu0 %vm500_vm2, %v10204_v18  ;;  %9188 = vmatprep.mubr.msk.f32.mxu1 %vm9491_vm1, %v9490_v27 }
 0x149   : > { %v5177_v10 = vsel %vm497_vm4, %v5174_v16, %v5176_v42  ;;  %9193 = vmatprep.mubr.msk.f32.mxu0 %vm9491_vm1, %v9490_v27 }
 0x14a   : > { %9187 = vmatpush3.msra.mxu1 %v5177_v10 }
 0x14b   : > { %9189 = vmatmul.mubr.msk.f32.vlgmr.msra.gmra.mrb[42].mxu1 %vm500_vm2, %v10212_v20  ;;  %9196 = vmatprep.subr.mxu1 %v9490_v27 }
 0x14c   : > { %v5257_v63 = vpop.permute.xlu1 %5256  ;;  %v5255_v19 = vpop.permute.xlu0 %5254  ;;  %9198 = vmatprep.mubr.msk.f32.mxu1 %vm9491_vm1, %v9490_v27 }
 0x14d   : > { %v5258_v22 = vsel %vm654_vm3, %v5255_v19, %v5257_v63 }
 0x14e   : > { %9192 = vmatpush3.msra.mxu0 %v5258_v22 }
 0x14f   : > { %9194 = vmatmul.mubr.msk.f32.vlgmr.msra.gmra.mrb[44].mxu0 %vm500_vm2, %v10230_v38  ;;  %9201 = vmatprep.subr.mxu0 %v9490_v27 }
 0x150   : > { %v5439_v21 = vpop.permute.xlu1 %5438  ;;  %v5437_v32 = vpop.permute.xlu0 %5436  ;;  %9202 = vmatpush3.msra.mxu0 %v10112_v50  ;;  %9203 = vmatprep.mubr.msk.f32.mxu0 %vm9491_vm1, %v9490_v27 }
 0x151   : > { %v5440_v55 = vsel %vm497_vm4, %v5437_v32, %v5439_v21  ;;  %9211 = vmatprep.subr.mxu0 %v9490_v27 }
 0x152   : > { %9197 = vmatpush3.msra.mxu1 %v5440_v55 }
 0x153   : > { %9206 = vmatprep.subr.mxu1 %v9490_v27  ;;  %9199 = vmatmul.mubr.msk.f32.vlgmr.msra.gmra.mrb[44].mxu1 %vm500_vm2, %v10623_v12 }
 0x154   : > { %v5593_v23 = vpop.permute.xlu1 %5592  ;;  %v5591_v50 = vpop.permute.xlu0 %5590  ;;  %9204 = vmatmul.mubr.msk.f32.vlgmr.msra.gmra.mrb[46].mxu0 %vm500_vm2, %v10632_v11  ;;  %9208 = vmatprep.mubr.msk.f32.mxu1 %vm9491_vm1, %v9490_v27 }
 0x155   : > { %v5594_v26 = vsel %vm654_vm3, %v5591_v50, %v5593_v23  ;;  %9212 = vmatpush3.msra.mxu0 %v10150_v28  ;;  %9213 = vmatprep.mubr.msk.f32.mxu0 %vm9491_vm1, %v9490_v27  ;;  %v10667_v28 = vld [vmem:[%s10914_s2 + $0x20] sm:$0xff] }
 0x156   : > { %9207 = vmatpush3.msra.mxu1 %v5594_v26  ;;  %9221 = vmatprep.subr.mxu0 %v9490_v27 }
 0x157   : > { %9216 = vmatprep.subr.mxu1 %v9490_v27  ;;  %9209 = vmatmul.mubr.msk.f32.vlgmr.msra.gmra.mrb[46].mxu1 %vm500_vm2, %v10645_v24 }
 0x158   : > { %v5832_v15 = vpop.permute.xlu1 %5831  ;;  %v5830_v31 = vpop.permute.xlu0 %5829  ;;  %9214 = vmatmul.mubr.msk.f32.vlgmr.msra.gmra.mrb[48].mxu0 %vm500_vm2, %v10654_v61  ;;  %9218 = vmatprep.mubr.msk.f32.mxu1 %vm9491_vm1, %v9490_v27 }
 0x159   : > { %v5833_v3 = vsel %vm497_vm4, %v5830_v31, %v5832_v15  ;;  %9223 = vmatprep.mubr.msk.f32.mxu0 %vm9491_vm1, %v9490_v27 }
 0x15a   : > { %9217 = vmatpush3.msra.mxu1 %v5833_v3  ;;  %v10744_v54 = vpop.f32.mrb[0].mxu1 }
 0x15b   : > { %9219 = vmatmul.mubr.msk.f32.vlgmr.msra.gmra.mrb[48].mxu1 %vm500_vm2, %v10667_v28  ;;  %9226 = vmatprep.subr.mxu1 %v9490_v27 }
 0x15c   : > { %v5913_v48 = vpop.permute.xlu1 %5912  ;;  %v5911_v35 = vpop.permute.xlu0 %5910  ;;  %9227 = vmatpush3.msra.mxu1 %v10199_v17  ;;  %9228 = vmatprep.mubr.msk.f32.mxu1 %vm9491_vm1, %v9490_v27 }
 0x15d   : > { %v5914_v43 = vsel %vm654_vm3, %v5911_v35, %v5913_v48  ;;  %9236 = vmatprep.subr.mxu1 %v9490_v27 }
 0x15e   : > { %9222 = vmatpush3.msra.mxu0 %v5914_v43 }
 0x15f   : > { %9224 = vmatmul.mubr.msk.f32.vlgmr.msra.gmra.mrb[50].mxu0 %vm500_vm2, %v10678_v39  ;;  %9231 = vmatprep.subr.mxu0 %v9490_v27 }
 0x160   : > { %v6160_v34 = vpop.permute.xlu1 %6159  ;;  %v6158_v44 = vpop.permute.xlu0 %6157  ;;  %9229 = vmatmul.mubr.msk.f32.vlgmr.msra.gmra.mrb[50].mxu1 %vm500_vm2, %v10204_v18  ;;  %9233 = vmatprep.mubr.msk.f32.mxu0 %vm9491_vm1, %v9490_v27 }
 0x161   : > { %v6161_v17 = vsel %vm497_vm4, %v6158_v44, %v6160_v34  ;;  %9238 = vmatprep.mubr.msk.f32.mxu1 %vm9491_vm1, %v9490_v27  ;;  %v1402_v34 = vstv %s1401_s17  ;;  %s8288_s17 = scalar_select %p8287_p9, 1, 0 }
 0x162   : > { %9232 = vmatpush3.msra.mxu0 %v6161_v17  ;;  %vm1403_vm6 = vcmp.eq.s32.totalorder %v1402_v34, 1 }
 0x163   : > { %9234 = vmatmul.mubr.msk.f32.vlgmr.msra.gmra.mrb[52].mxu0 %vm500_vm2, %v10212_v20  ;;  %9241 = vmatprep.subr.mxu0 %v9490_v27 }
 0x164   : > { %v6241_v37 = vpop.permute.xlu1 %6240  ;;  %v6239_v45 = vpop.permute.xlu0 %6238  ;;  %9243 = vmatprep.mubr.msk.f32.mxu0 %vm9491_vm1, %v9490_v27 }
 0x165   : > { %v6242_v18 = vsel %vm654_vm3, %v6239_v45, %v6241_v37 }
 0x166   : > { %9237 = vmatpush3.msra.mxu1 %v6242_v18 }
 0x167   : > { %9239 = vmatmul.mubr.msk.f32.vlgmr.msra.gmra.mrb[52].mxu1 %vm500_vm2, %v10230_v38  ;;  %9246 = vmatprep.subr.mxu1 %v9490_v27 }
 0x168   : > { %v6423_v46 = vpop.permute.xlu1 %6422  ;;  %v6421_v47 = vpop.permute.xlu0 %6420  ;;  %9247 = vmatpush3.msra.mxu1 %v10274_v14  ;;  %9248 = vmatprep.mubr.msk.f32.mxu1 %vm9491_vm1, %v9490_v27 }
 0x169   : > { %v6424_v20 = vsel %vm497_vm4, %v6421_v47, %v6423_v46  ;;  %9256 = vmatprep.subr.mxu1 %v9490_v27 }
 0x16a   : > { %9242 = vmatpush3.msra.mxu0 %v6424_v20 }
 0x16b   : > { %9251 = vmatprep.subr.mxu0 %v9490_v27  ;;  %9244 = vmatmul.mubr.msk.f32.vlgmr.msra.gmra.mrb[54].mxu0 %vm500_vm2, %v10623_v12 }
 0x16c   : > { %v6577_v38 = vpop.permute.xlu1 %6576  ;;  %v6575_v49 = vpop.permute.xlu0 %6574  ;;  %9249 = vmatmul.mubr.msk.f32.vlgmr.msra.gmra.mrb[54].mxu1 %vm500_vm2, %v10632_v11  ;;  %9253 = vmatprep.mubr.msk.f32.mxu0 %vm9491_vm1, %v9490_v27 }
 0x16d   : > { %v6578_v14 = vsel %vm654_vm3, %v6575_v49, %v6577_v38  ;;  %9257 = vmatpush3.msra.mxu1 %v10318_v60  ;;  %9258 = vmatprep.mubr.msk.f32.mxu1 %vm9491_vm1, %v9490_v27 }
 0x16e   : > { %9252 = vmatpush3.msra.mxu0 %v6578_v14  ;;  %9266 = vmatprep.subr.mxu1 %v9490_v27 }
 0x16f   : > { %9261 = vmatprep.subr.mxu0 %v9490_v27  ;;  %9254 = vmatmul.mubr.msk.f32.vlgmr.msra.gmra.mrb[56].mxu0 %vm500_vm2, %v10645_v24 }
 0x170   : > { %v6816_v2 = vpop.permute.xlu1 %6815  ;;  %v6814_v53 = vpop.permute.xlu0 %6813  ;;  %9259 = vmatmul.mubr.msk.f32.vlgmr.msra.gmra.mrb[56].mxu1 %vm500_vm2, %v10654_v61  ;;  %9263 = vmatprep.mubr.msk.f32.mxu0 %vm9491_vm1, %v9490_v27 }
 0x171   : > { %v6817_v60 = vsel %vm497_vm4, %v6814_v53, %v6816_v2  ;;  %9268 = vmatprep.mubr.msk.f32.mxu1 %vm9491_vm1, %v9490_v27 }
 0x172   : > { %9262 = vmatpush3.msra.mxu0 %v6817_v60 }
 0x173   : > { %9264 = vmatmul.mubr.msk.f32.vlgmr.msra.gmra.mrb[58].mxu0 %vm500_vm2, %v10667_v28  ;;  %9271 = vmatprep.subr.mxu0 %v9490_v27 }
 0x174   : > { %v6897_v56 = vpop.permute.xlu1 %6896  ;;  %v6895_v8 = vpop.permute.xlu0 %6894  ;;  %9272 = vmatpush3.msra.mxu0 %v10366_v52  ;;  %9273 = vmatprep.mubr.msk.f32.mxu0 %vm9491_vm1, %v9490_v27 }
 0x175   : > { %v6898_v29 = vsel %vm654_vm3, %v6895_v8, %v6897_v56  ;;  %9281 = vmatprep.subr.mxu0 %v9490_v27  ;;  %v8980_v52 = vpop.f32.mrb[1].mxu1 }
 0x176   : > { %9267 = vmatpush3.msra.mxu1 %v6898_v29  ;;  %v10759_v1 = vpop.f32.mrb[2].mxu1 }
 0x177   : > { %9269 = vmatmul.mubr.msk.f32.vlgmr.msra.gmra.mrb[58].mxu1 %vm500_vm2, %v10678_v39  ;;  %9276 = vmatprep.subr.mxu1 %v9490_v27  ;;  %v8990_v5 = vpop.f32.mrb[3].mxu1 }
 0x178   : > { %v7143_v58 = vpop.permute.xlu1 %7142  ;;  %v7141_v59 = vpop.permute.xlu0 %7140  ;;  %9274 = vmatmul.mubr.msk.f32.vlgmr.msra.gmra.mrb[60].mxu0 %vm500_vm2, %v10741_v57  ;;  %9278 = vmatprep.mubr.msk.f32.mxu1 %vm9491_vm1, %v9490_v27 }
 0x179   : > { %v7144_v41 = vsel %vm497_vm4, %v7141_v59, %v7143_v58  ;;  %9283 = vmatprep.mubr.msk.f32.mxu0 %vm9491_vm1, %v9490_v27 }
 0x17a   : > { %9277 = vmatpush3.msra.mxu1 %v7144_v41 }
 0x17b   : > { %9279 = vmatmul.mubr.msk.f32.vlgmr.msra.gmra.mrb[60].mxu1 %vm500_vm2, %v8779_v0  ;;  %9286 = vmatprep.subr.mxu1 %v9490_v27 }
 0x17c   : > { %v7224_v6 = vpop.permute.xlu1 %7223  ;;  %v7222_v7 = vpop.permute.xlu0 %7221  ;;  %9288 = vmatprep.mubr.msk.f32.mxu1 %vm9491_vm1, %v9490_v27 }
 0x17d   : > { %v7225_v62 = vsel %vm654_vm3, %v7222_v7, %v7224_v6 }
 0x17e   : > { %9282 = vmatpush3.msra.mxu0 %v7225_v62 }
 0x17f   : > { %9284 = vmatmul.mubr.msk.f32.vlgmr.msra.gmra.mrb[62].mxu0 %vm500_vm2, %v8781_v51  ;;  %9291 = vmatprep.subr.mxu0 %v9490_v27 }
 0x180   : > { %v7406_v36 = vpop.permute.xlu1 %7405  ;;  %v7404_v25 = vpop.permute.xlu0 %7403  ;;  %9292 = vmatpush3.msra.mxu0 %v10410_v40  ;;  %9293 = vmatprep.mubr.msk.f32.mxu0 %vm9491_vm1, %v9490_v27 }
 0x181   : > { %v7407_v9 = vsel %vm497_vm4, %v7404_v25, %v7406_v36  ;;  %9301 = vmatprep.subr.mxu0 %v9490_v27  ;;  %v2386_v25 = vstv %s2385_s7 }
 0x182   : > { %9287 = vmatpush3.msra.mxu1 %v7407_v9  ;;  %vm2387_vm8 = vcmp.eq.s32.totalorder %v2386_v25, 1 }
 0x183   : > { %9296 = vmatprep.subr.mxu1 %v9490_v27  ;;  %9289 = vmatmul.mubr.msk.f32.vlgmr.msra.gmra.mrb[62].mxu1 %vm500_vm2, %v10623_v12 }
 0x184   : > { %v7560_v13 = vpop.permute.xlu1 %7559  ;;  %v7558_v42 = vpop.permute.xlu0 %7557  ;;  %9294 = vmatmul.mubr.msk.f32.vlgmr.msra.gmra.mrb[64].mxu0 %vm500_vm2, %v10632_v11  ;;  %9298 = vmatprep.mubr.msk.f32.mxu1 %vm9491_vm1, %v9490_v27 }
 0x185   : > { %v7561_v40 = vsel %vm654_vm3, %v7558_v42, %v7560_v13  ;;  %9302 = vmatpush3.msra.mxu0 %v10446_v4  ;;  %9303 = vmatprep.mubr.msk.f32.mxu0 %vm9491_vm1, %v9490_v27 }
 0x186   : > { %9297 = vmatpush3.msra.mxu1 %v7561_v40  ;;  %9311 = vmatprep.subr.mxu0 %v9490_v27 }
 0x187   : > { %9306 = vmatprep.subr.mxu1 %v9490_v27  ;;  %9299 = vmatmul.mubr.msk.f32.vlgmr.msra.gmra.mrb[64].mxu1 %vm500_vm2, %v10645_v24 }
 0x188   : > { %v7799_v16 = vpop.permute.xlu1 %7798  ;;  %v7797_v10 = vpop.permute.xlu0 %7796  ;;  %9304 = vmatmul.mubr.msk.f32.vlgmr.msra.gmra.mrb[66].mxu0 %vm500_vm2, %v10654_v61  ;;  %9308 = vmatprep.mubr.msk.f32.mxu1 %vm9491_vm1, %v9490_v27 }
 0x189   : > { %v7800_v4 = vsel %vm497_vm4, %v7797_v10, %v7799_v16  ;;  %9313 = vmatprep.mubr.msk.f32.mxu0 %vm9491_vm1, %v9490_v27 }
 0x18a   : > { %9307 = vmatpush3.msra.mxu1 %v7800_v4 }
 0x18b   : > { %9309 = vmatmul.mubr.msk.f32.vlgmr.msra.gmra.mrb[66].mxu1 %vm500_vm2, %v10667_v28  ;;  %9316 = vmatprep.subr.mxu1 %v9490_v27 }
 0x18c   : > { %v7880_v63 = vpop.permute.xlu1 %7879  ;;  %v7878_v19 = vpop.permute.xlu0 %7877  ;;  %9317 = vmatpush3.msra.mxu1 %v10483_v30  ;;  %9318 = vmatprep.mubr.msk.f32.mxu1 %vm9491_vm1, %v9490_v27 }
 0x18d   : > { %v7881_v22 = vsel %vm654_vm3, %v7878_v19, %v7880_v63  ;;  %9326 = vmatprep.subr.mxu1 %v9490_v27 }
 0x18e   : > { %9312 = vmatpush3.msra.mxu0 %v7881_v22 }
 0x18f   : > { %9314 = vmatmul.mubr.msk.f32.vlgmr.msra.gmra.mrb[68].mxu0 %vm500_vm2, %v10678_v39  ;;  %9321 = vmatprep.subr.mxu0 %v9490_v27  ;;  %v10823_v39 = vand.u32 127, %v398_v33 }
 0x190   : > { %v8127_v21 = vpop.permute.xlu1 %8126  ;;  %v8125_v32 = vpop.permute.xlu0 %8124  ;;  %9319 = vmatmul.mubr.msk.f32.vlgmr.msra.gmra.mrb[68].mxu1 %vm500_vm2, %v10741_v57  ;;  %9323 = vmatprep.mubr.msk.f32.mxu0 %vm9491_vm1, %v9490_v27 }
 0x191   : > { %v8128_v30 = vsel %vm497_vm4, %v8125_v32, %v8127_v21  ;;  %9328 = vmatprep.mubr.msk.f32.mxu1 %vm9491_vm1, %v9490_v27  ;;  %vm400_vm5 = vcmp.lt.s32.totalorder %v10823_v39, 16 }
 0x192   : > { %9322 = vmatpush3.msra.mxu0 %v8128_v30  ;;  %vm1404_vm7 = vmand %vm400_vm5, %vm1403_vm6 }
 0x193   : > { %9324 = vmatmul.mubr.msk.f32.vlgmr.msra.gmra.mrb[70].mxu0 %vm500_vm2, %v8779_v0  ;;  %v8532_v14 = vsel %vm1404_vm7, 1.0, %v9490_v27  ;;  %vm2388_vm9 = vmand %vm400_vm5, %vm2387_vm8  ;;  %vm8309_vm7 = vcmask 15368  }
 0x194   : > { %v8208_v12 = vpop.permute.xlu1 %8207  ;;  %v8206_v55 = vpop.permute.xlu0 %8205  ;;  %v8574_v22 = vsel %vm2388_vm9, 1.0, %v9490_v27 }
 0x195   : > { %v8209_v11 = vsel %vm654_vm3, %v8206_v55, %v8208_v12 }
 0x196   : > { %9327 = vmatpush3.msra.mxu1 %v8209_v11 }
 0x197   : > { %9329 = vmatmul.mubr.msk.f32.vlgmr.msra.gmra.mrb[70].mxu1 %vm500_vm2, %v8781_v51 }
 0x1b1   : > { %v10828_v33 = vpop.permute.xlu0 %1395 }
 0x1b3   : > { %v570_v23 = vpop.f32.mrb[0].mxu0 }
 0x1b4   : > { %v645_v50 = vadd.f32 %v10744_v54, %v570_v23  ;;  %v8975_v24 = vpop.f32.mrb[1].mxu0 }
 0x1b7   : > { %v726_v26 = vpop.f32.mrb[2].mxu0 }
 0x1b8   : > { %v730_v61 = vadd.f32 %v726_v26, %v645_v50  ;;  %v8985_v15 = vpop.f32.mrb[3].mxu0 }
 0x1ba   : > { %v880_v31 = vadd.f32 %v10759_v1, %v730_v61 }
 0x1bb   : > { %v975_v28 = vpop.f32.mrb[4].mxu0 }
 0x1bc   : > { %v979_v3 = vadd.f32 %v975_v28, %v880_v31  ;;  %v1057_v48 = vpop.f32.mrb[4].mxu1  ;;  %v8995_v35 = vpop.f32.mrb[5].mxu0 }
 0x1bd   : > { %v9000_v43 = vpop.f32.mrb[5].mxu1 }
 0x1be   : > { %v1061_v44 = vadd.f32 %v1057_v48, %v979_v3 }
 0x1bf   : > { %v1207_v17 = vpop.f32.mrb[6].mxu0 }
 0x1c0   : > { %v1211_v37 = vadd.f32 %v1207_v17, %v1061_v44  ;;  %v9005_v45 = vpop.f32.mrb[7].mxu0  ;;  %v3370_v44 = vstv %s3369_s10 }
 0x1c1   : > { %vm3371_vm10 = vcmp.eq.s32.totalorder %v3370_v44, 1 }
 0x1c2   : > { %v1306_v18 = vpop.f32.mrb[6].mxu1  ;;  %vm3372_vm11 = vmand %vm400_vm5, %vm3371_vm10 }
 0x1c3   : > { %v1310_v46 = vadd.f32 %v1306_v18, %v1211_v37  ;;  %v9010_v47 = vpop.f32.mrb[7].mxu1 }
 0x1c4   : > { %v1388_v20 = vpop.f32.mrb[8].mxu0 }
 0x1c5   : > { %v1392_v38 = vadd.f32 %v1388_v20, %v1310_v46  ;;  %v9015_v49 = vpop.f32.mrb[9].mxu0 }
 0x1c7   : > { %v1575_v2 = vpop.f32.mrb[8].mxu1  ;;  %v1398_v53 = vadd.f32 %v10828_v33, %v1392_v38 }
 0x1c8   : > { %v9020_v60 = vpop.f32.mrb[9].mxu1 }
 0x1c9   : > { %v1407_v56 = vmul.f32 %v8532_v14, %v1398_v53  ;;  %1415 = vst [vmem:[%s9677_s30] sm:$0xff] %v1398_v53 }
 0x1ca   : > { %v1649_v8 = vpop.f32.mrb[10].mxu0 }
 0x1cb   : > { %v1650_v29 = vadd.f32 %v1649_v8, %v1575_v2  ;;  %v1729_v57 = vpop.f32.mrb[10].mxu1  ;;  %v9025_v54 = vpop.f32.mrb[11].mxu0  ;;  %1408 = vadd.xlane.f32.xlu1 %v1407_v56  ;;  %v1411_v52 = vmul.f32 %v1407_v56, %v1398_v53  ;;  %v8616_v2 = vsel %vm3372_vm11, 1.0, %v9490_v27 }
 0x1cc   : > { %v9030_v58 = vpop.f32.mrb[11].mxu1 }
 0x1cd   : > { %v1733_v59 = vadd.f32 %v1729_v57, %v1650_v29  ;;  %1412 = vadd.xlane.f32.xlu0 %v1411_v52 }
 0x1cf   : > { %v1870_v0 = vpop.f32.mrb[12].mxu0 }
 0x1d0   : > { %v1874_v41 = vadd.f32 %v1870_v0, %v1733_v59  ;;  %v9035_v1 = vpop.f32.mrb[13].mxu0 }
 0x1d2   : > { %v1968_v5 = vpop.f32.mrb[12].mxu1 }
 0x1d3   : > { %v1972_v6 = vadd.f32 %v1968_v5, %v1874_v41  ;;  %v9040_v7 = vpop.f32.mrb[13].mxu1  ;;  %v2049_v51 = vpop.f32.mrb[14].mxu0 }
 0x1d4   : > { %v9045_v62 = vpop.f32.mrb[15].mxu0 }
 0x1d5   : > { %v2053_v36 = vadd.f32 %v2049_v51, %v1972_v6 }
 0x1d7   : > { %v2198_v9 = vpop.f32.mrb[14].mxu1 }
 0x1d8   : > { %v2202_v13 = vadd.f32 %v2198_v9, %v2053_v36  ;;  %v9050_v42 = vpop.f32.mrb[15].mxu1 }
 0x1da   : > { %v2296_v40 = vpop.f32.mrb[16].mxu0 }
 0x1db   : > { %v2300_v16 = vadd.f32 %v2296_v40, %v2202_v13  ;;  %v9055_v10 = vpop.f32.mrb[17].mxu0  ;;  %v4354_v13 = vstv %s4353_s1 }
 0x1dc   : > { %v2377_v4 = vpop.f32.mrb[16].mxu1  ;;  %vm4355_vm12 = vcmp.eq.s32.totalorder %v4354_v13, 1 }
 0x1dd   : > { %v2381_v63 = vadd.f32 %v2377_v4, %v2300_v16  ;;  %v9060_v19 = vpop.f32.mrb[17].mxu1  ;;  %vm4356_vm13 = vmand %vm400_vm5, %vm4355_vm12 }
 0x1df   : > { %v2559_v21 = vpop.f32.mrb[18].mxu0  ;;  %v2382_v32 = vadd.f32 %v2381_v63, %v10828_v33 }
 0x1e0   : > { %v9065_v30 = vpop.f32.mrb[19].mxu0 }
 0x1e1   : > { %v2391_v12 = vmul.f32 %v8574_v22, %v2382_v32  ;;  %2399 = vst [vmem:[%s9677_s30 + $0x8] sm:$0xff] %v2382_v32 }
 0x1e2   : > { %v2633_v55 = vpop.f32.mrb[18].mxu1 }
 0x1e3   : > { %v2634_v11 = vadd.f32 %v2633_v55, %v2559_v21  ;;  %v2713_v23 = vpop.f32.mrb[20].mxu0  ;;  %v9070_v50 = vpop.f32.mrb[19].mxu1  ;;  %2392 = vadd.xlane.f32.xlu1 %v2391_v12  ;;  %v2395_v24 = vmul.f32 %v2391_v12, %v2382_v32  ;;  %v8658_v21 = vsel %vm4356_vm13, 1.0, %v9490_v27 }
 0x1e4   : > { %v9075_v26 = vpop.f32.mrb[21].mxu0 }
 0x1e5   : > { %v2717_v61 = vadd.f32 %v2713_v23, %v2634_v11  ;;  %2396 = vadd.xlane.f32.xlu0 %v2395_v24 }
 0x1e7   : > { %v2854_v15 = vpop.f32.mrb[20].mxu1 }
 0x1e8   : > { %v2858_v31 = vadd.f32 %v2854_v15, %v2717_v61  ;;  %v9080_v28 = vpop.f32.mrb[21].mxu1 }
 0x1ea   : > { %v2952_v3 = vpop.f32.mrb[22].mxu0 }
 0x1eb   : > { %v2956_v48 = vadd.f32 %v2952_v3, %v2858_v31  ;;  %v3033_v35 = vpop.f32.mrb[22].mxu1  ;;  %v9085_v43 = vpop.f32.mrb[23].mxu0 }
 0x1ec   : > { %v9090_v34 = vpop.f32.mrb[23].mxu1 }
 0x1ed   : > { %v3037_v17 = vadd.f32 %v3033_v35, %v2956_v48 }
 0x1ef   : > { %v3182_v37 = vpop.f32.mrb[24].mxu0 }
 0x1f0   : > { %v3186_v45 = vadd.f32 %v3182_v37, %v3037_v17  ;;  %v3280_v18 = vpop.f32.mrb[24].mxu1  ;;  %v9095_v46 = vpop.f32.mrb[25].mxu0 }
 0x1f1   : > { %v9100_v47 = vpop.f32.mrb[25].mxu1 }
 0x1f2   : > { %v3284_v20 = vadd.f32 %v3280_v18, %v3186_v45  ;;  %v5338_v45 = vstv %s5337_s20 }
 0x1f3   : > { %v3361_v38 = vpop.f32.mrb[26].mxu0  ;;  %vm5339_vm14 = vcmp.eq.s32.totalorder %v5338_v45, 1 }
 0x1f4   : > { %v3365_v49 = vadd.f32 %v3361_v38, %v3284_v20  ;;  %v9105_v14 = vpop.f32.mrb[27].mxu0  ;;  %vm5340_vm15 = vmand %vm400_vm5, %vm5339_vm14 }
 0x1f6   : > { %v3366_v53 = vadd.f32 %v3365_v49, %v10828_v33 }
 0x1f7   : > { %v3543_v60 = vpop.f32.mrb[26].mxu1 }
 0x1f8   : > { %3383 = vst [vmem:[%s9677_s30 + $0x10] sm:$0xff] %v3366_v53  ;;  %v3375_v56 = vmul.f32 %v8616_v2, %v3366_v53  ;;  %v9110_v8 = vpop.f32.mrb[27].mxu1 }
 0x1f9   : > { %v3617_v29 = vpop.f32.mrb[28].mxu0 }
 0x1fa   : > { %3376 = vadd.xlane.f32.xlu1 %v3375_v56  ;;  %v3379_v57 = vmul.f32 %v3375_v56, %v3366_v53  ;;  %v3618_v54 = vadd.f32 %v3617_v29, %v3543_v60  ;;  %v9115_v52 = vpop.f32.mrb[29].mxu0  ;;  %v8700_v53 = vsel %vm5340_vm15, 1.0, %v9490_v27 }
 0x1fb   : > { %v3697_v58 = vpop.f32.mrb[28].mxu1 }
 0x1fc   : > { %3380 = vadd.xlane.f32.xlu0 %v3379_v57  ;;  %v3701_v59 = vadd.f32 %v3697_v58, %v3618_v54  ;;  %v9120_v0 = vpop.f32.mrb[29].mxu1 }
 0x1fd   : > { %v3838_v41 = vpop.f32.mrb[30].mxu0 }
 0x1fe   : > { %v3842_v1 = vadd.f32 %v3838_v41, %v3701_v59  ;;  %v9125_v5 = vpop.f32.mrb[31].mxu0 }
 0x1ff   : > { %v3936_v6 = vpop.f32.mrb[30].mxu1 }
 0x200   : > { %v3940_v7 = vadd.f32 %v3936_v6, %v3842_v1  ;;  %v9130_v51 = vpop.f32.mrb[31].mxu1 }
 0x202   : > { %v4017_v62 = vpop.f32.mrb[32].mxu0 }
 0x203   : > { %v4021_v36 = vadd.f32 %v4017_v62, %v3940_v7  ;;  %v4166_v25 = vpop.f32.mrb[32].mxu1  ;;  %v9135_v9 = vpop.f32.mrb[33].mxu0 }
 0x204   : > { %v9140_v42 = vpop.f32.mrb[33].mxu1 }
 0x205   : > { %v4170_v40 = vadd.f32 %v4166_v25, %v4021_v36  ;;  %v6322_v42 = vstv %s6321_s23 }
 0x206   : > { %v4264_v16 = vpop.f32.mrb[34].mxu0  ;;  %vm6323_vm0 = vcmp.eq.s32.totalorder %v6322_v42, 1 }
 0x207   : > { %v4268_v10 = vadd.f32 %v4264_v16, %v4170_v40  ;;  %v9145_v4 = vpop.f32.mrb[35].mxu0  ;;  %vm6324_vm1 = vmand %vm400_vm5, %vm6323_vm0 }
 0x20a   : > { %v4345_v63 = vpop.f32.mrb[34].mxu1 }
 0x20b   : > { %v4349_v19 = vadd.f32 %v4345_v63, %v4268_v10  ;;  %v9150_v22 = vpop.f32.mrb[35].mxu1 }
 0x20d   : > { %v4350_v32 = vadd.f32 %v4349_v19, %v10828_v33 }
 0x20e   : > { %v4527_v30 = vpop.f32.mrb[36].mxu0 }
 0x20f   : > { %4367 = vst [vmem:[%s9677_s30 + $0x18] sm:$0xff] %v4350_v32  ;;  %v4359_v12 = vmul.f32 %v8658_v21, %v4350_v32  ;;  %v4601_v55 = vpop.f32.mrb[36].mxu1  ;;  %v9155_v11 = vpop.f32.mrb[37].mxu0 }
 0x210   : > { %v4602_v23 = vadd.f32 %v4601_v55, %v4527_v30  ;;  %v9160_v50 = vpop.f32.mrb[37].mxu1 }
 0x211   : > { %4360 = vadd.xlane.f32.xlu1 %v4359_v12  ;;  %v4363_v24 = vmul.f32 %v4359_v12, %v4350_v32  ;;  %v8742_v32 = vsel %vm6324_vm1, 1.0, %v9490_v27 }
 0x212   : > { %v4681_v26 = vpop.f32.mrb[38].mxu0 }
 0x213   : > { %4364 = vadd.xlane.f32.xlu0 %v4363_v24  ;;  %v4685_v61 = vadd.f32 %v4681_v26, %v4602_v23  ;;  %v4822_v15 = vpop.f32.mrb[38].mxu1  ;;  %v9165_v31 = vpop.f32.mrb[39].mxu0 }
 0x214   : > { %v9170_v28 = vpop.f32.mrb[39].mxu1 }
 0x215   : > { %v4826_v3 = vadd.f32 %v4822_v15, %v4685_v61 }
 0x216   : > { %v4920_v48 = vpop.f32.mrb[40].mxu0 }
 0x217   : > { %v4924_v35 = vadd.f32 %v4920_v48, %v4826_v3  ;;  %v9175_v43 = vpop.f32.mrb[41].mxu0 }
 0x21a   : > { %v5001_v34 = vpop.f32.mrb[40].mxu1 }
 0x21b   : > { %v5005_v44 = vadd.f32 %v5001_v34, %v4924_v35  ;;  %v5150_v17 = vpop.f32.mrb[42].mxu0  ;;  %v9180_v37 = vpop.f32.mrb[41].mxu1 }
 0x21c   : > { %v9185_v18 = vpop.f32.mrb[43].mxu0 }
 0x21d   : > { %v5154_v46 = vadd.f32 %v5150_v17, %v5005_v44  ;;  %v7305_v18 = vstv %s7304_s11 }
 0x21e   : > { %v5248_v47 = vpop.f32.mrb[42].mxu1  ;;  %vm7306_vm2 = vcmp.eq.s32.totalorder %v7305_v18, 1  ;;  %v8303_v18 = vld [vmem:[%s9672_s14] sm:$0xff] }
 0x21f   : > { %v5252_v20 = vadd.f32 %v5248_v47, %v5154_v46  ;;  %v9190_v38 = vpop.f32.mrb[43].mxu1  ;;  %vm7307_vm3 = vmand %vm400_vm5, %vm7306_vm2 }
 0x222   : > { %v5329_v49 = vpop.f32.mrb[44].mxu0 }
 0x223   : > { %v5333_v14 = vadd.f32 %v5329_v49, %v5252_v20  ;;  %v9195_v2 = vpop.f32.mrb[45].mxu0 }
 0x225   : > { %v5334_v60 = vadd.f32 %v5333_v14, %v10828_v33 }
 0x226   : > { %v5511_v56 = vpop.f32.mrb[44].mxu1 }
 0x227   : > { %5351 = vst [vmem:[%s9677_s30 + $0x20] sm:$0xff] %v5334_v60  ;;  %v5343_v8 = vmul.f32 %v8700_v53, %v5334_v60  ;;  %v5585_v29 = vpop.f32.mrb[46].mxu0  ;;  %v9200_v57 = vpop.f32.mrb[45].mxu1 }
 0x228   : > { %v5586_v54 = vadd.f32 %v5585_v29, %v5511_v56  ;;  %v9205_v52 = vpop.f32.mrb[47].mxu0 }
 0x229   : > { %5344 = vadd.xlane.f32.xlu1 %v5343_v8  ;;  %v5347_v58 = vmul.f32 %v5343_v8, %v5334_v60  ;;  %v8783_v60 = vsel %vm7307_vm3, 1.0, %v9490_v27 }
 0x22a   : > { %v5665_v59 = vpop.f32.mrb[46].mxu1 }
 0x22b   : > { %5348 = vadd.xlane.f32.xlu0 %v5347_v58  ;;  %v5669_v0 = vadd.f32 %v5665_v59, %v5586_v54  ;;  %v5806_v41 = vpop.f32.mrb[48].mxu0  ;;  %v9210_v1 = vpop.f32.mrb[47].mxu1 }
 0x22c   : > { %v9215_v5 = vpop.f32.mrb[49].mxu0 }
 0x22d   : > { %v5810_v6 = vadd.f32 %v5806_v41, %v5669_v0 }
 0x22e   : > { %v5904_v7 = vpop.f32.mrb[48].mxu1 }
 0x22f   : > { %v5908_v51 = vadd.f32 %v5904_v7, %v5810_v6  ;;  %v9220_v62 = vpop.f32.mrb[49].mxu1 }
 0x232   : > { %v5985_v36 = vpop.f32.mrb[50].mxu0 }
 0x233   : > { %v5989_v25 = vadd.f32 %v5985_v36, %v5908_v51  ;;  %v6134_v9 = vpop.f32.mrb[50].mxu1  ;;  %v9225_v13 = vpop.f32.mrb[51].mxu0 }
 0x234   : > { %v9230_v40 = vpop.f32.mrb[51].mxu1 }
 0x235   : > { %v6138_v16 = vadd.f32 %v6134_v9, %v5989_v25  ;;  %v8289_v40 = vstv %s8288_s17 }
 0x236   : > { %v6232_v10 = vpop.f32.mrb[52].mxu0  ;;  %vm8290_vm4 = vcmp.eq.s32.totalorder %v8289_v40, 1 }
 0x237   : > { %v6236_v4 = vadd.f32 %v6232_v10, %v6138_v16  ;;  %v9235_v63 = vpop.f32.mrb[53].mxu0  ;;  %vm8291_vm6 = vmand %vm400_vm5, %vm8290_vm4  ;;  %vm8305_vm5 = vcmask 7168  }
 0x23a   : > { %v6313_v19 = vpop.f32.mrb[52].mxu1 }
 0x23b   : > { %v6317_v22 = vadd.f32 %v6313_v19, %v6236_v4  ;;  %v9240_v21 = vpop.f32.mrb[53].mxu1 }
 0x23d   : > { %v6318_v30 = vadd.f32 %v6317_v22, %v10828_v33 }
 0x23e   : > { %v6495_v12 = vpop.f32.mrb[54].mxu0 }
 0x23f   : > { %6335 = vst [vmem:[%s9677_s30 + $0x28] sm:$0xff] %v6318_v30  ;;  %v6327_v55 = vmul.f32 %v8742_v32, %v6318_v30  ;;  %v6569_v11 = vpop.f32.mrb[54].mxu1  ;;  %v9245_v23 = vpop.f32.mrb[55].mxu0 }
 0x240   : > { %v6570_v50 = vadd.f32 %v6569_v11, %v6495_v12  ;;  %v9250_v24 = vpop.f32.mrb[55].mxu1 }
 0x241   : > { %6328 = vadd.xlane.f32.xlu1 %v6327_v55  ;;  %v6331_v26 = vmul.f32 %v6327_v55, %v6318_v30  ;;  %v8824_v30 = vsel %vm8291_vm6, 1.0, %v9490_v27 }
 0x242   : > { %v6649_v61 = vpop.f32.mrb[56].mxu0 }
 0x243   : > { %6332 = vadd.xlane.f32.xlu0 %v6331_v26  ;;  %v6653_v15 = vadd.f32 %v6649_v61, %v6570_v50  ;;  %v6790_v31 = vpop.f32.mrb[56].mxu1  ;;  %v9255_v28 = vpop.f32.mrb[57].mxu0 }
 0x244   : > { %v9260_v3 = vpop.f32.mrb[57].mxu1 }
 0x245   : > { %v6794_v48 = vadd.f32 %v6790_v31, %v6653_v15 }
 0x246   : > { %v6888_v35 = vpop.f32.mrb[58].mxu0 }
 0x247   : > { %v6892_v43 = vadd.f32 %v6888_v35, %v6794_v48  ;;  %v9265_v34 = vpop.f32.mrb[59].mxu0 }
 0x24a   : > { %v6969_v44 = vpop.f32.mrb[58].mxu1 }
 0x24b   : > { %v6973_v17 = vadd.f32 %v6969_v44, %v6892_v43  ;;  %v7117_v37 = vpop.f32.mrb[60].mxu0  ;;  %v9270_v45 = vpop.f32.mrb[59].mxu1 }
 0x24c   : > { %v9275_v46 = vpop.f32.mrb[61].mxu0 }
 0x24d   : > { %v7121_v47 = vadd.f32 %v7117_v37, %v6973_v17 }
 0x24e   : > { %v7215_v20 = vpop.f32.mrb[60].mxu1 }
 0x24f   : > { %v7219_v38 = vadd.f32 %v7215_v20, %v7121_v47  ;;  %v9280_v49 = vpop.f32.mrb[61].mxu1 }
 0x252   : > { %v7296_v14 = vpop.f32.mrb[62].mxu0 }
 0x253   : > { %v7300_v2 = vadd.f32 %v7296_v14, %v7219_v38  ;;  %v9285_v53 = vpop.f32.mrb[63].mxu0 }
 0x255   : > { %v7301_v56 = vadd.f32 %v7300_v2, %v10828_v33 }
 0x256   : > { %v7478_v8 = vpop.f32.mrb[62].mxu1 }
 0x257   : > { %7318 = vst [vmem:[%s9677_s30 + $0x30] sm:$0xff] %v7301_v56  ;;  %v7310_v29 = vmul.f32 %v8783_v60, %v7301_v56  ;;  %v7552_v57 = vpop.f32.mrb[64].mxu0  ;;  %v9290_v54 = vpop.f32.mrb[63].mxu1 }
 0x258   : > { %v7553_v52 = vadd.f32 %v7552_v57, %v7478_v8  ;;  %v9295_v58 = vpop.f32.mrb[65].mxu0  ;;  %v1409_v23 = vpop.xlane.xlu1 %1408 }
 0x259   : > { %7311 = vadd.xlane.f32.xlu1 %v7310_v29  ;;  %v7314_v59 = vmul.f32 %v7310_v29, %v7301_v56 }
 0x25a   : > { %v7632_v0 = vpop.f32.mrb[64].mxu1  ;;  %v1413_v24 = vpop.xlane.xlu0 %1412 }
 0x25b   : > { %7315 = vadd.xlane.f32.xlu0 %v7314_v59  ;;  %v7636_v41 = vadd.f32 %v7632_v0, %v7553_v52  ;;  %v7773_v1 = vpop.f32.mrb[66].mxu0  ;;  %v9300_v5 = vpop.f32.mrb[65].mxu1 }
 0x25c   : > { %v9305_v6 = vpop.f32.mrb[67].mxu0 }
 0x25d   : > { %v7777_v7 = vadd.f32 %v7773_v1, %v7636_v41 }
 0x25e   : > { %v7871_v51 = vpop.f32.mrb[66].mxu1 }
 0x25f   : > { %v7875_v62 = vadd.f32 %v7871_v51, %v7777_v7  ;;  %v9310_v36 = vpop.f32.mrb[67].mxu1 }
 0x262   : > { %v7952_v25 = vpop.f32.mrb[68].mxu0 }
 0x263   : > { %v7956_v9 = vadd.f32 %v7952_v25, %v7875_v62  ;;  %v8101_v13 = vpop.f32.mrb[68].mxu1  ;;  %v9315_v42 = vpop.f32.mrb[69].mxu0 }
 0x264   : > { %v9320_v16 = vpop.f32.mrb[69].mxu1 }
 0x265   : > { %v8105_v10 = vadd.f32 %v8101_v13, %v7956_v9 }
 0x266   : > { %v8199_v4 = vpop.f32.mrb[70].mxu0 }
 0x267   : > { %v8203_v63 = vadd.f32 %v8199_v4, %v8105_v10  ;;  %v9325_v19 = vpop.f32.mrb[71].mxu0 }
 0x26a   : > { %v8280_v22 = vpop.f32.mrb[70].mxu1 }
 0x26b   : > { %v8284_v21 = vadd.f32 %v8280_v22, %v8203_v63  ;;  %v9330_v32 = vpop.f32.mrb[71].mxu1 }
 0x26d   : > { %v8285_v12 = vadd.f32 %v8284_v21, %v10828_v33 }
 0x26f   : > { %8302 = vst [vmem:[%s9677_s30 + $0x38] sm:$0xff] %v8285_v12  ;;  %v8294_v55 = vmul.f32 %v8824_v30, %v8285_v12 }
 0x270   : > { %v2393_v50 = vpop.xlane.xlu1 %2392 }
 0x271   : > { %8295 = vadd.xlane.f32.xlu1 %v8294_v55  ;;  %v8298_v11 = vmul.f32 %v8294_v55, %v8285_v12  ;;  %v2394_v28 = vadd.f32 %v2393_v50, %v1409_v23 }
 0x272   : > { %v2397_v61 = vpop.xlane.xlu0 %2396 }
 0x273   : > { %8299 = vadd.xlane.f32.xlu0 %v8298_v11  ;;  %v2398_v17 = vadd.f32 %v2397_v61, %v1413_v24 }
 0x287   : > { %v3377_v26 = vpop.xlane.xlu1 %3376 }
 0x288   : > { %v3378_v3 = vadd.f32 %v3377_v26, %v2394_v28 }
 0x289   : > { %v3381_v15 = vpop.xlane.xlu0 %3380 }
 0x28a   : > { %v3382_v47 = vadd.f32 %v3381_v15, %v2398_v17 }
 0x29e   : > { %v4361_v39 = vpop.xlane.xlu1 %4360 }
 0x29f   : > { %v4362_v35 = vadd.f32 %v4361_v39, %v3378_v3 }
 0x2a0   : > { %v4365_v48 = vpop.xlane.xlu0 %4364 }
 0x2a1   : > { %v4366_v38 = vadd.f32 %v4365_v48, %v3382_v47 }
 0x2b6   : > { %v5345_v31 = vpop.xlane.xlu1 %5344 }
 0x2b7   : > { %v5346_v33 = vadd.f32 %v5345_v31, %v4362_v35 }
 0x2b8   : > { %v5349_v43 = vpop.xlane.xlu0 %5348 }
 0x2b9   : > { %v5350_v2 = vadd.f32 %v5349_v43, %v4366_v38 }
 0x2ce   : > { %v6329_v27 = vpop.xlane.xlu1 %6328 }
 0x2cf   : > { %v6330_v44 = vadd.f32 %v6329_v27, %v5346_v33 }
 0x2d0   : > { %v6333_v45 = vpop.xlane.xlu0 %6332 }
 0x2d1   : > { %v6334_v53 = vadd.f32 %v6333_v45, %v5350_v2 }
 0x2e6   : > { %v7312_v34 = vpop.xlane.xlu1 %7311 }
 0x2e7   : > { %v7313_v37 = vadd.f32 %v7312_v34, %v6330_v44 }
 0x2e8   : > { %v7316_v14 = vpop.xlane.xlu0 %7315 }
 0x2e9   : > { %v7317_v56 = vadd.f32 %v7316_v14, %v6334_v53 }
 0x2fe   : > { %v8296_v46 = vpop.xlane.xlu1 %8295 }
 0x2ff   : > { %v8297_v20 = vadd.f32 %v8296_v46, %v7313_v37 }
 0x300   : > { %v8300_v60 = vpop.xlane.xlu0 %8299 }
 0x301   : > { %v8304_v49 = vadd.f32 %v8303_v18, %v8297_v20  ;;  %v8301_v8 = vadd.f32 %v8300_v60, %v7317_v56 }
 0x303   : > { %8306 = vst.msk [vmem:[%s9672_s14] sm:$0xff] %vm8305_vm5, %v8304_v49 }
 0x30a   : > { %v8307_v29 = vld [vmem:[%s9672_s14] sm:$0xff] }
 0x30b   : > { %v8308_v57 = vadd.f32 %v8307_v29, %v8301_v8 }
 0x30d   : > { %8310 = vst.msk [vmem:[%s9672_s14] sm:$0xff] %vm8309_vm7, %v8308_v57 }
 0x30e PF: > { %s16_s26 = sadd.s32 1, %s9484_s26   ;;  %s10925_s18 = smov %s9456_s19 }
 0x30f   : > { %p13_p10 = scmp.ge.s32.totalorder %s16_s26, 6   ;;  %s10926_s19 = smov %s9603_s16 }
 0x310   : > { %s10927_s20 = smov %s9464_s21  ;;  %s10928_s21 = smov %s9600_s15 }
 0x311   : > { %s10929_s22 = smov %s9476_s24  ;;  %s10930_s23 = smov %s9480_s25 }
 0x312   : > { %s10931_s24 = smov %s9573_s29  ;;  %s10932_s25 = smov %s10936_s28 }
 0x313   :  { %15 = sbr.rel (!%p13_p10) target bundleno = 8 (0x8), region = 227 }

</bundles_post_ra>
